<compile_context>
chip_gen: v5e
topology: v5e:2x2
jax: 0.10.0
libtpu: 0.0.40
codegen_flags: <defaults>
</compile_context>

<pallas_src>
import functools

import jax
import jax.numpy as jnp
from jax import lax
from jax.experimental import pallas as pl
from jax.experimental.pallas import tpu as pltpu

_GAMMA_RELU = 1.7139588594436646   # _nonlin_gamma['relu']


# ----------------------------------------------------------------------------
# Fused Bottleneck kernel (one image per grid step)
# ----------------------------------------------------------------------------
def _bottleneck_kernel(x_ref, w1_ref, w2_ref, w3_ref, o_ref, a1p_ref, *,
                       H, W, Cin, Cmid, Cout):
    """x_ref:(1,H,W,Cin) bf16
       w1_ref:(Cin,Cmid) bf16   (gamma*beta folded in)
       w2_ref:(9,Cmid,Cmid) bf16 (gamma folded in, tap t = 3*dy + dx)
       w3_ref:(Cmid,Cout) bf16  (gamma*alpha folded in)
       o_ref:(1,H,W,Cout) bf16
       a1p_ref:(H+2,W+2,Cmid) bf16 scratch -- zero-padded act(conv1) halo."""

    # --- act(x)*gamma*beta -> conv1 (1x1): scales are folded into w1 ---------
    x0 = x_ref[...].reshape(H * W, Cin)                       # bf16
    a0 = jnp.maximum(x0, 0.0)                                 # relu (exact)
    y1 = jnp.dot(a0, w1_ref[...],
                 preferred_element_type=jnp.float32)          # (H*W, Cmid) f32

    # --- zero only the 1-pixel border of the halo scratch --------------------
    # Interior is fully overwritten every step; border-only zeroing is cheap
    # and stays correct even when the grid is sharded across TensorCores.
    a1p_ref[0:1, :, :] = jnp.zeros((1, W + 2, Cmid), jnp.bfloat16)
    a1p_ref[H + 1:H + 2, :, :] = jnp.zeros((1, W + 2, Cmid), jnp.bfloat16)
    a1p_ref[:, 0:1, :] = jnp.zeros((H + 2, 1, Cmid), jnp.bfloat16)
    a1p_ref[:, W + 1:W + 2, :] = jnp.zeros((H + 2, 1, Cmid), jnp.bfloat16)

    # --- act(conv1)*gamma -> bf16 halo scratch (gamma folded into w2) --------
    a1 = jnp.maximum(y1, 0.0).astype(jnp.bfloat16)
    a1p_ref[1:H + 1, 1:W + 1, :] = a1.reshape(H, W, Cmid)

    # --- conv2 (3x3, pad=1): 9 shifted-tap matmuls accumulated in f32 --------
    # Avoids the lane-sparse im2col patch stores that saturate the vst slot
    # when Cmid < 128; MXU underfill (K=N=Cmid) is free at these sizes.
    y2 = None
    t = 0
    for dy in range(3):
        for dx in range(3):
            tap = a1p_ref[dy:dy + H, dx:dx + W, :].reshape(H * W, Cmid)
            contrib = jnp.dot(tap, w2_ref[t],
                              preferred_element_type=jnp.float32)
            y2 = contrib if y2 is None else y2 + contrib
            t += 1

    # --- act(conv2)*gamma -> conv3 (1x1) -> *alpha + identity ----------------
    a2 = jnp.maximum(y2, 0.0).astype(jnp.bfloat16)
    y3 = jnp.dot(a2, w3_ref[...],
                 preferred_element_type=jnp.float32)          # (H*W, Cout) f32
    # Re-read x only now (short identity live range; VMEM reload is cheap).
    out = y3.reshape(1, H, W, Cout) + x_ref[...].astype(jnp.float32)
    o_ref[...] = out.astype(o_ref.dtype)


def _bottleneck_call(x_nhwc_bf16, w1m, w2m, w3m):
    N, H, W, Cin = x_nhwc_bf16.shape
    Cmid = w1m.shape[1]
    Cout = w3m.shape[1]
    assert Cout == Cin, "residual add requires inplanes == planes * expansion"
    kern = functools.partial(_bottleneck_kernel,
                             H=H, W=W, Cin=Cin, Cmid=Cmid, Cout=Cout)
    return pl.pallas_call(
        kern,
        out_shape=jax.ShapeDtypeStruct((N, H, W, Cout), jnp.bfloat16),
        grid_spec=pltpu.PrefetchScalarGridSpec(
            num_scalar_prefetch=0,
            grid=(N,),                          # parallel over batch
            in_specs=[
                pl.BlockSpec((1, H, W, Cin), lambda n: (n, 0, 0, 0)),
                pl.BlockSpec(w1m.shape, lambda n: (0, 0)),
                pl.BlockSpec(w2m.shape, lambda n: (0, 0, 0)),
                pl.BlockSpec(w3m.shape, lambda n: (0, 0)),
            ],
            out_specs=pl.BlockSpec((1, H, W, Cout), lambda n: (n, 0, 0, 0)),
            scratch_shapes=[
                pltpu.VMEM((H + 2, W + 2, Cmid), jnp.bfloat16),  # padded act(conv1)
            ]),
        compiler_params=pltpu.CompilerParams(
            dimension_semantics=("parallel",),
            vmem_limit_bytes=32 * 1024 * 1024),
    )(x_nhwc_bf16, w1m, w2m, w3m)


# ----------------------------------------------------------------------------
# ScaledStdConv2d weight standardization (parameter preprocessing, plain JAX)
# ----------------------------------------------------------------------------
def _scaled_std_weight(w_oihw, gain, eps=1e-5):
    # Per-output-channel: (w - mean) * rsqrt(var + eps) * fan_in**-0.5 * gain.
    # TODO(synk): exact eps placement depends on the ScaledStdConv2d variant
    # (not provided in the spec); validate against the real PyTorch module.
    fan_in = w_oihw.shape[1] * w_oihw.shape[2] * w_oihw.shape[3]
    mean = jnp.mean(w_oihw, axis=(1, 2, 3), keepdims=True)
    var = jnp.var(w_oihw, axis=(1, 2, 3), keepdims=True)
    w_hat = (w_oihw - mean) * lax.rsqrt(var + eps) * (fan_in ** -0.5)
    return gain[:, None, None, None] * w_hat


# ----------------------------------------------------------------------------
# Bottleneck forward
# ----------------------------------------------------------------------------
@functools.partial(jax.jit, static_argnames=("alpha", "beta"))
def bottleneck_forward_nhwc(x_nhwc, w1_oihw, g1, w2_oihw, g2, w3_oihw, g3,
                            alpha=0.2, beta=1.0):
    gamma = _GAMMA_RELU
    w1s = _scaled_std_weight(w1_oihw, g1)             # (width, Cin, 1, 1)
    w2s = _scaled_std_weight(w2_oihw, g2)             # (width, width, 3, 3)
    w3s = _scaled_std_weight(w3_oihw, g3)             # (Cout, width, 1, 1)
    cmid = w2s.shape[0]
    # Fold the scalar multipliers into the tiny weights once (done per call on
    # weights only, never on activations), then cast to bf16 for the MXU.
    w1m = (jnp.transpose(w1s[:, :, 0, 0], (1, 0))
           * (gamma * beta)).astype(jnp.bfloat16)                      # (Cin, width)
    w2m = (jnp.transpose(w2s, (2, 3, 1, 0)).reshape(9, cmid, cmid)
           * gamma).astype(jnp.bfloat16)                               # (9, width, width)
    w3m = (jnp.transpose(w3s[:, :, 0, 0], (1, 0))
           * (gamma * alpha)).astype(jnp.bfloat16)                     # (width, Cout)
    return _bottleneck_call(x_nhwc.astype(jnp.bfloat16), w1m, w2m, w3m)


def bottleneck_forward(x_nchw, w1_oihw, g1, w2_oihw, g2, w3_oihw, g3,
                       alpha=0.2, beta=1.0):
    # PyTorch-layout/dtype parity wrapper.  A full NF-ResNet should stay
    # NHWC + bf16 end-to-end and call bottleneck_forward_nhwc directly:
    # each transpose here is a full HBM read+write of the activation.
    x = jnp.transpose(x_nchw, (0, 2, 3, 1))           # NCHW -> NHWC
    out = bottleneck_forward_nhwc(x, w1_oihw, g1, w2_oihw, g2, w3_oihw, g3,
                                  alpha=alpha, beta=beta)
    return jnp.transpose(out, (0, 3, 1, 2)).astype(x_nchw.dtype)


# ----------------------------------------------------------------------------
# Pure-JAX reference (same math, lax.conv, f32 everywhere) for a sanity check
# ----------------------------------------------------------------------------
def _reference_forward(x_nchw, w1, g1, w2, g2, w3, g3, alpha=0.2, beta=1.0):
    gamma = _GAMMA_RELU
    dn = ("NCHW", "OIHW", "NCHW")
    w1s = _scaled_std_weight(w1, g1)
    w2s = _scaled_std_weight(w2, g2)
    w3s = _scaled_std_weight(w3, g3)
    out = jnp.maximum(x_nchw, 0.0) * gamma * beta
    out = lax.conv_general_dilated(out, w1s, (1, 1), ((0, 0), (0, 0)),
                                   dimension_numbers=dn)
    out = jnp.maximum(out, 0.0) * gamma
    out = lax.conv_general_dilated(out, w2s, (1, 1), ((1, 1), (1, 1)),
                                   dimension_numbers=dn)
    out = jnp.maximum(out, 0.0) * gamma
    out = lax.conv_general_dilated(out, w3s, (1, 1), ((0, 0), (0, 0)),
                                   dimension_numbers=dn)
    return out * alpha + x_nchw


if __name__ == "__main__":
    # Bottleneck(inplanes=128, planes=32, stride=1, downsample=None,
    #            groups=1, base_width=64, alpha=0.2, beta=1.0, activation='relu')
    planes, expansion = 32, 4
    inplanes = planes * expansion          # identity add needs inplanes == planes*4
    width = planes                         # int(planes * 64/64) * 1
    N, H, W = 2, 16, 16
    alpha, beta = 0.2, 1.0

    key = jax.random.PRNGKey(0)
    kx, k1, k2, k3 = jax.random.split(key, 4)
    x = jax.random.normal(kx, (N, inplanes, H, W), jnp.float32)
    w1 = jax.random.normal(k1, (width, inplanes, 1, 1), jnp.float32)
    w2 = jax.random.normal(k2, (width, width, 3, 3), jnp.float32)
    w3 = jax.random.normal(k3, (inplanes, width, 1, 1), jnp.float32)
    g1 = jnp.ones((width,), jnp.float32)       # ScaledStdConv2d gains
    g2 = jnp.ones((width,), jnp.float32)
    g3 = jnp.ones((inplanes,), jnp.float32)

    out = bottleneck_forward(x, w1, g1, w2, g2, w3, g3, alpha=alpha, beta=beta)
    out = jax.block_until_ready(out)

    ref = _reference_forward(x, w1, g1, w2, g2, w3, g3, alpha=alpha, beta=beta)
    assert out.shape == (N, inplanes, H, W)
    max_err = float(jnp.max(jnp.abs(out - ref)))
    # bf16 at the HBM boundary (x, out) and bf16 MXU inputs -> loosened tolerance.
    assert jnp.allclose(out, ref, rtol=5e-2, atol=5e-2), (
        f"mismatch vs reference, max abs err = {max_err}")

    print("KERNEL_OK")
</pallas_src>

<mosaic_0001>
module attributes {stable_mosaic.version = 11 : i64} {
  func.func @_bottleneck_kernel(%arg0: i32, %arg1: memref<1x16x16x128xbf16, #tpu.memory_space<vmem>>, %arg2: memref<128x32xbf16, #tpu.memory_space<vmem>>, %arg3: memref<9x32x32xbf16, #tpu.memory_space<vmem>>, %arg4: memref<32x128xbf16, #tpu.memory_space<vmem>>, %arg5: memref<1x16x16x128xbf16, #tpu.memory_space<vmem>>, %arg6: memref<18x18x32xbf16, #tpu.memory_space<vmem>>) attributes {dimension_semantics = [#tpu.dimension_semantics<parallel>], iteration_bounds = array<i64: 2>, scalar_prefetch = 0 : i64, scratch_operands = 1 : i64, tpu.core_type = #tpu.core_type<tc>, window_params = [{transform_indices = @transform_0, window_bounds = array<i64: 1, 16, 16, 128>}, {pipeline_mode = #tpu.pipeline_mode<synchronous>, transform_indices = @transform_1, window_bounds = array<i64: 128, 32>}, {pipeline_mode = #tpu.pipeline_mode<synchronous>, transform_indices = @transform_2, window_bounds = array<i64: 9, 32, 32>}, {pipeline_mode = #tpu.pipeline_mode<synchronous>, transform_indices = @transform_3, window_bounds = array<i64: 32, 128>}, {transform_indices = @transform_4, window_bounds = array<i64: 1, 16, 16, 128>}]} {
    %c0 = arith.constant 0 : index
    %c0_0 = arith.constant 0 : index
    %c0_1 = arith.constant 0 : index
    %c0_2 = arith.constant 0 : index
    %0 = vector.load %arg1[%c0, %c0_0, %c0_1, %c0_2] : memref<1x16x16x128xbf16, #tpu.memory_space<vmem>>, vector<1x16x16x128xbf16>
    %1 = vector.shape_cast %0 : vector<1x16x16x128xbf16> to vector<256x128xbf16>
    %cst = arith.constant 0.000000e+00 : bf16
    %2 = vector.broadcast %cst : bf16 to vector<256x128xbf16>
    %3 = arith.maximumf %1, %2 : vector<256x128xbf16>
    %c0_3 = arith.constant 0 : index
    %c0_4 = arith.constant 0 : index
    %4 = vector.load %arg2[%c0_3, %c0_4] : memref<128x32xbf16, #tpu.memory_space<vmem>>, vector<128x32xbf16>
    %cst_5 = arith.constant dense<0.000000e+00> : vector<256x32xf32>
    %5 = tpu.matmul %3, %4, %cst_5 {dimension_numbers = #tpu.dot_dimension_numbers<[1], [0], [0], [1], [0, 0, 1, 1], [], []>} : vector<256x128xbf16>, vector<128x32xbf16>, vector<256x32xf32> -> vector<256x32xf32>
    %cst_6 = arith.constant 0.000000e+00 : bf16
    %6 = vector.broadcast %cst_6 : bf16 to vector<1x18x32xbf16>
    %c0_7 = arith.constant 0 : index
    %c0_8 = arith.constant 0 : index
    %c0_9 = arith.constant 0 : index
    %7 = vector.load %arg6[%c0_7, %c0_8, %c0_9] : memref<18x18x32xbf16, #tpu.memory_space<vmem>>, vector<1x18x32xbf16>
    tpu.vector_store %arg6[%c0_7, %c0_8, %c0_9], %6 {strides = array<i32>} : memref<18x18x32xbf16, #tpu.memory_space<vmem>>, vector<1x18x32xbf16>,
    %cst_10 = arith.constant 0.000000e+00 : bf16
    %8 = vector.broadcast %cst_10 : bf16 to vector<1x18x32xbf16>
    %c17 = arith.constant 17 : index
    %c0_11 = arith.constant 0 : index
    %c0_12 = arith.constant 0 : index
    %9 = vector.load %arg6[%c17, %c0_11, %c0_12] : memref<18x18x32xbf16, #tpu.memory_space<vmem>>, vector<1x18x32xbf16>
    tpu.vector_store %arg6[%c17, %c0_11, %c0_12], %8 {strides = array<i32>} : memref<18x18x32xbf16, #tpu.memory_space<vmem>>, vector<1x18x32xbf16>,
    %cst_13 = arith.constant 0.000000e+00 : bf16
    %10 = vector.broadcast %cst_13 : bf16 to vector<18x1x32xbf16>
    %c0_14 = arith.constant 0 : index
    %c0_15 = arith.constant 0 : index
    %c0_16 = arith.constant 0 : index
    %11 = vector.load %arg6[%c0_14, %c0_15, %c0_16] : memref<18x18x32xbf16, #tpu.memory_space<vmem>>, vector<18x1x32xbf16>
    tpu.vector_store %arg6[%c0_14, %c0_15, %c0_16], %10 {strides = array<i32>} : memref<18x18x32xbf16, #tpu.memory_space<vmem>>, vector<18x1x32xbf16>,
    %cst_17 = arith.constant 0.000000e+00 : bf16
    %12 = vector.broadcast %cst_17 : bf16 to vector<18x1x32xbf16>
    %c0_18 = arith.constant 0 : index
    %c17_19 = arith.constant 17 : index
    %c0_20 = arith.constant 0 : index
    %13 = vector.load %arg6[%c0_18, %c17_19, %c0_20] : memref<18x18x32xbf16, #tpu.memory_space<vmem>>, vector<18x1x32xbf16>
    tpu.vector_store %arg6[%c0_18, %c17_19, %c0_20], %12 {strides = array<i32>} : memref<18x18x32xbf16, #tpu.memory_space<vmem>>, vector<18x1x32xbf16>,
    %cst_21 = arith.constant 0.000000e+00 : f32
    %14 = vector.broadcast %cst_21 : f32 to vector<256x32xf32>
    %15 = arith.maximumf %5, %14 : vector<256x32xf32>
    %16 = arith.truncf %15 : vector<256x32xf32> to vector<256x32xbf16>
    %17 = vector.shape_cast %16 : vector<256x32xbf16> to vector<16x16x32xbf16>
    %c1 = arith.constant 1 : index
    %c1_22 = arith.constant 1 : index
    %c0_23 = arith.constant 0 : index
    %18 = vector.load %arg6[%c1, %c1_22, %c0_23] : memref<18x18x32xbf16, #tpu.memory_space<vmem>>, vector<16x16x32xbf16>
    tpu.vector_store %arg6[%c1, %c1_22, %c0_23], %17 {strides = array<i32>} : memref<18x18x32xbf16, #tpu.memory_space<vmem>>, vector<16x16x32xbf16>,
    %c0_24 = arith.constant 0 : index
    %c0_25 = arith.constant 0 : index
    %c0_26 = arith.constant 0 : index
    %19 = vector.load %arg6[%c0_24, %c0_25, %c0_26] : memref<18x18x32xbf16, #tpu.memory_space<vmem>>, vector<16x16x32xbf16>
    %20 = vector.shape_cast %19 : vector<16x16x32xbf16> to vector<256x32xbf16>
    %c0_27 = arith.constant 0 : index
    %c0_28 = arith.constant 0 : index
    %c0_29 = arith.constant 0 : index
    %21 = vector.load %arg3[%c0_27, %c0_28, %c0_29] : memref<9x32x32xbf16, #tpu.memory_space<vmem>>, vector<1x32x32xbf16>
    %22 = vector.shape_cast %21 : vector<1x32x32xbf16> to vector<32x32xbf16>
    %cst_30 = arith.constant dense<0.000000e+00> : vector<256x32xf32>
    %23 = tpu.matmul %20, %22, %cst_30 {dimension_numbers = #tpu.dot_dimension_numbers<[1], [0], [0], [1], [0, 0, 1, 1], [], []>} : vector<256x32xbf16>, vector<32x32xbf16>, vector<256x32xf32> -> vector<256x32xf32>
    %c0_31 = arith.constant 0 : index
    %c1_32 = arith.constant 1 : index
    %c0_33 = arith.constant 0 : index
    %24 = vector.load %arg6[%c0_31, %c1_32, %c0_33] : memref<18x18x32xbf16, #tpu.memory_space<vmem>>, vector<16x16x32xbf16>
    %25 = vector.shape_cast %24 : vector<16x16x32xbf16> to vector<256x32xbf16>
    %c1_34 = arith.constant 1 : index
    %c0_35 = arith.constant 0 : index
    %c0_36 = arith.constant 0 : index
    %26 = vector.load %arg3[%c1_34, %c0_35, %c0_36] : memref<9x32x32xbf16, #tpu.memory_space<vmem>>, vector<1x32x32xbf16>
    %27 = vector.shape_cast %26 : vector<1x32x32xbf16> to vector<32x32xbf16>
    %cst_37 = arith.constant dense<0.000000e+00> : vector<256x32xf32>
    %28 = tpu.matmul %25, %27, %cst_37 {dimension_numbers = #tpu.dot_dimension_numbers<[1], [0], [0], [1], [0, 0, 1, 1], [], []>} : vector<256x32xbf16>, vector<32x32xbf16>, vector<256x32xf32> -> vector<256x32xf32>
    %29 = arith.addf %23, %28 : vector<256x32xf32>
    %c0_38 = arith.constant 0 : index
    %c2 = arith.constant 2 : index
    %c0_39 = arith.constant 0 : index
    %30 = vector.load %arg6[%c0_38, %c2, %c0_39] : memref<18x18x32xbf16, #tpu.memory_space<vmem>>, vector<16x16x32xbf16>
    %31 = vector.shape_cast %30 : vector<16x16x32xbf16> to vector<256x32xbf16>
    %c2_40 = arith.constant 2 : index
    %c0_41 = arith.constant 0 : index
    %c0_42 = arith.constant 0 : index
    %32 = vector.load %arg3[%c2_40, %c0_41, %c0_42] : memref<9x32x32xbf16, #tpu.memory_space<vmem>>, vector<1x32x32xbf16>
    %33 = vector.shape_cast %32 : vector<1x32x32xbf16> to vector<32x32xbf16>
    %cst_43 = arith.constant dense<0.000000e+00> : vector<256x32xf32>
    %34 = tpu.matmul %31, %33, %cst_43 {dimension_numbers = #tpu.dot_dimension_numbers<[1], [0], [0], [1], [0, 0, 1, 1], [], []>} : vector<256x32xbf16>, vector<32x32xbf16>, vector<256x32xf32> -> vector<256x32xf32>
    %35 = arith.addf %29, %34 : vector<256x32xf32>
    %c1_44 = arith.constant 1 : index
    %c0_45 = arith.constant 0 : index
    %c0_46 = arith.constant 0 : index
    %36 = vector.load %arg6[%c1_44, %c0_45, %c0_46] : memref<18x18x32xbf16, #tpu.memory_space<vmem>>, vector<16x16x32xbf16>
    %37 = vector.shape_cast %36 : vector<16x16x32xbf16> to vector<256x32xbf16>
    %c3 = arith.constant 3 : index
    %c0_47 = arith.constant 0 : index
    %c0_48 = arith.constant 0 : index
    %38 = vector.load %arg3[%c3, %c0_47, %c0_48] : memref<9x32x32xbf16, #tpu.memory_space<vmem>>, vector<1x32x32xbf16>
    %39 = vector.shape_cast %38 : vector<1x32x32xbf16> to vector<32x32xbf16>
    %cst_49 = arith.constant dense<0.000000e+00> : vector<256x32xf32>
    %40 = tpu.matmul %37, %39, %cst_49 {dimension_numbers = #tpu.dot_dimension_numbers<[1], [0], [0], [1], [0, 0, 1, 1], [], []>} : vector<256x32xbf16>, vector<32x32xbf16>, vector<256x32xf32> -> vector<256x32xf32>
    %41 = arith.addf %35, %40 : vector<256x32xf32>
    %c1_50 = arith.constant 1 : index
    %c1_51 = arith.constant 1 : index
    %c0_52 = arith.constant 0 : index
    %42 = vector.load %arg6[%c1_50, %c1_51, %c0_52] : memref<18x18x32xbf16, #tpu.memory_space<vmem>>, vector<16x16x32xbf16>
    %43 = vector.shape_cast %42 : vector<16x16x32xbf16> to vector<256x32xbf16>
    %c4 = arith.constant 4 : index
    %c0_53 = arith.constant 0 : index
    %c0_54 = arith.constant 0 : index
    %44 = vector.load %arg3[%c4, %c0_53, %c0_54] : memref<9x32x32xbf16, #tpu.memory_space<vmem>>, vector<1x32x32xbf16>
    %45 = vector.shape_cast %44 : vector<1x32x32xbf16> to vector<32x32xbf16>
    %cst_55 = arith.constant dense<0.000000e+00> : vector<256x32xf32>
    %46 = tpu.matmul %43, %45, %cst_55 {dimension_numbers = #tpu.dot_dimension_numbers<[1], [0], [0], [1], [0, 0, 1, 1], [], []>} : vector<256x32xbf16>, vector<32x32xbf16>, vector<256x32xf32> -> vector<256x32xf32>
    %47 = arith.addf %41, %46 : vector<256x32xf32>
    %c1_56 = arith.constant 1 : index
    %c2_57 = arith.constant 2 : index
    %c0_58 = arith.constant 0 : index
    %48 = vector.load %arg6[%c1_56, %c2_57, %c0_58] : memref<18x18x32xbf16, #tpu.memory_space<vmem>>, vector<16x16x32xbf16>
    %49 = vector.shape_cast %48 : vector<16x16x32xbf16> to vector<256x32xbf16>
    %c5 = arith.constant 5 : index
    %c0_59 = arith.constant 0 : index
    %c0_60 = arith.constant 0 : index
    %50 = vector.load %arg3[%c5, %c0_59, %c0_60] : memref<9x32x32xbf16, #tpu.memory_space<vmem>>, vector<1x32x32xbf16>
    %51 = vector.shape_cast %50 : vector<1x32x32xbf16> to vector<32x32xbf16>
    %cst_61 = arith.constant dense<0.000000e+00> : vector<256x32xf32>
    %52 = tpu.matmul %49, %51, %cst_61 {dimension_numbers = #tpu.dot_dimension_numbers<[1], [0], [0], [1], [0, 0, 1, 1], [], []>} : vector<256x32xbf16>, vector<32x32xbf16>, vector<256x32xf32> -> vector<256x32xf32>
    %53 = arith.addf %47, %52 : vector<256x32xf32>
    %c2_62 = arith.constant 2 : index
    %c0_63 = arith.constant 0 : index
    %c0_64 = arith.constant 0 : index
    %54 = vector.load %arg6[%c2_62, %c0_63, %c0_64] : memref<18x18x32xbf16, #tpu.memory_space<vmem>>, vector<16x16x32xbf16>
    %55 = vector.shape_cast %54 : vector<16x16x32xbf16> to vector<256x32xbf16>
    %c6 = arith.constant 6 : index
    %c0_65 = arith.constant 0 : index
    %c0_66 = arith.constant 0 : index
    %56 = vector.load %arg3[%c6, %c0_65, %c0_66] : memref<9x32x32xbf16, #tpu.memory_space<vmem>>, vector<1x32x32xbf16>
    %57 = vector.shape_cast %56 : vector<1x32x32xbf16> to vector<32x32xbf16>
    %cst_67 = arith.constant dense<0.000000e+00> : vector<256x32xf32>
    %58 = tpu.matmul %55, %57, %cst_67 {dimension_numbers = #tpu.dot_dimension_numbers<[1], [0], [0], [1], [0, 0, 1, 1], [], []>} : vector<256x32xbf16>, vector<32x32xbf16>, vector<256x32xf32> -> vector<256x32xf32>
    %59 = arith.addf %53, %58 : vector<256x32xf32>
    %c2_68 = arith.constant 2 : index
    %c1_69 = arith.constant 1 : index
    %c0_70 = arith.constant 0 : index
    %60 = vector.load %arg6[%c2_68, %c1_69, %c0_70] : memref<18x18x32xbf16, #tpu.memory_space<vmem>>, vector<16x16x32xbf16>
    %61 = vector.shape_cast %60 : vector<16x16x32xbf16> to vector<256x32xbf16>
    %c7 = arith.constant 7 : index
    %c0_71 = arith.constant 0 : index
    %c0_72 = arith.constant 0 : index
    %62 = vector.load %arg3[%c7, %c0_71, %c0_72] : memref<9x32x32xbf16, #tpu.memory_space<vmem>>, vector<1x32x32xbf16>
    %63 = vector.shape_cast %62 : vector<1x32x32xbf16> to vector<32x32xbf16>
    %cst_73 = arith.constant dense<0.000000e+00> : vector<256x32xf32>
    %64 = tpu.matmul %61, %63, %cst_73 {dimension_numbers = #tpu.dot_dimension_numbers<[1], [0], [0], [1], [0, 0, 1, 1], [], []>} : vector<256x32xbf16>, vector<32x32xbf16>, vector<256x32xf32> -> vector<256x32xf32>
    %65 = arith.addf %59, %64 : vector<256x32xf32>
    %c2_74 = arith.constant 2 : index
    %c2_75 = arith.constant 2 : index
    %c0_76 = arith.constant 0 : index
    %66 = vector.load %arg6[%c2_74, %c2_75, %c0_76] : memref<18x18x32xbf16, #tpu.memory_space<vmem>>, vector<16x16x32xbf16>
    %67 = vector.shape_cast %66 : vector<16x16x32xbf16> to vector<256x32xbf16>
    %c8 = arith.constant 8 : index
    %c0_77 = arith.constant 0 : index
    %c0_78 = arith.constant 0 : index
    %68 = vector.load %arg3[%c8, %c0_77, %c0_78] : memref<9x32x32xbf16, #tpu.memory_space<vmem>>, vector<1x32x32xbf16>
    %69 = vector.shape_cast %68 : vector<1x32x32xbf16> to vector<32x32xbf16>
    %cst_79 = arith.constant dense<0.000000e+00> : vector<256x32xf32>
    %70 = tpu.matmul %67, %69, %cst_79 {dimension_numbers = #tpu.dot_dimension_numbers<[1], [0], [0], [1], [0, 0, 1, 1], [], []>} : vector<256x32xbf16>, vector<32x32xbf16>, vector<256x32xf32> -> vector<256x32xf32>
    %71 = arith.addf %65, %70 : vector<256x32xf32>
    %cst_80 = arith.constant 0.000000e+00 : f32
    %72 = vector.broadcast %cst_80 : f32 to vector<256x32xf32>
    %73 = arith.maximumf %71, %72 : vector<256x32xf32>
    %74 = arith.truncf %73 : vector<256x32xf32> to vector<256x32xbf16>
    %c0_81 = arith.constant 0 : index
    %c0_82 = arith.constant 0 : index
    %75 = vector.load %arg4[%c0_81, %c0_82] : memref<32x128xbf16, #tpu.memory_space<vmem>>, vector<32x128xbf16>
    %cst_83 = arith.constant dense<0.000000e+00> : vector<256x128xf32>
    %76 = tpu.matmul %74, %75, %cst_83 {dimension_numbers = #tpu.dot_dimension_numbers<[1], [0], [0], [1], [0, 0, 1, 1], [], []>} : vector<256x32xbf16>, vector<32x128xbf16>, vector<256x128xf32> -> vector<256x128xf32>
    %77 = vector.shape_cast %76 : vector<256x128xf32> to vector<1x16x16x128xf32>
    %c0_84 = arith.constant 0 : index
    %c0_85 = arith.constant 0 : index
    %c0_86 = arith.constant 0 : index
    %c0_87 = arith.constant 0 : index
    %78 = vector.load %arg1[%c0_84, %c0_85, %c0_86, %c0_87] : memref<1x16x16x128xbf16, #tpu.memory_space<vmem>>, vector<1x16x16x128xbf16>
    %79 = arith.extf %78 : vector<1x16x16x128xbf16> to vector<1x16x16x128xf32>
    %80 = arith.addf %77, %79 : vector<1x16x16x128xf32>
    %81 = arith.truncf %80 : vector<1x16x16x128xf32> to vector<1x16x16x128xbf16>
    %c0_88 = arith.constant 0 : index
    %c0_89 = arith.constant 0 : index
    %c0_90 = arith.constant 0 : index
    %c0_91 = arith.constant 0 : index
    %82 = vector.load %arg5[%c0_88, %c0_89, %c0_90, %c0_91] : memref<1x16x16x128xbf16, #tpu.memory_space<vmem>>, vector<1x16x16x128xbf16>
    tpu.vector_store %arg5[%c0_88, %c0_89, %c0_90, %c0_91], %81 {strides = array<i32>} : memref<1x16x16x128xbf16, #tpu.memory_space<vmem>>, vector<1x16x16x128xbf16>,
    return
  }
  func.func @transform_0(%arg0: i32) -> (i32, i32, i32, i32) {
    %c0_i32 = arith.constant 0 : i32
    %c0_i32_0 = arith.constant 0 : i32
    %c0_i32_1 = arith.constant 0 : i32
    %c0_i32_2 = arith.constant 0 : i32
    return %arg0, %c0_i32, %c0_i32_0, %c0_i32_1 : i32, i32, i32, i32
  }
  func.func @transform_1(%arg0: i32) -> (i32, i32) {
    %c0_i32 = arith.constant 0 : i32
    %c0_i32_0 = arith.constant 0 : i32
    %c0_i32_1 = arith.constant 0 : i32
    return %c0_i32, %c0_i32_0 : i32, i32
  }
  func.func @transform_2(%arg0: i32) -> (i32, i32, i32) {
    %c0_i32 = arith.constant 0 : i32
    %c0_i32_0 = arith.constant 0 : i32
    %c0_i32_1 = arith.constant 0 : i32
    %c0_i32_2 = arith.constant 0 : i32
    return %c0_i32, %c0_i32_0, %c0_i32_1 : i32, i32, i32
  }
  func.func @transform_3(%arg0: i32) -> (i32, i32) {
    %c0_i32 = arith.constant 0 : i32
    %c0_i32_0 = arith.constant 0 : i32
    %c0_i32_1 = arith.constant 0 : i32
    return %c0_i32, %c0_i32_0 : i32, i32
  }
  func.func @transform_4(%arg0: i32) -> (i32, i32, i32, i32) {
    %c0_i32 = arith.constant 0 : i32
    %c0_i32_0 = arith.constant 0 : i32
    %c0_i32_1 = arith.constant 0 : i32
    %c0_i32_2 = arith.constant 0 : i32
    return %arg0, %c0_i32, %c0_i32_0, %c0_i32_1 : i32, i32, i32, i32
  }
}

</mosaic_0001>

<bundles_post_ra>
// kernel: bottleneck_forward_nhwc.1
= control target key start
LH: loop header
LB: loop body
LE: loop exit
PB: predicated region body
PF: predicated region fallthrough
CT: control target
= control target key end

     0   :  { %9 = vsyncpa [#allocation4], 0  ;;  %s8148_s0 = inlined_call_operand.vmem [shape: bf16[2,16,16,128], index: 0, kind: input, shape index: {}]   ;;  %s8149_s1 = inlined_call_operand.vmem [shape: bf16[128,32], index: 1, kind: input, shape index: {}]   ;;  %s8150_s2 = inlined_call_operand.vmem [shape: bf16[9,32,32], index: 2, kind: input, shape index: {}]   ;;  %s8151_s3 = inlined_call_operand.vmem [shape: bf16[32,128], index: 3, kind: input, shape index: {}]   ;;  %s8152_s4 = inlined_call_operand.hbm [shape: bf16[2,16,16,128], index: 4, kind: output, shape index: {}]  }
   0x1   :  { %11 = vsyncpa [#allocation4 + $0x1], 0  ;;  %s6569_s15 = smov 0   ;;  %s6571_s16 = smov 0  }
   0x2   :  { %s6573_s17 = smov 0   ;;  %s6575_s18 = smov 0  }
   0x3 LB: > { %s6590_s19 = sadd.s32 4294967295, %s6539_s18   ;;  %s5541_s20 = sadd.s32 4294967294, %s6539_s18   ;;  %s6539_s18 = sphi %s6575_s18, %s8209_s18   ;;  %s6535_s17 = sphi %s6573_s17, %s8208_s17   ;;  %s6531_s16 = sphi %s6571_s16, %s8207_s16   ;;  %s6527_s15 = sphi %s6569_s15, %s8206_s15  }
   0x4   : > { %s6594_s21 = sadd.s32 1, %s6539_s18   ;;  %s113_s22 = sadd.s32 1, %s6535_s17 }
   0x5   : > { %s110_s23 = ssub.s32 %s6539_s18, %s6594_s21  ;;  %p123_p0 = scmp.ne.s32.totalorder %s6535_s17, %s6531_s16 }
   0x6   : > { %p111_p1 = scmp.eq.s32.totalorder %s110_s23, 0  ;;  %p124_p2 = scmp.eq.s32.totalorder %s6590_s19, 1 }
   0x7   : > { %p129_p3 = scmp.ne.s32.totalorder %s6531_s16, %s6527_s15  ;;  %p130_p4 = scmp.eq.s32.totalorder %s5541_s20, 1 }
   0x8   : > { %s6605_s24 = scalar_select %p111_p1, %s6535_s17, %s113_s22  }
   0x9   : > { %p6607_p5 = por %p124_p2, %p123_p0  ;;  %p6611_p6 = por %p130_p4, %p129_p3 }
   0xa   : > { %p5544_p7 = scmp.ge.s32.totalorder %s6539_s18, 1  ;;  %p165_p8 = scmp.lt.s32.totalorder %s6539_s18, 3 }
   0xc   : > { %p166_p9 = pnand %p5544_p7, %p165_p8 }
   0xe   : > { %169 = sbr.rel (%p166_p9) target bundleno = 1245 (0x4dd), region = 36 }
  0x13   : > { %v6105_v0 = vld [vmem:[%s8149_s1 + $0x38] sm:$0xff]  ;;  %v6104_v1 = vld [vmem:[%s8149_s1 + $0x30] sm:$0xff]  ;;  %p191_p10 = scmp.lt.s32.totalorder %s6590_s19, 1  ;;  %v6103_v2 = vld [vmem:[%s8149_s1 + $0x28] sm:$0xff]  ;;  %vm465_vm0 = vcmask 253952   ;;  %v8158_v56 = vmov 0 }
  0x14   : > { %373 = vmatpush.bf16.msra.mxu0 %v6105_v0  ;;  %v6102_v3 = vld [vmem:[%s8149_s1 + $0x20] sm:$0xff]  ;;  %v6101_v4 = vld [vmem:[%s8149_s1 + $0x18] sm:$0xff]  ;;  %v6100_v5 = vld [vmem:[%s8149_s1 + $0x10] sm:$0xff]  ;;  %vm472_vm1 = vsmask.f32 256  ;;  %vm462_vm5 = vcmask 257024  }
  0x15   : > { %s192_s7 = scalar_select %p191_p10, %s6590_s19, 1  ;;  %v6099_v9 = vld [vmem:[%s8149_s1 + $0x8] sm:$0xff]  ;;  %v6098_v12 = vld [vmem:[%s8149_s1] sm:$0xff]  ;;  %vm6657_vm2 = vmand %vm465_vm0, %vm472_vm1  ;;  %vm528_vm3 = vsmask.f32 7938  ;;  %vm2004_vm9 = vcmask 1042432  }
  0x16   : > { %v477_v50 = vld [vmem:[#allocation2 + $0xc] sm:$0x1]  ;;  %vm6666_vm4 = vmand %vm465_vm0, %vm528_vm3  ;;  %v533_v57 = vld [vmem:[#allocation2 + $0x14] sm:$0x1]  ;;  %vm648_vm7 = vsmask.f32 4368 }
  0x17   : > { %s6097_s10 = sshll.u32 %s192_s7, 7  ;;  %v478_v52 = vsel %vm6657_vm2, 0, %v477_v50  ;;  %v8159_v56 = vsel %vm6666_vm4, 4294967295, %v8158_v56  ;;  %v534_v58 = vsel %vm6666_vm4, 0, %v533_v57  ;;  %v480_v62 = vld [vmem:[#allocation2 + $0x18] sm:$0x1]  ;;  %vm6682_vm6 = vmand %vm462_vm5, %vm528_vm3 }
  0x18   : > { %374 = vmatpush.bf16.msra.mxu0 %v6104_v1  ;;  %s6637_s20 = scalar_lea.vmem %s8148_s0, %s6097_s10  ;;  %479 = vst [vmem:[#allocation2 + $0xc] sm:$0x1] %v478_v52  ;;  %v481_v63 = vsel %vm6657_vm2, 0, %v480_v62  ;;  %vm6691_vm8 = vmor %vm472_vm1, %vm648_vm7  ;;  %vm2005_vm10 = vcmask 1046532   ;;  %vm1589_vm12 = vcmask 261120   ;;  %s188_s22 = sand.u32 1, %s6531_s16  }
  0x19   : > { %v6176_v6 = vld [vmem:[%s6637_s20] sm:$0xff]   ;;  %v6383_v14 = vld [vmem:[%s6637_s20 + $0x8] sm:$0xff]   ;;  %v6384_v20 = vld [vmem:[%s6637_s20 + $0x10] sm:$0xff]   ;;  %8160 = vst [vmem:[#allocation6_spill] sm:$0xff] %v8159_v56  ;;  %vm1137_vm13 = vsmask.f32 3328 }
  0x1a   : > { %v6177_v7 = vunpack.c.l.bf16 %v6176_v6  ;;  %v6178_v8 = vunpack.c.h.bf16 %v6176_v6  ;;  %v6181_v15 = vunpack.c.l.bf16 %v6383_v14  ;;  %v6182_v16 = vunpack.c.h.bf16 %v6383_v14  ;;  %v6385_v26 = vld [vmem:[%s6637_s20 + $0x18] sm:$0xff]   ;;  %v6386_v32 = vld [vmem:[%s6637_s20 + $0x20] sm:$0xff]   ;;  %v6387_v38 = vld [vmem:[%s6637_s20 + $0x28] sm:$0xff]   ;;  %535 = vst [vmem:[#allocation2 + $0x14] sm:$0x1] %v534_v58  ;;  %s5545_s23 = sshll.u32 %s188_s22, 7 }
  0x1b   : > { %v6185_v21 = vunpack.c.l.bf16 %v6384_v20  ;;  %v6186_v22 = vunpack.c.h.bf16 %v6384_v20  ;;  %v6189_v27 = vunpack.c.l.bf16 %v6385_v26  ;;  %v6190_v28 = vunpack.c.h.bf16 %v6385_v26  ;;  %v6388_v44 = vld [vmem:[%s6637_s20 + $0x30] sm:$0xff]   ;;  %v6389_v53 = vld [vmem:[%s6637_s20 + $0x38] sm:$0xff]   ;;  %v6390_v0 = vld [vmem:[%s6637_s20 + $0x40] sm:$0xff]   ;;  %482 = vst [vmem:[#allocation2 + $0x18] sm:$0x1] %v481_v63  ;;  %s8056_s27 = scalar_lea.vmem [#allocation3], %s5545_s23 }
  0x1c   : > { %375 = vmatpush.bf16.msra.mxu0 %v6103_v2  ;;  %v261_v10 = vmax.f32 %v6177_v7, 0.0  ;;  %v262_v11 = vmax.f32 %v6178_v8, 0.0  ;;  %v263_v17 = vmax.f32 %v6181_v15, 0.0  ;;  %v264_v18 = vmax.f32 %v6182_v16, 0.0  ;;  %vm6735_vm11 = vmor %vm2004_vm9, %vm2005_vm10  ;;  %s6174_s28 = sshll.u32 %s6590_s19, 7  ;;  %s5476_s6 = sshll.u32 %s8056_s27, 4  ;;  %s5477_s6 = int_to_ptr.vmem [resolvable:$true] %s5476_s6 }
  0x1d   : > { %v265_v23 = vmax.f32 %v6185_v21, 0.0  ;;  %v266_v24 = vmax.f32 %v6186_v22, 0.0  ;;  %v267_v29 = vmax.f32 %v6189_v27, 0.0  ;;  %v268_v30 = vmax.f32 %v6190_v28, 0.0  ;;  %s5475_s5 = scalar_lea.hbm %s8152_s4, %s6174_s28  ;;  %s5464_s8 = scalar_lea.sflag [#allocation4], %s188_s22 }
  0x1e   : > { %v293_v13 = vpack.c.bf16 %v262_v11, %v261_v10  ;;  %v294_v19 = vpack.c.bf16 %v264_v18, %v263_v17  ;;  %v6193_v33 = vunpack.c.l.bf16 %v6386_v32  ;;  %v6194_v34 = vunpack.c.h.bf16 %v6386_v32  ;;  %v483_v10 = vld [vmem:[#allocation2 + $0x24] sm:$0x1]  ;;  %s5478_s7 = sshll.u32 %s5475_s5, 4  ;;  %s6497_s11 = scalar_lea.hbm %s8152_s4, 256  ;;  %s5479_s7 = int_to_ptr.hbm [resolvable:$true] %s5478_s7 }
  0x1f   : > { %v295_v25 = vpack.c.bf16 %v266_v24, %v265_v23  ;;  %v296_v31 = vpack.c.bf16 %v268_v30, %v267_v29  ;;  %v6197_v39 = vunpack.c.l.bf16 %v6387_v38  ;;  %v6198_v40 = vunpack.c.h.bf16 %v6387_v38  ;;  %v973_v20 = vld [vmem:[#allocation2 + $0xc] sm:$0xf] }
  0x20   : > { %376 = vmatpush.bf16.msra.mxu0 %v6102_v3  ;;  %v269_v35 = vmax.f32 %v6193_v33, 0.0  ;;  %v270_v36 = vmax.f32 %v6194_v34, 0.0  ;;  %v6201_v45 = vunpack.c.l.bf16 %v6388_v44  ;;  %v6202_v46 = vunpack.c.h.bf16 %v6388_v44  ;;  %v536_v3 = vld [vmem:[#allocation2 + $0x20] sm:$0x1] }
  0x21   : > { %v271_v41 = vmax.f32 %v6197_v39, 0.0  ;;  %v272_v42 = vmax.f32 %v6198_v40, 0.0  ;;  %v6205_v54 = vunpack.c.l.bf16 %v6389_v53  ;;  %v6206_v55 = vunpack.c.h.bf16 %v6389_v53 }
  0x22   : > { %v297_v37 = vpack.c.bf16 %v270_v36, %v269_v35  ;;  %v273_v47 = vmax.f32 %v6201_v45, 0.0  ;;  %v274_v48 = vmax.f32 %v6202_v46, 0.0  ;;  %v6209_v1 = vunpack.c.l.bf16 %v6390_v0  ;;  %v977_v35 = vld [vmem:[#allocation2 + $0x14] sm:$0x1] }
  0x23   : > { %v298_v43 = vpack.c.bf16 %v272_v42, %v271_v41  ;;  %v275_v59 = vmax.f32 %v6205_v54, 0.0  ;;  %v276_v60 = vmax.f32 %v6206_v55, 0.0  ;;  %v6210_v2 = vunpack.c.h.bf16 %v6390_v0  ;;  %v486_v41 = vld [vmem:[#allocation2 + $0x30] sm:$0x1]  ;;  %v980_v54 = vld [vmem:[#allocation2 + $0x18] sm:$0xf] }
  0x24   : > { %377 = vmatpush.bf16.msra.mxu0 %v6101_v4  ;;  %v299_v49 = vpack.c.bf16 %v274_v48, %v273_v47  ;;  %v277_v4 = vmax.f32 %v6209_v1, 0.0  ;;  %v537_v6 = vsel %vm6666_vm4, 0, %v536_v3  ;;  %v6392_v45 = vld [vmem:[%s6637_s20 + $0x50] sm:$0xff]   ;;  %v487_v46 = vsel %vm6657_vm2, 0, %v486_v41  ;;  %v6706_v48 = vld [vmem:[%s8150_s2 + $0x8] sm:$0xff] }
  0x25   : > { %v300_v61 = vpack.c.bf16 %v276_v60, %v275_v59  ;;  %538 = vst [vmem:[#allocation2 + $0x20] sm:$0x1] %v537_v6  ;;  %v6218_v53 = vunpack.c.h.bf16 %v6392_v45  ;;  %6430 = vmatpush.bf16.msra.mxu2 %v6706_v48  ;;  %v6712_v59 = vld [vmem:[%s8150_s2] sm:$0xff]  ;;  %v6722_v3 = vld [vmem:[%s8150_s2 + $0x28] sm:$0xff]  ;;  %vm1138_vm14 = vsmask.f32 7440 }
  0x26   : > { %488 = vst [vmem:[#allocation2 + $0x30] sm:$0x1] %v487_v46  ;;  %6432 = vmatpush.bf16.msra.mxu3 %v6722_v3  ;;  %v545_v46 = vld [vmem:[#allocation2 + $0x44] sm:$0x1]  ;;  %vm6803_vm15 = vmor %vm1137_vm13, %vm1138_vm14 }
  0x27   : > { %v282_v0 = vmax.f32 %v6218_v53, 0.0  ;;  %v546_v53 = vsel %vm6666_vm4, 0, %v545_v46 }
  0x28   : > { %378 = vmatpush.bf16.msra.mxu0 %v6100_v5  ;;  %v278_v5 = vmax.f32 %v6210_v2, 0.0  ;;  %547 = vst [vmem:[#allocation2 + $0x44] sm:$0x1] %v546_v53 }
  0x29   : > { %6431 = vmatpush.bf16.msra.mxu2 %v6712_v59 }
  0x2a   : > { %v301_v7 = vpack.c.bf16 %v278_v5, %v277_v4 }
  0x2c   : > { %379 = vmatpush.bf16.msra.mxu0 %v6099_v9 }
  0x30   : > { %380 = vmatpush.bf16.msra.mxu0 %v6098_v12  ;;  %v6391_v12 = vld [vmem:[%s6637_s20 + $0x48] sm:$0xff]  }
  0x31   : > { %v6213_v15 = vunpack.c.l.bf16 %v6391_v12  ;;  %v6214_v18 = vunpack.c.h.bf16 %v6391_v12 }
  0x33   : > { %381 = vmatmul.bf16.vlgmr.msra.gmra.mxu0 %v293_v13  ;;  %v484_v13 = vsel %vm6657_vm2, 0, %v483_v10  ;;  %v279_v24 = vmax.f32 %v6213_v15, 0.0  ;;  %v280_v28 = vmax.f32 %v6214_v18, 0.0  ;;  %v984_v10 = vld [vmem:[#allocation2 + $0x20] sm:$0x1]  ;;  %v6125_v15 = vld [vmem:[%s8150_s2 + $0x18] sm:$0xff] }
  0x34   : > { %485 = vst [vmem:[#allocation2 + $0x24] sm:$0x1] %v484_v13  ;;  %v489_v18 = vld [vmem:[#allocation2 + $0x3c] sm:$0x1]  ;;  %6428 = vmatpush.bf16.msra.mxu1 %v6125_v15  ;;  %1644 = vmatpush.bf16.msrb.mxu0 %v6125_v15 }
  0x35   : > { %v302_v33 = vpack.c.bf16 %v280_v28, %v279_v24 }
  0x43   : > { %386 = vmatmul.bf16.gmra.mxu0 %v294_v19  ;;  %v6169_v19 = vld [vmem:[%s8150_s2 + $0x78] sm:$0xff] }
  0x53   : > { %391 = vmatmul.bf16.gmra.mxu0 %v295_v25  ;;  %v539_v25 = vld [vmem:[#allocation2 + $0x2c] sm:$0x1] }
  0x54   : > { %v540_v29 = vsel %vm6666_vm4, 0, %v539_v25 }
  0x55   : > { %541 = vst [vmem:[#allocation2 + $0x2c] sm:$0x1] %v540_v29  ;;  %v6124_v29 = vld [vmem:[%s8150_s2 + $0x10] sm:$0xff] }
  0x56   : > { %6429 = vmatpush.bf16.msra.mxu1 %v6124_v29  ;;  %1645 = vmatpush.bf16.msrb.mxu0 %v6124_v29 }
  0x5a   : > { %1873 = vmatpush.bf16.msra.mxu0 %v6706_v48 }
  0x5e   : > { %1874 = vmatpush.bf16.msra.mxu0 %v6712_v59 }
  0x63   : > { %396 = vmatmul.bf16.gmra.mxu0 %v296_v31 }
  0x73   : > { %401 = vmatmul.bf16.gmra.mxu0 %v297_v37 }
  0x83   : > { %406 = vmatmul.bf16.gmra.mxu0 %v298_v43 }
  0x93   : > { %411 = vmatmul.bf16.gmra.mxu0 %v299_v49  ;;  %v6217_v49 = vunpack.c.l.bf16 %v6392_v45 }
  0x95   : > { %v281_v60 = vmax.f32 %v6217_v49, 0.0 }
  0xa3   : > { %416 = vmatmul.bf16.gmra.mxu0 %v300_v61  ;;  %v542_v61 = vld [vmem:[#allocation2 + $0x38] sm:$0x1] }
  0xa4   : > { %v543_v1 = vsel %vm6666_vm4, 0, %v542_v61 }
  0xa5   : > { %544 = vst [vmem:[#allocation2 + $0x38] sm:$0x1] %v543_v1 }
  0xb0   : > { %v382_v8 = vpop.f32.mrf.mxu0 }
  0xb1   : > { %v584_v9 = vmax.f32 %v382_v8, 0.0 }
  0xb3   : > { %v616_v11 = vpack.c.bf16 %v584_v9, %v584_v9  ;;  %421 = vmatmul.bf16.gmra.mxu0 %v301_v7  ;;  %v303_v7 = vpack.c.bf16 %v282_v0, %v281_v60  ;;  %v991_v0 = vld [vmem:[#allocation2 + $0x2c] sm:$0x1] }
  0xb5   : > { %v651_v14 = vshrl.u32 %v616_v11, 16  ;;  %v654_v17 = vshll.u32 %v616_v11, 16 }
  0xb7   : > { %v653_v16 = vrot.slane %v651_v14, 7 }
  0xb8   : > { %v384_v21 = vpop.f32.mrf.mxu0 }
  0xb9   : > { %v656_v22 = vor.u32 %v654_v17, %v653_v16  ;;  %v585_v23 = vmax.f32 %v384_v21, 0.0  ;;  %v657_v37 = vrot.slane %v653_v16, 4  ;;  %v6126_v16 = vld [vmem:[%s8150_s2 + $0x20] sm:$0xff] }
  0xba   : > { %6433 = vmatpush.bf16.msra.mxu3 %v6126_v16  ;;  %v492_v16 = vld [vmem:[#allocation2 + $0x48] sm:$0x1] }
  0xbb   : > { %v974_v26 = vsel %vm6682_vm6, %v656_v22, %v973_v20  ;;  %v617_v27 = vpack.c.bf16 %v585_v23, %v585_v23  ;;  %v493_v29 = vsel %vm6657_vm2, 0, %v492_v16 }
  0xbc   : > { %975 = vst [vmem:[#allocation2 + $0xc] sm:$0xf] %v974_v26  ;;  %v6393_v26 = vld [vmem:[%s6637_s20 + $0x58] sm:$0xff]  }
  0xbd   : > { %v659_v30 = vshrl.u32 %v617_v27, 16  ;;  %v662_v32 = vshll.u32 %v617_v27, 16  ;;  %v490_v27 = vsel %vm6657_vm2, 0, %v489_v18  ;;  %494 = vst [vmem:[#allocation2 + $0x48] sm:$0x1] %v493_v29 }
  0xbe   : > { %491 = vst [vmem:[#allocation2 + $0x3c] sm:$0x1] %v490_v27 }
  0xbf   : > { %v661_v31 = vrot.slane %v659_v30, 7 }
  0xc0   : > { %v387_v36 = vpop.f32.mrf.mxu0 }
  0xc1   : > { %v664_v38 = vor.u32 %v662_v32, %v661_v31  ;;  %v666_v39 = vrot.slane %v661_v31, 4  ;;  %v586_v40 = vmax.f32 %v387_v36, 0.0 }
  0xc3   : > { %v665_v42 = vsel %vm6691_vm8, %v657_v37, %v664_v38  ;;  %v978_v43 = vsel %vm6657_vm2, %v666_v39, %v977_v35  ;;  %v618_v44 = vpack.c.bf16 %v586_v40, %v586_v40  ;;  %426 = vmatmul.bf16.gmra.mxu0 %v302_v33  ;;  %v1957_v8 = vld [vmem:[#allocation2 + $0xc] sm:$0xe]  ;;  %v6221_v33 = vunpack.c.l.bf16 %v6393_v26  ;;  %v987_v39 = vld [vmem:[#allocation2 + $0x24] sm:$0xf] }
  0xc4   : > { %976 = vst.msk [vmem:[#allocation2 + $0x10] sm:$0xf] %vm462_vm5, %v665_v42  ;;  %v5697_v22 = vrot.slane %v1957_v8, 9  ;;  %v6222_v37 = vunpack.c.h.bf16 %v6393_v26  ;;  %v6145_v26 = vld [vmem:[%s8150_s2 + $0x38] sm:$0xff] }
  0xc5   : > { %979 = vst [vmem:[#allocation2 + $0x14] sm:$0x1] %v978_v43  ;;  %v668_v47 = vshrl.u32 %v618_v44, 16  ;;  %v671_v52 = vshll.u32 %v618_v44, 16  ;;  %v283_v45 = vmax.f32 %v6221_v33, 0.0  ;;  %2536 = vmatpush.bf16.msrb.mxu1 %v6145_v26 }
  0xc6   : > { %v994_v33 = vld [vmem:[#allocation2 + $0x30] sm:$0xf] }
  0xc7   : > { %v670_v50 = vrot.slane %v668_v47, 7 }
  0xc8   : > { %v389_v55 = vpop.f32.mrf.mxu0 }
  0xc9   : > { %v673_v57 = vor.u32 %v671_v52, %v670_v50  ;;  %v587_v58 = vmax.f32 %v389_v55, 0.0  ;;  %v674_v9 = vrot.slane %v670_v50, 4  ;;  %v284_v52 = vmax.f32 %v6222_v37, 0.0  ;;  %v6147_v55 = vld [vmem:[%s8150_s2 + $0x48] sm:$0xff] }
  0xca   : > { %3202 = vmatpush.bf16.msrb.mxu2 %v6147_v55 }
  0xcb   : > { %v981_v62 = vsel %vm6682_vm6, %v673_v57, %v980_v54  ;;  %v619_v63 = vpack.c.bf16 %v587_v58, %v587_v58  ;;  %v6724_v4 = vld [vmem:[#allocation2 + $0x10] sm:$0xf] }
  0xcc   : > { %982 = vst [vmem:[#allocation2 + $0x18] sm:$0xf] %v981_v62  ;;  %v2016_v17 = vrot.slane %v6724_v4, 5  ;;  %v6739_v21 = vld [vmem:[#allocation2 + $0x14] sm:$0x1]  ;;  %v304_v62 = vpack.c.bf16 %v284_v52, %v283_v45 }
  0xcd   : > { %v676_v2 = vshrl.u32 %v619_v63, 16  ;;  %v679_v6 = vshll.u32 %v619_v63, 16  ;;  %v2019_v32 = vrot.slane %v6739_v21, 5 }
  0xce   : > { %v2017_v30 = vsel %vm6735_vm11, %v5697_v22, %v2016_v17  ;;  %v2018_v31 = vrot.slane %v2016_v17, 4 }
  0xcf   : > { %v678_v5 = vrot.slane %v676_v2, 7  ;;  %v2126_v41 = vunpack.c.l.b16 %v2017_v30 }
  0xd0   : > { %v392_v11 = vpop.f32.mrf.mxu0  ;;  %v2020_v38 = vsel %vm6735_vm11, %v2018_v31, %v2019_v32 }
  0xd1   : > { %v681_v12 = vor.u32 %v679_v6, %v678_v5  ;;  %v683_v13 = vrot.slane %v678_v5, 4  ;;  %v588_v14 = vmax.f32 %v392_v11, 0.0  ;;  %v2127_v42 = vunpack.c.l.b16 %v2020_v38 }
  0xd3   : > { %v682_v23 = vsel %vm6691_vm8, %v674_v9, %v681_v12  ;;  %v985_v24 = vsel %vm6657_vm2, %v683_v13, %v984_v10  ;;  %v620_v25 = vpack.c.bf16 %v588_v14, %v588_v14  ;;  %431 = vmatmul.bf16.gmra.mxu0 %v303_v7  ;;  %v6758_v47 = vpack.c.b16 %v2127_v42, %v2126_v41  ;;  %v1958_v57 = vld [vmem:[#allocation2 + $0x18] sm:$0xe]  ;;  %v6394_v9 = vld [vmem:[%s6637_s20 + $0x60] sm:$0xff]  }
  0xd4   : > { %983 = vst.msk [vmem:[#allocation2 + $0x1c] sm:$0xf] %vm462_vm5, %v682_v23  ;;  %v5698_v2 = vrot.slane %v1958_v57, 9  ;;  %v6225_v17 = vunpack.c.l.bf16 %v6394_v9  ;;  %v6226_v18 = vunpack.c.h.bf16 %v6394_v9 }
  0xd5   : > { %986 = vst [vmem:[#allocation2 + $0x20] sm:$0x1] %v985_v24  ;;  %v685_v28 = vshrl.u32 %v620_v25, 16  ;;  %v688_v36 = vshll.u32 %v620_v25, 16 }
  0xd6   : > { %v285_v41 = vmax.f32 %v6225_v17, 0.0  ;;  %v286_v42 = vmax.f32 %v6226_v18, 0.0 }
  0xd7   : > { %v687_v35 = vrot.slane %v685_v28, 7 }
  0xd8   : > { %v394_v40 = vpop.f32.mrf.mxu0 }
  0xd9   : > { %v690_v43 = vor.u32 %v688_v36, %v687_v35  ;;  %v589_v44 = vmax.f32 %v394_v40, 0.0  ;;  %v691_v5 = vrot.slane %v687_v35, 4 }
  0xdb   : > { %v988_v49 = vsel %vm6682_vm6, %v690_v43, %v987_v39  ;;  %v621_v50 = vpack.c.bf16 %v589_v44, %v589_v44  ;;  %v6764_v54 = vld [vmem:[#allocation2 + $0x1c] sm:$0xf] }
  0xdc   : > { %989 = vst [vmem:[#allocation2 + $0x24] sm:$0xf] %v988_v49  ;;  %v2023_v58 = vrot.slane %v6764_v54, 5  ;;  %v6771_v63 = vld [vmem:[#allocation2 + $0x20] sm:$0x1] }
  0xdd   : > { %v693_v48 = vshrl.u32 %v621_v50, 16  ;;  %v696_v61 = vshll.u32 %v621_v50, 16  ;;  %v2026_v11 = vrot.slane %v6771_v63, 5  ;;  %v548_v50 = vld [vmem:[#allocation2 + $0x50] sm:$0x1] }
  0xde   : > { %v2024_v59 = vsel %vm6735_vm11, %v5698_v2, %v2023_v58  ;;  %v2025_v10 = vrot.slane %v2023_v58, 4  ;;  %v549_v9 = vsel %vm6666_vm4, 0, %v548_v50 }
  0xdf   : > { %v695_v60 = vrot.slane %v693_v48, 7  ;;  %v2128_v27 = vunpack.c.l.b16 %v2024_v59  ;;  %v998_v59 = vld [vmem:[#allocation2 + $0x38] sm:$0x1]  ;;  %550 = vst [vmem:[#allocation2 + $0x50] sm:$0x1] %v549_v9 }
  0xe0   : > { %v397_v1 = vpop.f32.mrf.mxu0  ;;  %v2027_v23 = vsel %vm6735_vm11, %v2025_v10, %v2026_v11 }
  0xe1   : > { %v698_v6 = vor.u32 %v696_v61, %v695_v60  ;;  %v700_v7 = vrot.slane %v695_v60, 4  ;;  %v590_v8 = vmax.f32 %v397_v1, 0.0  ;;  %v2129_v28 = vunpack.c.l.b16 %v2027_v23 }
  0xe2   : > { %v305_v60 = vpack.c.bf16 %v286_v42, %v285_v41  ;;  %v6817_v41 = vld [vmem:[#allocation2 + $0xc] sm:$0xf] }
  0xe3   : > { %v699_v12 = vsel %vm6691_vm8, %v691_v5, %v698_v6  ;;  %v992_v13 = vsel %vm6657_vm2, %v700_v7, %v991_v0  ;;  %v622_v14 = vpack.c.bf16 %v590_v8, %v590_v8  ;;  %436 = vmatmul.bf16.gmra.mxu0 %v304_v62  ;;  %v1091_v15 = vld [vmem:[#allocation2 + $0x24] sm:$0xf]  ;;  %v6789_v32 = vpack.c.b16 %v2129_v28, %v2128_v27  ;;  %v6395_v8 = vld [vmem:[%s6637_s20 + $0x68] sm:$0xff]  }
  0xe4   : > { %990 = vst.msk [vmem:[#allocation2 + $0x28] sm:$0xf] %vm462_vm5, %v699_v12  ;;  %v1213_v22 = vshrl.u32 %v1091_v15, 16  ;;  %v1216_v25 = vshll.u32 %v1091_v15, 16  ;;  %v1959_v36 = vld [vmem:[#allocation2 + $0x24] sm:$0xe]  ;;  %v6230_v26 = vunpack.c.h.bf16 %v6395_v8 }
  0xe5   : > { %993 = vst [vmem:[#allocation2 + $0x2c] sm:$0x1] %v992_v13  ;;  %v702_v24 = vshrl.u32 %v622_v14, 16  ;;  %v705_v31 = vshll.u32 %v622_v14, 16  ;;  %v5699_v49 = vrot.slane %v1959_v36, 9 }
  0xe6   : > { %v1215_v37 = vrot.slane %v1213_v22, 4  ;;  %v1218_v38 = vrot.slane %v1216_v25, 5  ;;  %v6229_v25 = vunpack.c.l.bf16 %v6395_v8 }
  0xe7   : > { %v704_v30 = vrot.slane %v702_v24, 7 }
  0xe8   : > { %v399_v35 = vpop.f32.mrf.mxu0  ;;  %v1219_v55 = vor.u32 %v1218_v38, %v1215_v37 }
  0xe9   : > { %v707_v39 = vor.u32 %v705_v31, %v704_v30  ;;  %v591_v40 = vmax.f32 %v399_v35, 0.0  ;;  %v708_v57 = vrot.slane %v704_v30, 4 }
  0xea   : > { %v1220_v13 = vrot.slane %v1219_v55, 4 }
  0xeb   : > { %v995_v43 = vsel %vm6682_vm6, %v707_v39, %v994_v33  ;;  %v623_v44 = vpack.c.bf16 %v591_v40, %v591_v40  ;;  %v6109_v45 = vld [vmem:[#allocation2 + $0x24] sm:$0xff]  ;;  %v495_v33 = vld [vmem:[#allocation2 + $0x54] sm:$0x1] }
  0xec   : > { %v1092_v46 = vld [vmem:[#allocation2 + $0x28] sm:$0xf]  ;;  %996 = vst [vmem:[#allocation2 + $0x30] sm:$0xf] %v995_v43  ;;  %v1124_v52 = vld [vmem:[#allocation2 + $0x2c] sm:$0x1]  ;;  %5683 = vmatmul.msk.bf16.vlgmr.msra.gmra.mxu2 %vm1589_vm12, %v6109_v45 }
  0xed   : > { %v2030_v53 = vrot.slane %v1092_v46, 5  ;;  %v1222_v48 = vshll.u32 %v1092_v46, 16  ;;  %v710_v58 = vshrl.u32 %v623_v44, 16  ;;  %v1226_v61 = vshrl.u32 %v1092_v46, 16 }
  0xee   : > { %v2033_v1 = vrot.slane %v1124_v52, 5  ;;  %v713_v6 = vshll.u32 %v623_v44, 16  ;;  %v1232_v14 = vshll.u32 %v1124_v52, 16  ;;  %v496_v40 = vsel %vm6657_vm2, 0, %v495_v33  ;;  %v1005_v33 = vld [vmem:[#allocation2 + $0x44] sm:$0x1] }
  0xef   : > { %v2031_v62 = vsel %vm6735_vm11, %v5699_v49, %v2030_v53  ;;  %v2032_v0 = vrot.slane %v2030_v53, 4  ;;  %v1224_v2 = vrot.slane %v1222_v48, 5  ;;  %v712_v5 = vrot.slane %v710_v58, 7  ;;  %497 = vst [vmem:[#allocation2 + $0x54] sm:$0x1] %v496_v40 }
  0xf0   : > { %v1228_v7 = vrot.slane %v1226_v61, 4  ;;  %v402_v10 = vpop.f32.mrf.mxu0  ;;  %v2130_v12 = vunpack.c.l.b16 %v2031_v62  ;;  %v1234_v36 = vrot.slane %v1232_v14, 5  ;;  %v6821_v43 = vmax.f32 %v6229_v25, 0.0  ;;  %v1001_v49 = vld [vmem:[#allocation2 + $0x3c] sm:$0xf] }
  0xf1   : > { %v2034_v11 = vsel %vm6735_vm11, %v2032_v0, %v2033_v1  ;;  %v715_v15 = vor.u32 %v713_v6, %v712_v5  ;;  %v717_v16 = vrot.slane %v712_v5, 4  ;;  %v592_v17 = vmax.f32 %v402_v10, 0.0  ;;  %v6396_v0 = vld [vmem:[%s6637_s20 + $0x70] sm:$0xff]   ;;  %v551_v10 = vld [vmem:[#allocation2 + $0x5c] sm:$0x1] }
  0xf2   : > { %v2131_v18 = vunpack.c.l.b16 %v2034_v11  ;;  %v1225_v23 = vsel %vm6803_vm15, %v1220_v13, %v1224_v2  ;;  %v1229_v24 = vor.u32 %v1228_v7, %v1224_v2  ;;  %v6823_v44 = vmax.f32 %v6230_v26, 0.0 }
  0xf3   : > { %v716_v27 = vsel %vm6691_vm8, %v708_v57, %v715_v15  ;;  %v999_v28 = vsel %vm6657_vm2, %v717_v16, %v998_v59  ;;  %v624_v29 = vpack.c.bf16 %v592_v17, %v592_v17  ;;  %441 = vmatmul.bf16.gmra.mxu0 %v305_v60  ;;  %v1093_v31 = vld [vmem:[#allocation2 + $0x30] sm:$0xf]  ;;  %v1535_v50 = vunpack.c.l.b16 %v1225_v23 }
  0xf4   : > { %v2159_v30 = vpack.c.b16 %v2131_v18, %v2130_v12  ;;  %997 = vst.msk [vmem:[#allocation2 + $0x34] sm:$0xf] %vm462_vm5, %v716_v27  ;;  %v1230_v35 = vrot.slane %v1229_v24, 4  ;;  %v1237_v37 = vshrl.u32 %v1093_v31, 16  ;;  %v1240_v38 = vshll.u32 %v1093_v31, 16 }
  0xf5   : > { %1000 = vst [vmem:[#allocation2 + $0x38] sm:$0x1] %v999_v28  ;;  %v719_v39 = vshrl.u32 %v624_v29, 16  ;;  %v722_v46 = vshll.u32 %v624_v29, 16  ;;  %v6541_v53 = vmov 0   ;;  %v1165_v1 = vshrl.u32 %v6817_v41, 16 }
  0xf6   : > { %5727 = vmatmul.msk.bf16.vlgmr.msra.gmra.mxu3 %vm1589_vm12, %v2159_v30  ;;  %v1235_v42 = vsel %vm6803_vm15, %v1230_v35, %v1234_v36  ;;  %463 = vst.msk [vmem:[#allocation2] sm:$0xf] %vm462_vm5, %v6541_v53  ;;  %v1960_v48 = vld [vmem:[#allocation2 + $0x30] sm:$0xe]  ;;  %v1239_v57 = vrot.slane %v1237_v37, 4  ;;  %v1242_v58 = vrot.slane %v1240_v38, 5  ;;  %v306_v8 = vpack.c.bf16 %v6823_v44, %v6821_v43 }
  0xf7   : > { %v6825_v45 = vrot.slane %v719_v39, 7  ;;  %v1536_v52 = vunpack.c.l.b16 %v1235_v42  ;;  %464 = vst.msk [vmem:[#allocation2 + $0x4] sm:$0xf] %vm462_vm5, %v6541_v53  ;;  %v1168_v2 = vshll.u32 %v6817_v41, 16  ;;  %v5700_v59 = vrot.slane %v1960_v48, 9 }
  0xf8   : > { %v404_v55 = vpop.f32.mrf.mxu0  ;;  %466 = vst.msk [vmem:[#allocation2 + $0x8] sm:$0x1] %vm465_vm0, %v6541_v53  ;;  %v1243_v13 = vor.u32 %v1242_v58, %v1239_v57  ;;  %v6233_v15 = vunpack.c.l.bf16 %v6396_v0  ;;  %v6234_v23 = vunpack.c.h.bf16 %v6396_v0  ;;  %v552_v31 = vsel %vm6666_vm4, 0, %v551_v10 }
  0xf9   : > { %v724_v60 = vor.u32 %v722_v46, %v6825_v45  ;;  %v593_v61 = vmax.f32 %v404_v55, 0.0  ;;  %v1564_v62 = vpack.c.b16 %v1536_v52, %v1535_v50  ;;  %468 = vst.msk [vmem:[#allocation2 + $0xcc] sm:$0xf] %vm462_vm5, %v6541_v53  ;;  %v725_v16 = vrot.slane %v6825_v45, 4 }
  0xfa   : > { %469 = vst.msk [vmem:[#allocation2 + $0xd0] sm:$0xf] %vm462_vm5, %v6541_v53  ;;  %v1244_v38 = vrot.slane %v1243_v13, 4  ;;  %v6854_v50 = vmax.f32 %v6234_v23, 0.0 }
  0xfb   : > { %v1002_v5 = vsel %vm6682_vm6, %v724_v60, %v1001_v49  ;;  %v625_v6 = vpack.c.bf16 %v593_v61, %v593_v61  ;;  %5595 = vmatmul.msk.bf16.vlgmr.msra.gmra.mxu1 %vm1589_vm12, %v1564_v62  ;;  %v6110_v7 = vld [vmem:[#allocation2 + $0x30] sm:$0xff]  ;;  %553 = vst [vmem:[#allocation2 + $0x5c] sm:$0x1] %v552_v31  ;;  %v6852_v49 = vmax.f32 %v6233_v15, 0.0 }
  0xfc   : > { %v1094_v9 = vld [vmem:[#allocation2 + $0x34] sm:$0xf]  ;;  %1003 = vst [vmem:[#allocation2 + $0x3c] sm:$0xf] %v1002_v5  ;;  %v1125_v11 = vld [vmem:[#allocation2 + $0x38] sm:$0x1]  ;;  %5684 = vmatmul.msk.bf16.gmra.mxu2 %vm1589_vm12, %v6110_v7 }
  0xfd   : > { %v2037_v12 = vrot.slane %v1094_v9, 5  ;;  %v1246_v14 = vshll.u32 %v1094_v9, 16  ;;  %v727_v17 = vshrl.u32 %v625_v6, 16  ;;  %v1250_v18 = vshrl.u32 %v1094_v9, 16  ;;  %470 = vst.msk [vmem:[#allocation2 + $0xd4] sm:$0x1] %vm465_vm0, %v6541_v53 }
  0xfe   : > { %v2040_v26 = vrot.slane %v1125_v11, 5  ;;  %v730_v29 = vshll.u32 %v625_v6, 16  ;;  %v1256_v39 = vshll.u32 %v1125_v11, 16  ;;  %v474_v52 = vld [vmem:[#allocation2] sm:$0x1] }
  0xff   : > { %v2038_v24 = vsel %vm6735_vm11, %v5700_v59, %v2037_v12  ;;  %v2039_v25 = vrot.slane %v2037_v12, 4  ;;  %v1248_v27 = vrot.slane %v1246_v14, 5  ;;  %v729_v28 = vrot.slane %v727_v17, 7  ;;  %v498_v53 = vld [vmem:[#allocation2 + $0x60] sm:$0x1] }
 0x100   : > { %v1252_v30 = vrot.slane %v1250_v18, 4  ;;  %v407_v35 = vpop.f32.mrf.mxu0  ;;  %v2132_v37 = vunpack.c.l.b16 %v2038_v24  ;;  %v530_v61 = vld [vmem:[#allocation2 + $0x8] sm:$0x1]  ;;  %v1258_v0 = vrot.slane %v1256_v39, 5  ;;  %v499_v10 = vsel %vm6657_vm2, 0, %v498_v53 }
 0x101   : > { %v2041_v36 = vsel %vm6735_vm11, %v2039_v25, %v2040_v26  ;;  %v732_v40 = vor.u32 %v730_v29, %v729_v28  ;;  %v734_v42 = vrot.slane %v729_v28, 4  ;;  %v594_v43 = vmax.f32 %v407_v35, 0.0  ;;  %500 = vst [vmem:[#allocation2 + $0x60] sm:$0x1] %v499_v10  ;;  %v1008_v18 = vld [vmem:[#allocation2 + $0x48] sm:$0xf] }
 0x102   : > { %v2133_v44 = vunpack.c.l.b16 %v2041_v36  ;;  %v1249_v45 = vsel %vm6803_vm15, %v1244_v38, %v1248_v27  ;;  %v1253_v46 = vor.u32 %v1252_v30, %v1248_v27  ;;  %v475_v13 = vsel %vm6657_vm2, 0, %v474_v52  ;;  %v6874_v28 = vld [vmem:[%s6637_s20 + $0x78] sm:$0xff]  }
 0x103   : > { %v733_v55 = vsel %vm6691_vm8, %v725_v16, %v732_v40  ;;  %v1006_v48 = vsel %vm6657_vm2, %v734_v42, %v1005_v33  ;;  %v626_v57 = vpack.c.bf16 %v594_v43, %v594_v43  ;;  %446 = vmatmul.bf16.gmra.mxu0 %v306_v8  ;;  %v1095_v60 = vld [vmem:[#allocation2 + $0x3c] sm:$0xf]  ;;  %v1537_v9 = vunpack.c.l.b16 %v1249_v45  ;;  %476 = vst [vmem:[#allocation2] sm:$0x1] %v475_v13  ;;  %v6881_v33 = vld [vmem:[#allocation2 + $0x4] sm:$0xf] }
 0x104   : > { %v2160_v58 = vpack.c.b16 %v2133_v44, %v2132_v37  ;;  %1004 = vst.msk [vmem:[#allocation2 + $0x40] sm:$0xf] %vm462_vm5, %v733_v55  ;;  %v1254_v62 = vrot.slane %v1253_v46, 4  ;;  %v1261_v5 = vshrl.u32 %v1095_v60, 16  ;;  %v1264_v6 = vshll.u32 %v1095_v60, 16 }
 0x105   : > { %1007 = vst [vmem:[#allocation2 + $0x44] sm:$0x1] %v1006_v48  ;;  %v736_v7 = vshrl.u32 %v626_v57, 16  ;;  %v1961_v59 = vld [vmem:[#allocation2 + $0x3c] sm:$0xe]  ;;  %v739_v15 = vshll.u32 %v626_v57, 16  ;;  %v6237_v45 = vunpack.c.l.bf16 %v6874_v28  ;;  %v6238_v46 = vunpack.c.h.bf16 %v6874_v28 }
 0x106   : > { %5728 = vmatmul.msk.bf16.gmra.mxu3 %vm1589_vm12, %v2160_v58  ;;  %v1259_v8 = vsel %vm6803_vm15, %v1254_v62, %v1258_v0  ;;  %v1263_v11 = vrot.slane %v1261_v5, 4  ;;  %v1266_v12 = vrot.slane %v1264_v6, 5  ;;  %v531_v17 = vsel %vm6666_vm4, 0, %v530_v61  ;;  %v554_v43 = vld [vmem:[#allocation2 + $0x68] sm:$0x1] }
 0x107   : > { %v6868_v14 = vrot.slane %v736_v7, 7  ;;  %v1538_v16 = vunpack.c.l.b16 %v1259_v8  ;;  %532 = vst [vmem:[#allocation2 + $0x8] sm:$0x1] %v531_v17  ;;  %v6878_v29 = vrot.slane %v1165_v1, 4  ;;  %v5701_v31 = vrot.slane %v1961_v59, 9 }
 0x108   : > { %v409_v23 = vpop.f32.mrf.mxu0  ;;  %v1267_v24 = vor.u32 %v1266_v12, %v1263_v11  ;;  %v6885_v35 = vrot.slane %v1168_v2, 5  ;;  %v1174_v36 = vshll.u32 %v6724_v4, 16  ;;  %v307_v1 = vpack.c.bf16 %v6854_v50, %v6852_v49  ;;  %v1012_v6 = vld [vmem:[#allocation2 + $0x50] sm:$0x1]  ;;  %v501_v28 = vld [vmem:[#allocation2 + $0x6c] sm:$0x1] }
 0x109   : > { %v741_v25 = vor.u32 %v739_v15, %v6868_v14  ;;  %v595_v26 = vmax.f32 %v409_v23, 0.0  ;;  %v1565_v27 = vpack.c.b16 %v1538_v16, %v1537_v9  ;;  %v742_v30 = vrot.slane %v6868_v14, 4 }
 0x10a   : > { %v6893_v42 = vrot.slane %v1267_v24, 4  ;;  %v1150_v57 = vshll.u32 %v6881_v33, 16  ;;  %v1085_v53 = vld [vmem:[#allocation2] sm:$0xf]  ;;  %v555_v5 = vsel %vm6666_vm4, 0, %v554_v43  ;;  %v1154_v8 = vshrl.u32 %v6881_v33, 16 }
 0x10b   : > { %v1009_v37 = vsel %vm6682_vm6, %v741_v25, %v1008_v18  ;;  %v627_v38 = vpack.c.bf16 %v595_v26, %v595_v26  ;;  %5596 = vmatmul.msk.bf16.gmra.mxu1 %vm1589_vm12, %v1565_v27  ;;  %v6111_v39 = vld [vmem:[#allocation2 + $0x3c] sm:$0xff]  ;;  %556 = vst [vmem:[#allocation2 + $0x68] sm:$0x1] %v555_v5  ;;  %v1141_v10 = vshrl.u32 %v1085_v53, 16  ;;  %v1144_v18 = vshll.u32 %v1085_v53, 16 }
 0x10c   : > { %v1096_v40 = vld [vmem:[#allocation2 + $0x40] sm:$0xf]  ;;  %1010 = vst [vmem:[#allocation2 + $0x48] sm:$0xf] %v1009_v37  ;;  %v1126_v41 = vld [vmem:[#allocation2 + $0x44] sm:$0x1]  ;;  %5685 = vmatmul.msk.bf16.gmra.mxu2 %vm1589_vm12, %v6111_v39 }
 0x10d   : > { %v2044_v2 = vrot.slane %v1096_v40, 5  ;;  %v1270_v44 = vshll.u32 %v1096_v40, 16  ;;  %v744_v52 = vshrl.u32 %v627_v38, 16  ;;  %v2047_v55 = vrot.slane %v1126_v41, 5 }
 0x10e   : > { %v1274_v48 = vshrl.u32 %v1096_v40, 16  ;;  %v1280_v60 = vshll.u32 %v1126_v41, 16  ;;  %v747_v62 = vshll.u32 %v627_v38, 16  ;;  %v1143_v39 = vrot.slane %v1141_v10, 4 }
 0x10f   : > { %v2045_v49 = vsel %vm6735_vm11, %v5701_v31, %v2044_v2  ;;  %v2046_v50 = vrot.slane %v2044_v2, 4  ;;  %v1272_v58 = vrot.slane %v1270_v44, 5  ;;  %v746_v61 = vrot.slane %v744_v52, 7 }
 0x110   : > { %v1276_v0 = vrot.slane %v1274_v48, 4  ;;  %v412_v7 = vpop.f32.mrf.mxu0  ;;  %v2134_v59 = vunpack.c.l.b16 %v2045_v49  ;;  %v1282_v17 = vrot.slane %v1280_v60, 5  ;;  %v1178_v43 = vshrl.u32 %v6724_v4, 16  ;;  %v1015_v48 = vld [vmem:[#allocation2 + $0x54] sm:$0xf] }
 0x111   : > { %v2048_v9 = vsel %vm6735_vm11, %v2046_v50, %v2047_v55  ;;  %v749_v11 = vor.u32 %v747_v62, %v746_v61  ;;  %v751_v12 = vrot.slane %v746_v61, 4  ;;  %v596_v13 = vmax.f32 %v412_v7, 0.0  ;;  %v6924_v61 = vld [vmem:[#allocation2 + $0x8] sm:$0x1] }
 0x112   : > { %v2135_v14 = vunpack.c.l.b16 %v2048_v9  ;;  %v1273_v15 = vsel %vm6803_vm15, %v6893_v42, %v1272_v58  ;;  %v1277_v16 = vor.u32 %v1276_v0, %v1272_v58  ;;  %v1146_v42 = vrot.slane %v1144_v18, 5 }
 0x113   : > { %v750_v23 = vsel %vm6691_vm8, %v742_v30, %v749_v11  ;;  %v1013_v24 = vsel %vm6657_vm2, %v751_v12, %v1012_v6  ;;  %v628_v25 = vpack.c.bf16 %v596_v13, %v596_v13  ;;  %451 = vmatmul.bf16.gmra.mxu0 %v307_v1  ;;  %v1097_v27 = vld [vmem:[#allocation2 + $0x48] sm:$0xf]  ;;  %v502_v30 = vsel %vm6657_vm2, 0, %v501_v28 }
 0x114   : > { %v2161_v26 = vpack.c.b16 %v2135_v14, %v2134_v59  ;;  %1011 = vst.msk [vmem:[#allocation2 + $0x4c] sm:$0xf] %vm462_vm5, %v750_v23  ;;  %v1278_v31 = vrot.slane %v1277_v16, 4  ;;  %v1285_v37 = vshrl.u32 %v1097_v27, 16  ;;  %v1288_v38 = vshll.u32 %v1097_v27, 16 }
 0x115   : > { %1014 = vst [vmem:[#allocation2 + $0x50] sm:$0x1] %v1013_v24  ;;  %v753_v40 = vshrl.u32 %v628_v25, 16  ;;  %v6920_v41 = vmax.f32 %v6237_v45, 0.0  ;;  %v756_v55 = vshll.u32 %v628_v25, 16  ;;  %v1539_v49 = vunpack.c.l.b16 %v1273_v15 }
 0x116   : > { %5729 = vmatmul.msk.bf16.gmra.mxu3 %vm1589_vm12, %v2161_v26  ;;  %v1283_v1 = vsel %vm6803_vm15, %v1278_v31, %v1282_v17  ;;  %v1287_v2 = vrot.slane %v1285_v37, 4  ;;  %v1290_v44 = vrot.slane %v1288_v38, 5  ;;  %503 = vst [vmem:[#allocation2 + $0x6c] sm:$0x1] %v502_v30  ;;  %v1962_v58 = vld [vmem:[#allocation2 + $0x48] sm:$0xe]  ;;  %v1147_v62 = vor.u32 %v1146_v42, %v1143_v39 }
 0x117   : > { %v6922_v52 = vrot.slane %v753_v40, 7  ;;  %v1540_v50 = vunpack.c.l.b16 %v1283_v1  ;;  %v292_v53 = vmax.f32 %v6238_v46, 0.0  ;;  %v6926_v0 = vrot.slane %v1150_v57, 5  ;;  %v1019_v42 = vld [vmem:[#allocation2 + $0x5c] sm:$0x1] }
 0x118   : > { %v414_v60 = vpop.f32.mrf.mxu0  ;;  %v1156_v5 = vrot.slane %v1154_v8, 4  ;;  %v1291_v9 = vor.u32 %v1290_v44, %v1287_v2  ;;  %v5702_v59 = vrot.slane %v1962_v58, 9  ;;  %v1171_v10 = vor.u32 %v6885_v35, %v6878_v29 }
 0x119   : > { %v758_v45 = vor.u32 %v756_v55, %v6922_v52  ;;  %v597_v6 = vmax.f32 %v414_v60, 0.0  ;;  %v1566_v7 = vpack.c.b16 %v1540_v50, %v1539_v49  ;;  %v6933_v11 = vrot.slane %v1174_v36, 5  ;;  %v557_v60 = vld [vmem:[#allocation2 + $0x74] sm:$0x1] }
 0x11a   : > { %v6935_v46 = vrot.slane %v1178_v43, 4  ;;  %v759_v12 = vrot.slane %v6922_v52, 4  ;;  %v1160_v15 = vshll.u32 %v6924_v61, 16  ;;  %v308_v16 = vpack.c.bf16 %v292_v53, %v6920_v41 }
 0x11b   : > { %v1016_v57 = vsel %vm6682_vm6, %v758_v45, %v1015_v48  ;;  %v629_v8 = vpack.c.bf16 %v597_v6, %v597_v6  ;;  %5597 = vmatmul.msk.bf16.gmra.mxu1 %vm1589_vm12, %v1566_v7  ;;  %v6112_v13 = vld [vmem:[#allocation2 + $0x48] sm:$0xff]  ;;  %v1157_v18 = vor.u32 %v1156_v5, %v6926_v0  ;;  %v1292_v24 = vrot.slane %v1291_v9, 4 }
 0x11c   : > { %v1098_v14 = vld [vmem:[#allocation2 + $0x4c] sm:$0xf]  ;;  %1017 = vst [vmem:[#allocation2 + $0x54] sm:$0xf] %v1016_v57  ;;  %v1127_v4 = vld [vmem:[#allocation2 + $0x50] sm:$0x1]  ;;  %5686 = vmatmul.msk.bf16.gmra.mxu2 %vm1589_vm12, %v6112_v13  ;;  %v1181_v53 = vor.u32 %v6935_v46, %v6933_v11 }
 0x11d   : > { %v2051_v36 = vrot.slane %v1098_v14, 5  ;;  %v1294_v17 = vshll.u32 %v1098_v14, 16  ;;  %v761_v23 = vshrl.u32 %v629_v8, 16  ;;  %v1298_v25 = vshrl.u32 %v1098_v14, 16 }
 0x11e   : > { %v1148_v26 = vrot.slane %v1147_v62, 4  ;;  %v2054_v31 = vrot.slane %v1127_v4, 5  ;;  %v764_v39 = vshll.u32 %v629_v8, 16  ;;  %v1162_v30 = vrot.slane %v1160_v15, 5 }
 0x11f   : > { %v2052_v27 = vsel %vm6735_vm11, %v5702_v59, %v2051_v36  ;;  %v2053_v28 = vrot.slane %v2051_v36, 4  ;;  %v1296_v37 = vrot.slane %v1294_v17, 5  ;;  %v763_v38 = vrot.slane %v761_v23, 7  ;;  %v504_v17 = vld [vmem:[#allocation2 + $0x78] sm:$0x1] }
 0x120   : > { %v1300_v40 = vrot.slane %v1298_v25, 4  ;;  %v417_v43 = vpop.f32.mrf.mxu0  ;;  %v2136_v41 = vunpack.c.l.b16 %v2052_v27  ;;  %v1304_v2 = vshll.u32 %v1127_v4, 16  ;;  %v1158_v44 = vrot.slane %v1157_v18, 4  ;;  %v1022_v25 = vld [vmem:[#allocation2 + $0x60] sm:$0xf] }
 0x121   : > { %v2055_v1 = vsel %vm6735_vm11, %v2053_v28, %v2054_v31  ;;  %v766_v52 = vor.u32 %v764_v39, %v763_v38  ;;  %v768_v55 = vrot.slane %v763_v38, 4  ;;  %v598_v48 = vmax.f32 %v417_v43, 0.0 }
 0x122   : > { %v2137_v49 = vunpack.c.l.b16 %v2055_v1  ;;  %v1297_v50 = vsel %vm6803_vm15, %v1292_v24, %v1296_v37  ;;  %v1301_v58 = vor.u32 %v1300_v40, %v1296_v37  ;;  %v1198_v62 = vshll.u32 %v6764_v54, 16 }
 0x123   : > { %v767_v5 = vsel %vm6691_vm8, %v759_v12, %v766_v52  ;;  %v1020_v45 = vsel %vm6657_vm2, %v768_v55, %v1019_v42  ;;  %v630_v6 = vpack.c.bf16 %v598_v48, %v598_v48  ;;  %456 = vmatmul.bf16.gmra.mxu0 %v308_v16  ;;  %v1099_v9 = vld [vmem:[#allocation2 + $0x54] sm:$0xf]  ;;  %v1306_v57 = vrot.slane %v1304_v2, 5 }
 0x124   : > { %v2162_v7 = vpack.c.b16 %v2137_v49, %v2136_v41  ;;  %1018 = vst.msk [vmem:[#allocation2 + $0x58] sm:$0xf] %vm462_vm5, %v767_v5  ;;  %v1302_v59 = vrot.slane %v1301_v58, 4  ;;  %v1153_v46 = vsel %vm6803_vm15, %v1148_v26, %v6926_v0  ;;  %v1202_v8 = vshrl.u32 %v6764_v54, 16  ;;  %v1963_v40 = vld [vmem:[#allocation2 + $0x54] sm:$0xe] }
 0x125   : > { %1021 = vst [vmem:[#allocation2 + $0x5c] sm:$0x1] %v1020_v45  ;;  %v770_v13 = vshrl.u32 %v630_v6, 16  ;;  %v1163_v12 = vsel %vm6803_vm15, %v1158_v44, %v1162_v30  ;;  %v558_v14 = vsel %vm6666_vm4, 0, %v557_v60  ;;  %v1309_v15 = vshrl.u32 %v1099_v9, 16 }
 0x126   : > { %5730 = vmatmul.msk.bf16.gmra.mxu3 %vm1589_vm12, %v2162_v7  ;;  %v773_v16 = vshll.u32 %v630_v6, 16  ;;  %v1307_v4 = vsel %vm6803_vm15, %v1302_v59, %v1306_v57  ;;  %v1541_v36 = vunpack.c.l.b16 %v1297_v50  ;;  %559 = vst [vmem:[#allocation2 + $0x74] sm:$0x1] %v558_v14  ;;  %v1312_v0 = vshll.u32 %v1099_v9, 16  ;;  %v560_v7 = vld [vmem:[#allocation2 + $0x80] sm:$0x1] }
 0x127   : > { %v6970_v54 = vrot.slane %v770_v13, 7  ;;  %v1542_v18 = vunpack.c.l.b16 %v1307_v4  ;;  %v1311_v23 = vrot.slane %v1309_v15, 4  ;;  %v505_v24 = vsel %vm6657_vm2, 0, %v504_v17  ;;  %v1026_v13 = vld [vmem:[#allocation2 + $0x68] sm:$0x1] }
 0x128   : > { %v419_v26 = vpop.f32.mrf.mxu0  ;;  %v1529_v27 = vunpack.c.l.b16 %v1153_v46  ;;  %v1530_v28 = vunpack.c.l.b16 %v1163_v12  ;;  %v1314_v31 = vrot.slane %v1312_v0, 5  ;;  %506 = vst [vmem:[#allocation2 + $0x78] sm:$0x1] %v505_v24  ;;  %v6978_v42 = vrot.slane %v1171_v10, 4 }
 0x129   : > { %v775_v37 = vor.u32 %v773_v16, %v6970_v54  ;;  %v599_v38 = vmax.f32 %v419_v26, 0.0  ;;  %v1567_v39 = vpack.c.b16 %v1542_v18, %v1541_v36  ;;  %v6980_v43 = vrot.slane %v1181_v53, 4 }
 0x12a   : > { %v1315_v30 = vor.u32 %v1314_v31, %v1311_v23  ;;  %v1184_v1 = vshll.u32 %v6739_v21, 16  ;;  %v6986_v55 = vrot.slane %v1198_v62, 5  ;;  %v6988_v48 = vrot.slane %v1202_v8, 4  ;;  %v1089_v8 = vld [vmem:[#allocation2 + $0x18] sm:$0xf] }
 0x12b   : > { %v1023_v41 = vsel %vm6682_vm6, %v775_v37, %v1022_v25  ;;  %v631_v2 = vpack.c.bf16 %v599_v38, %v599_v38  ;;  %5598 = vmatmul.msk.bf16.gmra.mxu1 %vm1589_vm12, %v1567_v39  ;;  %v6113_v44 = vld [vmem:[#allocation2 + $0x54] sm:$0xff]  ;;  %v1561_v29 = vpack.c.b16 %v1530_v28, %v1529_v27  ;;  %v5703_v10 = vrot.slane %v1963_v40, 9 }
 0x12c   : > { %v1100_v52 = vld [vmem:[#allocation2 + $0x58] sm:$0xf]  ;;  %1024 = vst [vmem:[#allocation2 + $0x60] sm:$0xf] %v1023_v41  ;;  %v1128_v35 = vld [vmem:[#allocation2 + $0x5c] sm:$0x1]  ;;  %v1177_v21 = vsel %vm6803_vm15, %v6978_v42, %v6933_v11  ;;  %5687 = vmatmul.msk.bf16.gmra.mxu2 %vm1589_vm12, %v6113_v44  ;;  %v1205_v44 = vor.u32 %v6988_v48, %v6986_v55 }
 0x12d   : > { %v2058_v49 = vrot.slane %v1100_v52, 5  ;;  %v776_v50 = vrot.slane %v6970_v54, 4  ;;  %v778_v58 = vshrl.u32 %v631_v2, 16  ;;  %v1316_v60 = vrot.slane %v1315_v30, 4  ;;  %v6476_v48 = vld [vmem:[%s8150_s2 + $0x20] sm:$0xff] }
 0x12e   : > { %v1318_v53 = vshll.u32 %v1100_v52, 16  ;;  %v2061_v45 = vrot.slane %v1128_v35, 5  ;;  %v1322_v6 = vshrl.u32 %v1100_v52, 16  ;;  %v781_v59 = vshll.u32 %v631_v2, 16 }
 0x12f   : > { %v2059_v62 = vsel %vm6735_vm11, %v5703_v10, %v2058_v49  ;;  %v2060_v5 = vrot.slane %v2058_v49, 4  ;;  %v780_v9 = vrot.slane %v778_v58, 7  ;;  %v561_v46 = vsel %vm6666_vm4, 0, %v560_v7  ;;  %v507_v49 = vld [vmem:[#allocation2 + $0x84] sm:$0x1] }
 0x130   : > { %v1320_v57 = vrot.slane %v1318_v53, 5  ;;  %v422_v12 = vpop.f32.mrf.mxu0  ;;  %v2138_v15 = vunpack.c.l.b16 %v2059_v62  ;;  %v1324_v16 = vrot.slane %v1322_v6, 4  ;;  %v1328_v4 = vshll.u32 %v1128_v35, 16  ;;  %562 = vst [vmem:[#allocation2 + $0x80] sm:$0x1] %v561_v46 }
 0x131   : > { %v2062_v14 = vsel %vm6735_vm11, %v2060_v5, %v2061_v45  ;;  %v783_v36 = vor.u32 %v781_v59, %v780_v9  ;;  %v785_v0 = vrot.slane %v780_v9, 4  ;;  %v600_v17 = vmax.f32 %v422_v12, 0.0  ;;  %v1029_v53 = vld [vmem:[#allocation2 + $0x6c] sm:$0xf] }
 0x132   : > { %v2139_v54 = vunpack.c.l.b16 %v2062_v14  ;;  %v1321_v18 = vsel %vm6803_vm15, %v1316_v60, %v1320_v57  ;;  %v1325_v23 = vor.u32 %v1324_v16, %v1320_v57  ;;  %v1186_v24 = vrot.slane %v1184_v1, 5 }
 0x133   : > { %v1189_v25 = vshrl.u32 %v1089_v8, 16  ;;  %v784_v26 = vsel %vm6691_vm8, %v776_v50, %v783_v36  ;;  %v1027_v27 = vsel %vm6657_vm2, %v785_v0, %v1026_v13  ;;  %v632_v28 = vpack.c.bf16 %v600_v17, %v600_v17  ;;  %5592 = vmatmul.msk.bf16.vlgmr.msrb.gmra.mxu0 %vm1589_vm12, %v1561_v29  ;;  %v1101_v37 = vld [vmem:[#allocation2 + $0x60] sm:$0xf] }
 0x134   : > { %v2163_v31 = vpack.c.b16 %v2139_v54, %v2138_v15  ;;  %1025 = vst.msk [vmem:[#allocation2 + $0x64] sm:$0xf] %vm462_vm5, %v784_v26  ;;  %v1326_v38 = vrot.slane %v1325_v23, 4  ;;  %v1330_v39 = vrot.slane %v1328_v4, 5  ;;  %v1333_v40 = vshrl.u32 %v1101_v37, 16  ;;  %2238 = vmatpush.bf16.msrb.mxu0 %v6722_v3 }
 0x135   : > { %v1192_v30 = vshll.u32 %v1089_v8, 16  ;;  %1028 = vst [vmem:[#allocation2 + $0x68] sm:$0x1] %v1027_v27  ;;  %v787_v1 = vshrl.u32 %v632_v28, 16  ;;  %v1187_v41 = vsel %vm6803_vm15, %v6980_v43, %v1186_v24  ;;  %v1336_v2 = vshll.u32 %v1101_v37, 16 }
 0x136   : > { %5731 = vmatmul.msk.bf16.gmra.mxu3 %vm1589_vm12, %v2163_v31  ;;  %v790_v52 = vshll.u32 %v632_v28, 16  ;;  %v1331_v29 = vsel %vm6803_vm15, %v1326_v38, %v1330_v39  ;;  %v1543_v35 = vunpack.c.l.b16 %v1321_v18  ;;  %v1335_v10 = vrot.slane %v1333_v40, 4  ;;  %v1964_v59 = vld [vmem:[#allocation2 + $0x60] sm:$0xe]  ;;  %v563_v23 = vld [vmem:[#allocation2 + $0x8c] sm:$0x1] }
 0x137   : > { %v789_v3 = vrot.slane %v787_v1, 7  ;;  %v1544_v50 = vunpack.c.l.b16 %v1331_v29  ;;  %v1338_v58 = vrot.slane %v1336_v2, 5  ;;  %v508_v60 = vsel %vm6657_vm2, 0, %v507_v49  ;;  %v1033_v38 = vld [vmem:[#allocation2 + $0x74] sm:$0x1] }
 0x138   : > { %v424_v62 = vpop.f32.mrf.mxu0  ;;  %v1532_v43 = vunpack.c.l.b16 %v1187_v41  ;;  %509 = vst [vmem:[#allocation2 + $0x84] sm:$0x1] %v508_v60  ;;  %v1191_v5 = vrot.slane %v1189_v25, 4  ;;  %v1194_v45 = vrot.slane %v1192_v30, 5  ;;  %2239 = vmatpush.bf16.msrb.mxu0 %v6476_v48  ;;  %v1531_v57 = vunpack.c.l.b16 %v1177_v21 }
 0x139   : > { %v792_v6 = vor.u32 %v790_v52, %v789_v3  ;;  %v601_v7 = vmax.f32 %v424_v62, 0.0  ;;  %v1568_v9 = vpack.c.b16 %v1544_v50, %v1543_v35  ;;  %v1339_v46 = vor.u32 %v1338_v58, %v1335_v10 }
 0x13a   : > { %v7032_v15 = vrot.slane %v1205_v44, 4  ;;  %v1208_v16 = vshll.u32 %v6771_v63, 16  ;;  %v1562_v4 = vpack.c.b16 %v1532_v43, %v1531_v57  ;;  %v5704_v0 = vrot.slane %v1964_v59, 9  ;;  %v6146_v59 = vld [vmem:[%s8150_s2 + $0x40] sm:$0xff] }
 0x13b   : > { %v1030_v8 = vsel %vm6682_vm6, %v792_v6, %v1029_v53  ;;  %v633_v13 = vpack.c.bf16 %v601_v7, %v601_v7  ;;  %5599 = vmatmul.msk.bf16.gmra.mxu1 %vm1589_vm12, %v1568_v9  ;;  %v6114_v12 = vld [vmem:[#allocation2 + $0x60] sm:$0xff]  ;;  %v1195_v11 = vor.u32 %v1194_v45, %v1191_v5  ;;  %v793_v42 = vrot.slane %v789_v3, 4  ;;  %3203 = vmatpush.bf16.msrb.mxu2 %v6146_v59 }
 0x13c   : > { %v1102_v14 = vld [vmem:[#allocation2 + $0x64] sm:$0xf]  ;;  %1031 = vst [vmem:[#allocation2 + $0x6c] sm:$0xf] %v1030_v8  ;;  %v1129_v36 = vld [vmem:[#allocation2 + $0x68] sm:$0x1]  ;;  %5688 = vmatmul.msk.bf16.gmra.mxu2 %vm1589_vm12, %v6114_v12 }
 0x13d   : > { %v2065_v17 = vrot.slane %v1102_v14, 5  ;;  %v795_v21 = vshrl.u32 %v633_v13, 16  ;;  %v1340_v54 = vrot.slane %v1339_v46, 4  ;;  %v1342_v18 = vshll.u32 %v1102_v14, 16  ;;  %v510_v12 = vld [vmem:[#allocation2 + $0x90] sm:$0x1] }
 0x13e   : > { %v2068_v26 = vrot.slane %v1129_v36, 5  ;;  %v1346_v27 = vshrl.u32 %v1102_v14, 16  ;;  %v798_v28 = vshll.u32 %v633_v13, 16  ;;  %v564_v37 = vsel %vm6666_vm4, 0, %v563_v23 }
 0x13f   : > { %v2066_v24 = vsel %vm6735_vm11, %v5704_v0, %v2065_v17  ;;  %v2067_v25 = vrot.slane %v2065_v17, 4  ;;  %v797_v63 = vrot.slane %v795_v21, 7  ;;  %v1344_v31 = vrot.slane %v1342_v18, 5  ;;  %565 = vst [vmem:[#allocation2 + $0x8c] sm:$0x1] %v564_v37 }
 0x140   : > { %v427_v39 = vpop.f32.mrf.mxu0  ;;  %v2140_v30 = vunpack.c.l.b16 %v2066_v24  ;;  %v1348_v1 = vrot.slane %v1346_v27, 4  ;;  %v1352_v41 = vshll.u32 %v1129_v36, 16  ;;  %v1196_v49 = vrot.slane %v1195_v11, 4 }
 0x141   : > { %v2069_v40 = vsel %vm6735_vm11, %v2067_v25, %v2068_v26  ;;  %v800_v2 = vor.u32 %v798_v28, %v797_v63  ;;  %v802_v44 = vrot.slane %v797_v63, 4  ;;  %v602_v52 = vmax.f32 %v427_v39, 0.0 }
 0x142   : > { %v2141_v29 = vunpack.c.l.b16 %v2069_v40  ;;  %v1345_v35 = vsel %vm6803_vm15, %v1340_v54, %v1344_v31  ;;  %v1349_v10 = vor.u32 %v1348_v1, %v1344_v31  ;;  %v1210_v3 = vrot.slane %v1208_v16, 5 }
 0x143   : > { %v801_v50 = vsel %vm6691_vm8, %v793_v42, %v800_v2  ;;  %v1034_v58 = vsel %vm6657_vm2, %v802_v44, %v1033_v38  ;;  %v634_v60 = vpack.c.bf16 %v602_v52, %v602_v52  ;;  %5593 = vmatmul.msk.bf16.gmra.mxu0 %vm1589_vm12, %v1562_v4  ;;  %v1103_v62 = vld [vmem:[#allocation2 + $0x6c] sm:$0xf]  ;;  %v1354_v5 = vrot.slane %v1352_v41, 5  ;;  %v566_v52 = vld [vmem:[#allocation2 + $0x98] sm:$0x1] }
 0x144   : > { %v2164_v53 = vpack.c.b16 %v2141_v29, %v2140_v30  ;;  %1032 = vst.msk [vmem:[#allocation2 + $0x70] sm:$0xf] %vm462_vm5, %v801_v50  ;;  %v1350_v43 = vrot.slane %v1349_v10, 4  ;;  %v1357_v45 = vshrl.u32 %v1103_v62, 16  ;;  %v1201_v6 = vsel %vm6803_vm15, %v1196_v49, %v6986_v55  ;;  %v1965_v21 = vld [vmem:[#allocation2 + $0x6c] sm:$0xe] }
 0x145   : > { %1035 = vst [vmem:[#allocation2 + $0x74] sm:$0x1] %v1034_v58  ;;  %v804_v48 = vshrl.u32 %v634_v60, 16  ;;  %v1211_v7 = vsel %vm6803_vm15, %v7032_v15, %v1210_v3  ;;  %v1360_v9 = vshll.u32 %v1103_v62, 16  ;;  %v807_v57 = vshll.u32 %v634_v60, 16  ;;  %v6144_v30 = vld [vmem:[%s8150_s2 + $0x30] sm:$0xff] }
 0x146   : > { %5732 = vmatmul.msk.bf16.gmra.mxu3 %vm1589_vm12, %v2164_v53  ;;  %v1355_v46 = vsel %vm6803_vm15, %v1350_v43, %v1354_v5  ;;  %v1545_v8 = vunpack.c.l.b16 %v1345_v35  ;;  %v1359_v13 = vrot.slane %v1357_v45, 4  ;;  %v511_v55 = vsel %vm6657_vm2, 0, %v510_v12  ;;  %v1036_v15 = vld [vmem:[#allocation2 + $0x78] sm:$0xf]  ;;  %2537 = vmatpush.bf16.msrb.mxu1 %v6144_v30  ;;  %v1040_v3 = vld [vmem:[#allocation2 + $0x80] sm:$0x1] }
 0x147   : > { %v806_v14 = vrot.slane %v804_v48, 7  ;;  %v1546_v16 = vunpack.c.l.b16 %v1355_v46  ;;  %v1362_v4 = vrot.slane %v1360_v9, 5  ;;  %v1534_v0 = vunpack.c.l.b16 %v1211_v7  ;;  %512 = vst [vmem:[#allocation2 + $0x90] sm:$0x1] %v511_v55 }
 0x148   : > { %v429_v36 = vpop.f32.mrf.mxu0  ;;  %v1533_v54 = vunpack.c.l.b16 %v1201_v6  ;;  %v5705_v28 = vrot.slane %v1965_v21, 9  ;;  %v567_v49 = vsel %vm6666_vm4, 0, %v566_v52  ;;  %v569_v52 = vld [vmem:[#allocation2 + $0xa4] sm:$0x1] }
 0x149   : > { %v809_v17 = vor.u32 %v807_v57, %v806_v14  ;;  %v603_v11 = vmax.f32 %v429_v36, 0.0  ;;  %v1569_v42 = vpack.c.b16 %v1546_v16, %v1545_v8  ;;  %v1363_v18 = vor.u32 %v1362_v4, %v1359_v13  ;;  %568 = vst [vmem:[#allocation2 + $0x98] sm:$0x1] %v567_v49 }
 0x14a   : > { %v1563_v27 = vpack.c.b16 %v1534_v0, %v1533_v54  ;;  %v810_v37 = vrot.slane %v806_v14, 4  ;;  %4577 = vmatpush.bf16.msra.mxu1 %v6169_v19 }
 0x14b   : > { %v1037_v23 = vsel %vm6682_vm6, %v809_v17, %v1036_v15  ;;  %v635_v24 = vpack.c.bf16 %v603_v11, %v603_v11  ;;  %5600 = vmatmul.msk.bf16.gmra.mxu1 %vm1589_vm12, %v1569_v42  ;;  %v6115_v25 = vld [vmem:[#allocation2 + $0x6c] sm:$0xff]  ;;  %v1364_v39 = vrot.slane %v1363_v18, 4  ;;  %v513_v17 = vld [vmem:[#allocation2 + $0x9c] sm:$0x1]  ;;  %v1043_v18 = vld [vmem:[#allocation2 + $0x84] sm:$0xf] }
 0x14c   : > { %v1104_v26 = vld [vmem:[#allocation2 + $0x70] sm:$0xf]  ;;  %1038 = vst [vmem:[#allocation2 + $0x78] sm:$0xf] %v1037_v23  ;;  %v1130_v63 = vld [vmem:[#allocation2 + $0x74] sm:$0x1]  ;;  %5689 = vmatmul.msk.bf16.gmra.mxu2 %vm1589_vm12, %v6115_v25 }
 0x14d   : > { %v2072_v31 = vrot.slane %v1104_v26, 5  ;;  %v812_v38 = vshrl.u32 %v635_v24, 16  ;;  %v1366_v40 = vshll.u32 %v1104_v26, 16  ;;  %v2075_v2 = vrot.slane %v1130_v63, 5 }
 0x14e   : > { %v1370_v44 = vshrl.u32 %v1104_v26, 16  ;;  %v815_v35 = vshll.u32 %v635_v24, 16  ;;  %v1376_v62 = vshll.u32 %v1130_v63, 16  ;;  %v514_v54 = vsel %vm6657_vm2, 0, %v513_v17 }
 0x14f   : > { %v2073_v1 = vsel %vm6735_vm11, %v5705_v28, %v2072_v31  ;;  %v2074_v41 = vrot.slane %v2072_v31, 4  ;;  %v814_v29 = vrot.slane %v812_v38, 7  ;;  %v1368_v10 = vrot.slane %v1366_v40, 5  ;;  %515 = vst [vmem:[#allocation2 + $0x9c] sm:$0x1] %v514_v54 }
 0x150   : > { %v432_v50 = vpop.f32.mrf.mxu0  ;;  %v2142_v60 = vunpack.c.l.b16 %v2073_v1  ;;  %v1372_v53 = vrot.slane %v1370_v44, 4  ;;  %v1378_v12 = vrot.slane %v1376_v62, 5  ;;  %v1047_v62 = vld [vmem:[#allocation2 + $0x8c] sm:$0x1] }
 0x151   : > { %v2076_v58 = vsel %vm6735_vm11, %v2074_v41, %v2075_v2  ;;  %v817_v43 = vor.u32 %v815_v35, %v814_v29  ;;  %v819_v5 = vrot.slane %v814_v29, 4  ;;  %v604_v45 = vmax.f32 %v432_v50, 0.0 }
 0x152   : > { %v2143_v48 = vunpack.c.l.b16 %v2076_v58  ;;  %v1369_v6 = vsel %vm6803_vm15, %v1364_v39, %v1368_v10  ;;  %v1373_v7 = vor.u32 %v1372_v53, %v1368_v10  ;;  %v6106_v58 = vld [vmem:[#allocation2] sm:$0xff]  ;;  %v570_v53 = vsel %vm6666_vm4, 0, %v569_v52 }
 0x153   : > { %v818_v9 = vsel %vm6691_vm8, %v810_v37, %v817_v43  ;;  %v1041_v59 = vsel %vm6657_vm2, %v819_v5, %v1040_v3  ;;  %v636_v57 = vpack.c.bf16 %v604_v45, %v604_v45  ;;  %5594 = vmatmul.msk.bf16.gmra.mxu0 %vm1589_vm12, %v1563_v27  ;;  %v1105_v8 = vld [vmem:[#allocation2 + $0x78] sm:$0xf]  ;;  %v1547_v36 = vunpack.c.l.b16 %v1369_v6  ;;  %571 = vst [vmem:[#allocation2 + $0xa4] sm:$0x1] %v570_v53 }
 0x154   : > { %v2165_v46 = vpack.c.b16 %v2143_v48, %v2142_v60  ;;  %1039 = vst.msk [vmem:[#allocation2 + $0x7c] sm:$0xf] %vm462_vm5, %v818_v9  ;;  %v1374_v13 = vrot.slane %v1373_v7, 4  ;;  %v1381_v14 = vshrl.u32 %v1105_v8, 16  ;;  %v1384_v4 = vshll.u32 %v1105_v8, 16 }
 0x155   : > { %1042 = vst [vmem:[#allocation2 + $0x80] sm:$0x1] %v1041_v59  ;;  %v821_v16 = vshrl.u32 %v636_v57, 16  ;;  %v824_v55 = vshll.u32 %v636_v57, 16  ;;  %v1966_v27 = vld [vmem:[#allocation2 + $0x78] sm:$0xe] }
 0x156   : > { %5733 = vmatmul.msk.bf16.gmra.mxu3 %vm1589_vm12, %v2165_v46  ;;  %v1379_v15 = vsel %vm6803_vm15, %v1374_v13, %v1378_v12  ;;  %v1383_v0 = vrot.slane %v1381_v14, 4  ;;  %v1386_v21 = vrot.slane %v1384_v4, 5  ;;  %v5706_v40 = vrot.slane %v1966_v27, 9 }
 0x157   : > { %v823_v11 = vrot.slane %v821_v16, 7  ;;  %v1548_v42 = vunpack.c.l.b16 %v1379_v15 }
 0x158   : > { %v434_v23 = vpop.f32.mrf.mxu0  ;;  %v1387_v63 = vor.u32 %v1386_v21, %v1383_v0  ;;  %v516_v21 = vld [vmem:[#allocation2 + $0xa8] sm:$0x1] }
 0x159   : > { %v826_v24 = vor.u32 %v824_v55, %v823_v11  ;;  %v605_v25 = vmax.f32 %v434_v23, 0.0  ;;  %v1570_v26 = vpack.c.b16 %v1548_v42, %v1547_v36  ;;  %v827_v1 = vrot.slane %v823_v11, 4 }
 0x15a   : > { %v1388_v2 = vrot.slane %v1387_v63, 4 }
 0x15b   : > { %v1044_v28 = vsel %vm6682_vm6, %v826_v24, %v1043_v18  ;;  %v637_v31 = vpack.c.bf16 %v605_v25, %v605_v25  ;;  %5601 = vmatmul.msk.bf16.gmra.mxu1 %vm1589_vm12, %v1570_v26  ;;  %v6116_v37 = vld [vmem:[#allocation2 + $0x78] sm:$0xff]  ;;  %v517_v24 = vsel %vm6657_vm2, 0, %v516_v21  ;;  %v1050_v25 = vld [vmem:[#allocation2 + $0x90] sm:$0xf] }
 0x15c   : > { %v1106_v38 = vld [vmem:[#allocation2 + $0x7c] sm:$0xf]  ;;  %1045 = vst [vmem:[#allocation2 + $0x84] sm:$0xf] %v1044_v28  ;;  %v1131_v39 = vld [vmem:[#allocation2 + $0x80] sm:$0x1]  ;;  %5690 = vmatmul.msk.bf16.gmra.mxu2 %vm1589_vm12, %v6116_v37 }
 0x15d   : > { %v2079_v30 = vrot.slane %v1106_v38, 5  ;;  %v829_v41 = vshrl.u32 %v637_v31, 16  ;;  %v1390_v44 = vshll.u32 %v1106_v38, 16  ;;  %v2082_v10 = vrot.slane %v1131_v39, 5  ;;  %518 = vst [vmem:[#allocation2 + $0xa8] sm:$0x1] %v517_v24 }
 0x15e   : > { %v1394_v49 = vshrl.u32 %v1106_v38, 16  ;;  %v832_v50 = vshll.u32 %v637_v31, 16  ;;  %v1400_v6 = vshll.u32 %v1131_v39, 16  ;;  %v2009_v39 = vrot.slane %v6881_v33, 5 }
 0x15f   : > { %v2080_v29 = vsel %vm6735_vm11, %v5706_v40, %v2079_v30  ;;  %v2081_v35 = vrot.slane %v2079_v30, 4  ;;  %v831_v3 = vrot.slane %v829_v41, 7  ;;  %v1392_v60 = vrot.slane %v1390_v44, 5 }
 0x160   : > { %v437_v43 = vpop.f32.mrf.mxu0  ;;  %v2144_v45 = vunpack.c.l.b16 %v2080_v29  ;;  %v1396_v48 = vrot.slane %v1394_v49, 4  ;;  %v1402_v15 = vrot.slane %v1400_v6, 5  ;;  %v2012_v40 = vrot.slane %v6924_v61, 5 }
 0x161   : > { %v2083_v5 = vsel %vm6735_vm11, %v2081_v35, %v2082_v10  ;;  %v834_v7 = vor.u32 %v832_v50, %v831_v3  ;;  %v836_v9 = vrot.slane %v831_v3, 4  ;;  %v606_v59 = vmax.f32 %v437_v43, 0.0  ;;  %v6149_v3 = vld [vmem:[%s8150_s2 + $0x58] sm:$0xff] }
 0x162   : > { %v2145_v57 = vunpack.c.l.b16 %v2083_v5  ;;  %v1393_v46 = vsel %vm6803_vm15, %v1388_v2, %v1392_v60  ;;  %v1397_v8 = vor.u32 %v1396_v48, %v1392_v60  ;;  %3612 = vmatpush.bf16.msrb.mxu3 %v6149_v3 }
 0x163   : > { %v835_v13 = vsel %vm6691_vm8, %v827_v1, %v834_v7  ;;  %v1048_v12 = vsel %vm6657_vm2, %v836_v9, %v1047_v62  ;;  %v638_v14 = vpack.c.bf16 %v606_v59, %v606_v59  ;;  %5680 = vmatmul.msk.bf16.vlgmr.msra.gmra.mxu0 %vm1589_vm12, %v6106_v58  ;;  %v1107_v4 = vld [vmem:[#allocation2 + $0x84] sm:$0xf]  ;;  %v1549_v42 = vunpack.c.l.b16 %v1393_v46  ;;  %v572_v62 = vld [vmem:[#allocation2 + $0xb0] sm:$0x1] }
 0x164   : > { %v2166_v16 = vpack.c.b16 %v2145_v57, %v2144_v45  ;;  %1046 = vst.msk [vmem:[#allocation2 + $0x88] sm:$0xf] %vm462_vm5, %v835_v13  ;;  %v1398_v55 = vrot.slane %v1397_v8, 4  ;;  %v1405_v36 = vshrl.u32 %v1107_v4, 16  ;;  %v1408_v17 = vshll.u32 %v1107_v4, 16  ;;  %v6107_v4 = vld [vmem:[#allocation2 + $0xc] sm:$0xff] }
 0x165   : > { %1049 = vst [vmem:[#allocation2 + $0x8c] sm:$0x1] %v1048_v12  ;;  %v838_v0 = vshrl.u32 %v638_v14, 16  ;;  %v841_v18 = vshll.u32 %v638_v14, 16  ;;  %v1967_v37 = vld [vmem:[#allocation2 + $0x84] sm:$0xe] }
 0x166   : > { %5734 = vmatmul.msk.bf16.gmra.mxu3 %vm1589_vm12, %v2166_v16  ;;  %v1403_v11 = vsel %vm6803_vm15, %v1398_v55, %v1402_v15  ;;  %v1407_v27 = vrot.slane %v1405_v36, 4  ;;  %v1410_v38 = vrot.slane %v1408_v17, 5  ;;  %v5707_v52 = vrot.slane %v1967_v37, 9  ;;  %v1054_v45 = vld [vmem:[#allocation2 + $0x98] sm:$0x1] }
 0x167   : > { %v840_v54 = vrot.slane %v838_v0, 7  ;;  %v1550_v23 = vunpack.c.l.b16 %v1403_v11  ;;  %v573_v6 = vsel %vm6666_vm4, 0, %v572_v62  ;;  %v1956_v13 = vld [vmem:[#allocation2] sm:$0xe]  ;;  %v2011_v17 = vrot.slane %v2009_v39, 4 }
 0x168   : > { %v439_v26 = vpop.f32.mrf.mxu0  ;;  %v1411_v49 = vor.u32 %v1410_v38, %v1407_v27  ;;  %574 = vst [vmem:[#allocation2 + $0xb0] sm:$0x1] %v573_v6  ;;  %v5696_v0 = vrot.slane %v1956_v13, 9  ;;  %v519_v37 = vld [vmem:[#allocation2 + $0xb4] sm:$0x1] }
 0x169   : > { %v843_v63 = vor.u32 %v841_v18, %v840_v54  ;;  %v607_v28 = vmax.f32 %v439_v26, 0.0  ;;  %v1571_v31 = vpack.c.b16 %v1550_v23, %v1549_v42  ;;  %v844_v35 = vrot.slane %v840_v54, 4  ;;  %v575_v13 = vld [vmem:[#allocation2 + $0xbc] sm:$0x1] }
 0x16a   : > { %v1412_v15 = vrot.slane %v1411_v49, 4  ;;  %v2013_v38 = vsel %vm6735_vm11, %v2011_v17, %v2012_v40  ;;  %v576_v17 = vsel %vm6666_vm4, 0, %v575_v13 }
 0x16b   : > { %v1051_v30 = vsel %vm6682_vm6, %v843_v63, %v1050_v25  ;;  %v639_v1 = vpack.c.bf16 %v607_v28, %v607_v28  ;;  %5602 = vmatmul.msk.bf16.gmra.mxu1 %vm1589_vm12, %v1571_v31  ;;  %v6117_v41 = vld [vmem:[#allocation2 + $0x84] sm:$0xff]  ;;  %v2010_v28 = vsel %vm6735_vm11, %v5696_v0, %v2009_v39  ;;  %v2125_v49 = vunpack.c.l.b16 %v2013_v38  ;;  %577 = vst [vmem:[#allocation2 + $0xbc] sm:$0x1] %v576_v17 }
 0x16c   : > { %v1108_v2 = vld [vmem:[#allocation2 + $0x88] sm:$0xf]  ;;  %1052 = vst [vmem:[#allocation2 + $0x90] sm:$0xf] %v1051_v30  ;;  %v1132_v44 = vld [vmem:[#allocation2 + $0x8c] sm:$0x1]  ;;  %5691 = vmatmul.msk.bf16.gmra.mxu2 %vm1589_vm12, %v6117_v41  ;;  %v2124_v30 = vunpack.c.l.b16 %v2010_v28 }
 0x16d   : > { %v2086_v29 = vrot.slane %v1108_v2, 5  ;;  %v846_v10 = vshrl.u32 %v639_v1, 16  ;;  %v1414_v33 = vshll.u32 %v1108_v2, 16  ;;  %v2089_v60 = vrot.slane %v1132_v44, 5 }
 0x16e   : > { %v1418_v53 = vshrl.u32 %v1108_v2, 16  ;;  %v849_v5 = vshll.u32 %v639_v1, 16  ;;  %v1424_v8 = vshll.u32 %v1132_v44, 16  ;;  %v520_v44 = vsel %vm6657_vm2, 0, %v519_v37 }
 0x16f   : > { %v2087_v50 = vsel %vm6735_vm11, %v5707_v52, %v2086_v29  ;;  %v2088_v58 = vrot.slane %v2086_v29, 4  ;;  %v848_v43 = vrot.slane %v846_v10, 7  ;;  %v1416_v48 = vrot.slane %v1414_v33, 5  ;;  %v1891_v9 = vpop.f32.mrf.mxu2  ;;  %v1057_v52 = vld [vmem:[#allocation2 + $0x9c] sm:$0xf] }
 0x170   : > { %v442_v7 = vpop.f32.mrf.mxu0  ;;  %v2146_v57 = vunpack.c.l.b16 %v2087_v50  ;;  %v1420_v46 = vrot.slane %v1418_v53, 4  ;;  %v1426_v24 = vrot.slane %v1424_v8, 5  ;;  %521 = vst [vmem:[#allocation2 + $0xb4] sm:$0x1] %v520_v44  ;;  %v7150_v62 = vpack.c.b16 %v2125_v49, %v2124_v30 }
 0x171   : > { %v2090_v59 = vsel %vm6735_vm11, %v2088_v58, %v2089_v60  ;;  %v851_v12 = vor.u32 %v849_v5, %v848_v43  ;;  %v853_v14 = vrot.slane %v848_v43, 4  ;;  %v608_v16 = vmax.f32 %v442_v7, 0.0 }
 0x172   : > { %v2147_v55 = vunpack.c.l.b16 %v2090_v59  ;;  %v1421_v36 = vor.u32 %v1420_v46, %v1416_v48  ;;  %v1417_v27 = vsel %vm6803_vm15, %v1412_v15, %v1416_v48  ;;  %v1061_v15 = vld [vmem:[#allocation2 + $0xa4] sm:$0x1] }
 0x173   : > { %v852_v11 = vsel %vm6691_vm8, %v844_v35, %v851_v12  ;;  %v1055_v42 = vsel %vm6657_vm2, %v853_v14, %v1054_v45  ;;  %v640_v21 = vpack.c.bf16 %v608_v16, %v608_v16  ;;  %5681 = vmatmul.msk.bf16.gmra.mxu0 %vm1589_vm12, %v6107_v4  ;;  %v1109_v18 = vld [vmem:[#allocation2 + $0x90] sm:$0xf]  ;;  %v1551_v35 = vunpack.c.l.b16 %v1417_v27 }
 0x174   : > { %v2167_v54 = vpack.c.b16 %v2147_v55, %v2146_v57  ;;  %1053 = vst.msk [vmem:[#allocation2 + $0x94] sm:$0xf] %vm462_vm5, %v852_v11  ;;  %v1422_v23 = vrot.slane %v1421_v36, 4  ;;  %v1429_v25 = vshrl.u32 %v1109_v18, 16  ;;  %v1432_v63 = vshll.u32 %v1109_v18, 16 }
 0x175   : > { %1056 = vst [vmem:[#allocation2 + $0x98] sm:$0x1] %v1055_v42  ;;  %v855_v26 = vshrl.u32 %v640_v21, 16  ;;  %v858_v41 = vshll.u32 %v640_v21, 16  ;;  %v1968_v53 = vld [vmem:[#allocation2 + $0x90] sm:$0xe] }
 0x176   : > { %5735 = vmatmul.msk.bf16.gmra.mxu3 %vm1589_vm12, %v2167_v54  ;;  %v1427_v31 = vsel %vm6803_vm15, %v1422_v23, %v1426_v24  ;;  %v1431_v10 = vrot.slane %v1429_v25, 4  ;;  %v1434_v58 = vrot.slane %v1432_v63, 5  ;;  %v5708_v57 = vrot.slane %v1968_v53, 9 }
 0x177   : > { %v7145_v1 = vrot.slane %v855_v26, 7  ;;  %v1552_v2 = vunpack.c.l.b16 %v1427_v31  ;;  %v1893_v50 = vpop.f32.mrf.mxu2  ;;  %v6108_v31 = vld [vmem:[#allocation2 + $0x18] sm:$0xff] }
 0x178   : > { %v1662_v29 = vpop.f32.mrf.mxu1  ;;  %v444_v39 = vpop.f32.mrf.mxu0  ;;  %v1435_v46 = vor.u32 %v1434_v58, %v1431_v10 }
 0x179   : > { %v860_v61 = vor.u32 %v858_v41, %v7145_v1  ;;  %v1892_v33 = vadd.f32 %v1891_v9, %v1662_v29  ;;  %v609_v3 = vmax.f32 %v444_v39, 0.0  ;;  %v2256_v40 = vpop.f32.mrf.mxu3  ;;  %v1572_v60 = vpack.c.b16 %v1552_v2, %v1551_v35 }
 0x17a   : > { %v861_v11 = vrot.slane %v7145_v1, 4  ;;  %v1436_v30 = vrot.slane %v1435_v46, 4 }
 0x17b   : > { %v1058_v43 = vsel %vm6682_vm6, %v860_v61, %v1057_v52  ;;  %v641_v5 = vpack.c.bf16 %v609_v3, %v609_v3  ;;  %v7154_v45 = vadd.f32 %v2256_v40, %v1892_v33  ;;  %v6118_v48 = vld [vmem:[#allocation2 + $0x90] sm:$0xff]  ;;  %5603 = vmatmul.msk.bf16.gmra.mxu1 %vm1589_vm12, %v1572_v60 }
 0x17c   : > { %v1110_v6 = vld [vmem:[#allocation2 + $0x94] sm:$0xf]  ;;  %1059 = vst [vmem:[#allocation2 + $0x9c] sm:$0xf] %v1058_v43  ;;  %v1133_v7 = vld [vmem:[#allocation2 + $0x98] sm:$0x1]  ;;  %5692 = vmatmul.msk.bf16.gmra.mxu2 %vm1589_vm12, %v6118_v48 }
 0x17d   : > { %v2093_v9 = vrot.slane %v1110_v6, 5  ;;  %v863_v59 = vshrl.u32 %v641_v5, 16  ;;  %v1438_v8 = vshll.u32 %v1110_v6, 16  ;;  %v866_v12 = vshll.u32 %v641_v5, 16  ;;  %v1064_v43 = vld [vmem:[#allocation2 + $0xa8] sm:$0xf] }
 0x17e   : > { %v2096_v16 = vrot.slane %v1133_v7, 5  ;;  %v1442_v4 = vshrl.u32 %v1110_v6, 16  ;;  %v1448_v23 = vshll.u32 %v1133_v7, 16 }
 0x17f   : > { %v2095_v14 = vrot.slane %v2093_v9, 4  ;;  %v865_v55 = vrot.slane %v863_v59, 7  ;;  %v2094_v36 = vsel %vm6735_vm11, %v5708_v57, %v2093_v9  ;;  %v1440_v0 = vrot.slane %v1438_v8, 5  ;;  %v1896_v28 = vpop.f32.mrf.mxu2 }
 0x180   : > { %v1664_v42 = vpop.f32.mrf.mxu1  ;;  %v447_v21 = vpop.f32.mrf.mxu0  ;;  %v1444_v18 = vrot.slane %v1442_v4, 4  ;;  %v2148_v37 = vunpack.c.l.b16 %v2094_v36  ;;  %v1450_v10 = vrot.slane %v1448_v23, 5  ;;  %v578_v23 = vld [vmem:[#allocation2 + $0xc8] sm:$0x1] }
 0x181   : > { %v2097_v54 = vsel %vm6735_vm11, %v2095_v14, %v2096_v16  ;;  %v868_v24 = vor.u32 %v866_v12, %v865_v55  ;;  %v870_v25 = vrot.slane %v865_v55, 4  ;;  %v1894_v26 = vadd.f32 %v1893_v50, %v1664_v42  ;;  %v2258_v63 = vpop.f32.mrf.mxu3  ;;  %v522_v50 = vld [vmem:[#allocation2 + $0xc0] sm:$0x1] }
 0x182   : > { %v610_v27 = vmax.f32 %v447_v21, 0.0  ;;  %v2149_v38 = vunpack.c.l.b16 %v2097_v54  ;;  %v1445_v41 = vor.u32 %v1444_v18, %v1440_v0  ;;  %v1441_v61 = vsel %vm6803_vm15, %v1436_v30, %v1440_v0 }
 0x183   : > { %v869_v1 = vsel %vm6691_vm8, %v861_v11, %v868_v24  ;;  %v1062_v2 = vsel %vm6657_vm2, %v870_v25, %v1061_v15  ;;  %v7169_v52 = vadd.f32 %v2258_v63, %v1894_v26  ;;  %5682 = vmatmul.msk.bf16.gmra.mxu0 %vm1589_vm12, %v6108_v31  ;;  %v1111_v29 = vld [vmem:[#allocation2 + $0x9c] sm:$0xf]  ;;  %v1553_v6 = vunpack.c.l.b16 %v1441_v61 }
 0x184   : > { %v642_v44 = vpack.c.bf16 %v610_v27, %v610_v27  ;;  %1060 = vst.msk [vmem:[#allocation2 + $0xa0] sm:$0xf] %vm462_vm5, %v869_v1  ;;  %v2168_v39 = vpack.c.b16 %v2149_v38, %v2148_v37  ;;  %v1446_v35 = vrot.slane %v1445_v41, 4  ;;  %v1453_v33 = vshrl.u32 %v1111_v29, 16  ;;  %v1969_v16 = vld [vmem:[#allocation2 + $0x9c] sm:$0xe] }
 0x185   : > { %1063 = vst [vmem:[#allocation2 + $0xa4] sm:$0x1] %v1062_v2  ;;  %v1456_v3 = vshll.u32 %v1111_v29, 16  ;;  %v523_v9 = vsel %vm6657_vm2, 0, %v522_v50  ;;  %v5709_v21 = vrot.slane %v1969_v16, 9  ;;  %v579_v38 = vsel %vm6666_vm4, 0, %v578_v23 }
 0x186   : > { %v872_v49 = vshrl.u32 %v642_v44, 16  ;;  %5736 = vmatmul.msk.bf16.gmra.mxu3 %vm1589_vm12, %v2168_v39  ;;  %v1451_v40 = vsel %vm6803_vm15, %v1446_v35, %v1450_v10  ;;  %v875_v60 = vshll.u32 %v642_v44, 16  ;;  %v1455_v7 = vrot.slane %v1453_v33, 4  ;;  %524 = vst [vmem:[#allocation2 + $0xc0] sm:$0x1] %v523_v9 }
 0x187   : > { %v1554_v53 = vunpack.c.l.b16 %v1451_v40  ;;  %v1898_v13 = vpop.f32.mrf.mxu2  ;;  %v1458_v12 = vrot.slane %v1456_v3, 5  ;;  %580 = vst [vmem:[#allocation2 + $0xc8] sm:$0x1] %v579_v38 }
 0x188   : > { %v874_v58 = vrot.slane %v872_v49, 7  ;;  %v1667_v5 = vpop.f32.mrf.mxu1  ;;  %v449_v48 = vpop.f32.mrf.mxu0 }
 0x189   : > { %v1897_v57 = vadd.f32 %v1896_v28, %v1667_v5  ;;  %v611_v46 = vmax.f32 %v449_v48, 0.0  ;;  %v2261_v8 = vpop.f32.mrf.mxu3  ;;  %v1573_v14 = vpack.c.b16 %v1554_v53, %v1553_v6  ;;  %v1459_v54 = vor.u32 %v1458_v12, %v1455_v7  ;;  %v1068_v28 = vld [vmem:[#allocation2 + $0xb0] sm:$0x1]  ;;  %v2651_v6 = vld [vmem:[#allocation2 + $0xc] sm:$0xf] }
 0x18a   : > { %v877_v59 = vor.u32 %v875_v60, %v874_v58  ;;  %v878_v30 = vrot.slane %v874_v58, 4 }
 0x18b   : > { %v643_v55 = vpack.c.bf16 %v611_v46, %v611_v46  ;;  %v7182_v15 = vadd.f32 %v2261_v8, %v1897_v57  ;;  %v6119_v36 = vld [vmem:[#allocation2 + $0x9c] sm:$0xff]  ;;  %5604 = vmatmul.msk.bf16.gmra.mxu1 %vm1589_vm12, %v1573_v14  ;;  %v1460_v50 = vrot.slane %v1459_v54, 4  ;;  %v7203_v8 = vld [vmem:[#allocation2 + $0x10] sm:$0xf]  ;;  %v2700_v14 = vshrl.u32 %v2651_v6, 16 }
 0x18c   : > { %v1065_v4 = vsel %vm6682_vm6, %v877_v59, %v1064_v43  ;;  %v1112_v0 = vld [vmem:[#allocation2 + $0xa0] sm:$0xf]  ;;  %v1134_v17 = vld [vmem:[#allocation2 + $0xa4] sm:$0x1]  ;;  %5693 = vmatmul.msk.bf16.gmra.mxu2 %vm1589_vm12, %v6119_v36  ;;  %v2703_v36 = vshll.u32 %v2651_v6, 16 }
 0x18d   : > { %1066 = vst [vmem:[#allocation2 + $0xa8] sm:$0xf] %v1065_v4  ;;  %v2100_v11 = vrot.slane %v1112_v0, 5  ;;  %v880_v42 = vshrl.u32 %v643_v55, 16  ;;  %v1462_v18 = vshll.u32 %v1112_v0, 16  ;;  %v883_v24 = vshll.u32 %v643_v55, 16 }
 0x18e   : > { %v2103_v26 = vrot.slane %v1134_v17, 5  ;;  %v1466_v27 = vshrl.u32 %v1112_v0, 16  ;;  %v1472_v29 = vshll.u32 %v1134_v17, 16  ;;  %v1071_v0 = vld [vmem:[#allocation2 + $0xb4] sm:$0xf] }
 0x18f   : > { %v2102_v25 = vrot.slane %v2100_v11, 4  ;;  %v882_v63 = vrot.slane %v880_v42, 7  ;;  %v2101_v31 = vsel %vm6735_vm11, %v5709_v21, %v2100_v11  ;;  %v1464_v37 = vrot.slane %v1462_v18, 5  ;;  %v1901_v33 = vpop.f32.mrf.mxu2 }
 0x190   : > { %v1669_v41 = vpop.f32.mrf.mxu1  ;;  %v452_v1 = vpop.f32.mrf.mxu0  ;;  %v1468_v44 = vrot.slane %v1466_v27, 4  ;;  %v2150_v3 = vunpack.c.l.b16 %v2101_v31  ;;  %v1474_v59 = vrot.slane %v1472_v29, 5  ;;  %v2709_v21 = vshll.u32 %v7203_v8, 16 }
 0x191   : > { %v2104_v2 = vsel %vm6735_vm11, %v2102_v25, %v2103_v26  ;;  %v885_v39 = vor.u32 %v883_v24, %v882_v63  ;;  %v887_v35 = vrot.slane %v882_v63, 4  ;;  %v1899_v10 = vadd.f32 %v1898_v13, %v1669_v41  ;;  %v2263_v61 = vpop.f32.mrf.mxu3 }
 0x192   : > { %v612_v49 = vmax.f32 %v452_v1, 0.0  ;;  %v2151_v40 = vunpack.c.l.b16 %v2104_v2  ;;  %v1469_v60 = vor.u32 %v1468_v44, %v1464_v37  ;;  %v1465_v46 = vsel %vm6803_vm15, %v1460_v50, %v1464_v37 }
 0x193   : > { %v886_v58 = vsel %vm6691_vm8, %v878_v30, %v885_v39  ;;  %v1069_v53 = vsel %vm6657_vm2, %v887_v35, %v1068_v28  ;;  %v7196_v5 = vadd.f32 %v2263_v61, %v1899_v10  ;;  %5724 = vmatmul.msk.bf16.vlgmr.msrb.gmra.mxu0 %vm1589_vm12, %v7150_v62  ;;  %v1555_v42 = vunpack.c.l.b16 %v1465_v46 }
 0x194   : > { %v644_v43 = vpack.c.bf16 %v612_v49, %v612_v49  ;;  %v1113_v48 = vld [vmem:[#allocation2 + $0xa8] sm:$0xf]  ;;  %1067 = vst.msk [vmem:[#allocation2 + $0xac] sm:$0xf] %vm462_vm5, %v886_v58  ;;  %v2169_v7 = vpack.c.b16 %v2151_v40, %v2150_v3  ;;  %v1470_v9 = vrot.slane %v1469_v60, 4  ;;  %v2713_v26 = vshrl.u32 %v7203_v8, 16 }
 0x195   : > { %1070 = vst [vmem:[#allocation2 + $0xb0] sm:$0x1] %v1069_v53  ;;  %v1477_v62 = vshrl.u32 %v1113_v48, 16  ;;  %v1480_v12 = vshll.u32 %v1113_v48, 16  ;;  %v1970_v63 = vld [vmem:[#allocation2 + $0xa8] sm:$0xe] }
 0x196   : > { %v889_v57 = vshrl.u32 %v644_v43, 16  ;;  %5737 = vmatmul.msk.bf16.gmra.mxu3 %vm1589_vm12, %v2169_v7  ;;  %v1475_v13 = vsel %vm6803_vm15, %v1470_v9, %v1474_v59  ;;  %v892_v4 = vshll.u32 %v644_v43, 16  ;;  %v7213_v37 = vrot.slane %v2700_v14, 4  ;;  %v1075_v9 = vld [vmem:[#allocation2 + $0xbc] sm:$0x1] }
 0x197   : > { %v1556_v55 = vunpack.c.l.b16 %v1475_v13  ;;  %v1903_v25 = vpop.f32.mrf.mxu2  ;;  %v1479_v28 = vrot.slane %v1477_v62, 4  ;;  %v1482_v31 = vrot.slane %v1480_v12, 5  ;;  %v7219_v44 = vrot.slane %v2703_v36, 5 }
 0x198   : > { %v7208_v16 = vrot.slane %v889_v57, 7  ;;  %v1672_v17 = vpop.f32.mrf.mxu1  ;;  %v454_v11 = vpop.f32.mrf.mxu0  ;;  %v7222_v35 = vrot.slane %v2709_v21, 5  ;;  %v5710_v49 = vrot.slane %v1970_v63, 9  ;;  %v7228_v3 = vrot.slane %v2713_v26, 4  ;;  %v6166_v26 = vld [vmem:[%s8150_s2 + $0x60] sm:$0xff] }
 0x199   : > { %v1902_v18 = vadd.f32 %v1901_v33, %v1672_v17  ;;  %v613_v23 = vmax.f32 %v454_v11, 0.0  ;;  %v2266_v24 = vpop.f32.mrf.mxu3  ;;  %v1574_v27 = vpack.c.b16 %v1556_v55, %v1555_v42  ;;  %v6167_v33 = vld [vmem:[%s8150_s2 + $0x68] sm:$0xff]  ;;  %v1483_v60 = vor.u32 %v1482_v31, %v1479_v28 }
 0x19a   : > { %v894_v54 = vor.u32 %v892_v4, %v7208_v16  ;;  %3911 = vmatpush.bf16.msra.mxu0 %v6167_v33  ;;  %v895_v7 = vrot.slane %v7208_v16, 4 }
 0x19b   : > { %v645_v30 = vpack.c.bf16 %v613_v23, %v613_v23  ;;  %v7217_v41 = vadd.f32 %v2266_v24, %v1902_v18  ;;  %v6120_v1 = vld [vmem:[#allocation2 + $0xa8] sm:$0xff]  ;;  %5605 = vmatmul.msk.bf16.gmra.mxu1 %vm1589_vm12, %v1574_v27  ;;  %v1484_v42 = vrot.slane %v1483_v60, 4 }
 0x19c   : > { %v1072_v38 = vsel %vm6682_vm6, %v894_v54, %v1071_v0  ;;  %v1114_v2 = vld [vmem:[#allocation2 + $0xac] sm:$0xf]  ;;  %v1135_v29 = vld [vmem:[#allocation2 + $0xb0] sm:$0x1]  ;;  %5694 = vmatmul.msk.bf16.gmra.mxu2 %vm1589_vm12, %v6120_v1 }
 0x19d   : > { %1073 = vst [vmem:[#allocation2 + $0xb4] sm:$0xf] %v1072_v38  ;;  %v2107_v39 = vrot.slane %v1114_v2, 5  ;;  %v897_v10 = vshrl.u32 %v645_v30, 16  ;;  %v1486_v61 = vshll.u32 %v1114_v2, 16  ;;  %v2110_v50 = vrot.slane %v1135_v29, 5 }
 0x19e   : > { %v1490_v58 = vshrl.u32 %v1114_v2, 16  ;;  %v900_v43 = vshll.u32 %v645_v30, 16  ;;  %v1496_v62 = vshll.u32 %v1135_v29, 16  ;;  %v6148_v38 = vld [vmem:[%s8150_s2 + $0x50] sm:$0xff]  ;;  %3912 = vmatpush.bf16.msra.mxu0 %v6166_v26 }
 0x19f   : > { %v2109_v40 = vrot.slane %v2107_v39, 4  ;;  %v899_v53 = vrot.slane %v897_v10, 7  ;;  %v2108_v48 = vsel %vm6735_vm11, %v5710_v49, %v2107_v39  ;;  %v1488_v6 = vrot.slane %v1486_v61, 5  ;;  %v1906_v0 = vpop.f32.mrf.mxu2  ;;  %v6171_v49 = vld [vmem:[%s8150_s2 + $0x88] sm:$0xff]  ;;  %3613 = vmatpush.bf16.msrb.mxu3 %v6148_v38  ;;  %v7285_v38 = vld [vmem:[#allocation2 + $0x1c] sm:$0xf] }
 0x1a0   : > { %v1674_v59 = vpop.f32.mrf.mxu1  ;;  %v457_v57 = vpop.f32.mrf.mxu0  ;;  %v1492_v13 = vrot.slane %v1490_v58, 4  ;;  %v2152_v17 = vunpack.c.l.b16 %v2108_v48  ;;  %v1498_v31 = vrot.slane %v1496_v62, 5  ;;  %v2706_v39 = vor.u32 %v7219_v44, %v7213_v37  ;;  %4987 = vmatpush.bf16.msra.mxu2 %v6171_v49 }
 0x1a1   : > { %v2111_v46 = vsel %vm6735_vm11, %v2109_v40, %v2110_v50  ;;  %v902_v12 = vor.u32 %v900_v43, %v899_v53  ;;  %v904_v14 = vrot.slane %v899_v53, 4  ;;  %v1904_v4 = vadd.f32 %v1903_v25, %v1674_v59  ;;  %v2268_v36 = vpop.f32.mrf.mxu3  ;;  %v7243_v25 = vld [vmem:[#allocation2 + $0x14] sm:$0x1]  ;;  %v1078_v50 = vld [vmem:[#allocation2 + $0xc0] sm:$0xf] }
 0x1a2   : > { %v614_v55 = vmax.f32 %v457_v57, 0.0  ;;  %v2153_v11 = vunpack.c.l.b16 %v2111_v46  ;;  %v1493_v21 = vor.u32 %v1492_v13, %v1488_v6  ;;  %v1489_v63 = vsel %vm6803_vm15, %v1484_v42, %v1488_v6 }
 0x1a3   : > { %v903_v16 = vsel %vm6691_vm8, %v895_v7, %v902_v12  ;;  %v1076_v54 = vsel %vm6657_vm2, %v904_v14, %v1075_v9  ;;  %v7239_v23 = vadd.f32 %v2268_v36, %v1904_v4  ;;  %5725 = vmatmul.msk.bf16.gmra.mxu0 %vm1589_vm12, %v6758_v47  ;;  %v2719_v10 = vshll.u32 %v7243_v25, 16 }
 0x1a4   : > { %v646_v18 = vpack.c.bf16 %v614_v55, %v614_v55  ;;  %v1115_v24 = vld [vmem:[#allocation2 + $0xb4] sm:$0xf]  ;;  %1074 = vst.msk [vmem:[#allocation2 + $0xb8] sm:$0xf] %vm462_vm5, %v903_v16  ;;  %v2170_v27 = vpack.c.b16 %v2153_v11, %v2152_v17  ;;  %v1494_v28 = vrot.slane %v1493_v21, 4  ;;  %v2716_v40 = vor.u32 %v7228_v3, %v7222_v35 }
 0x1a5   : > { %1077 = vst [vmem:[#allocation2 + $0xbc] sm:$0x1] %v1076_v54  ;;  %v1501_v1 = vshrl.u32 %v1115_v24, 16  ;;  %v1504_v2 = vshll.u32 %v1115_v24, 16  ;;  %v1557_v53 = vunpack.c.l.b16 %v1489_v63  ;;  %v1971_v9 = vld [vmem:[#allocation2 + $0xb4] sm:$0xe] }
 0x1a6   : > { %v906_v47 = vshrl.u32 %v646_v18, 16  ;;  %v909_v30 = vshll.u32 %v646_v18, 16  ;;  %5738 = vmatmul.msk.bf16.gmra.mxu3 %vm1589_vm12, %v2170_v27  ;;  %v1499_v29 = vsel %vm6803_vm15, %v1494_v28, %v1498_v31  ;;  %v7268_v46 = vrot.slane %v2706_v39, 4 }
 0x1a7   : > { %v1558_v33 = vunpack.c.l.b16 %v1499_v29  ;;  %v1503_v43 = vrot.slane %v1501_v1, 4  ;;  %v1908_v7 = vpop.f32.mrf.mxu2  ;;  %v1506_v59 = vrot.slane %v1504_v2, 5  ;;  %v7270_v13 = vrot.slane %v2719_v10, 5 }
 0x1a8   : > { %v7263_v61 = vrot.slane %v906_v47, 7  ;;  %v1677_v60 = vpop.f32.mrf.mxu1  ;;  %v459_v58 = vpop.f32.mrf.mxu0  ;;  %v2717_v55 = vrot.slane %v2716_v40, 4  ;;  %v3383_v31 = vrot.slane %v7203_v8, 5  ;;  %v1082_v47 = vld [vmem:[#allocation2 + $0xc8] sm:$0x1]  ;;  %v2737_v34 = vshrl.u32 %v7285_v38, 16 }
 0x1a9   : > { %v1907_v44 = vadd.f32 %v1906_v0, %v1677_v60  ;;  %v615_v48 = vmax.f32 %v459_v58, 0.0  ;;  %v2271_v6 = vpop.f32.mrf.mxu3  ;;  %v1575_v57 = vpack.c.b16 %v1558_v33, %v1557_v53  ;;  %v5711_v0 = vrot.slane %v1971_v9, 9  ;;  %v2654_v9 = vld [vmem:[#allocation2 + $0x18] sm:$0xf] }
 0x1aa   : > { %v911_v37 = vor.u32 %v909_v30, %v7263_v61  ;;  %v1507_v21 = vor.u32 %v1506_v59, %v1503_v43  ;;  %v912_v27 = vrot.slane %v7263_v61, 4  ;;  %v2722_v43 = vsel %vm6803_vm15, %v2717_v55, %v7270_v13 }
 0x1ab   : > { %v647_v62 = vpack.c.bf16 %v615_v48, %v615_v48  ;;  %v7274_v12 = vadd.f32 %v2271_v6, %v1907_v44  ;;  %v6121_v14 = vld [vmem:[#allocation2 + $0xb4] sm:$0xff]  ;;  %5606 = vmatmul.msk.bf16.gmra.mxu1 %vm1589_vm12, %v1575_v57  ;;  %v3089_v55 = vunpack.c.l.b16 %v2722_v43 }
 0x1ac   : > { %v1079_v3 = vsel %vm6682_vm6, %v911_v37, %v1078_v50  ;;  %v1116_v4 = vld [vmem:[#allocation2 + $0xb8] sm:$0xf]  ;;  %v1136_v36 = vld [vmem:[#allocation2 + $0xbc] sm:$0x1]  ;;  %5695 = vmatmul.msk.bf16.gmra.mxu2 %vm1589_vm12, %v6121_v14  ;;  %v1508_v58 = vrot.slane %v1507_v21, 4  ;;  %v2733_v37 = vshll.u32 %v7285_v38, 16 }
 0x1ad   : > { %1080 = vst [vmem:[#allocation2 + $0xc0] sm:$0xf] %v1079_v3  ;;  %v2114_v17 = vrot.slane %v1116_v4, 5  ;;  %v914_v11 = vshrl.u32 %v647_v62, 16  ;;  %v917_v42 = vshll.u32 %v647_v62, 16  ;;  %v1510_v16 = vshll.u32 %v1116_v4, 16 }
 0x1ae   : > { %v2117_v24 = vrot.slane %v1136_v36, 5  ;;  %v1514_v26 = vshrl.u32 %v1116_v4, 16  ;;  %v1520_v10 = vshll.u32 %v1136_v36, 16  ;;  %v2724_v62 = vshrl.u32 %v2654_v9, 16 }
 0x1af   : > { %v2115_v54 = vsel %vm6735_vm11, %v5711_v0, %v2114_v17  ;;  %v2116_v18 = vrot.slane %v2114_v17, 4  ;;  %v916_v63 = vrot.slane %v914_v11, 7  ;;  %v1512_v28 = vrot.slane %v1510_v16, 5  ;;  %v1911_v50 = vpop.f32.mrf.mxu2 }
 0x1b0   : > { %v1679_v30 = vpop.f32.mrf.mxu1  ;;  %v7287_v1 = vpop.f32.mrf.mxu0  ;;  %v2154_v29 = vunpack.c.l.b16 %v2115_v54  ;;  %v1516_v39 = vrot.slane %v1514_v26, 4  ;;  %v1522_v13 = vrot.slane %v1520_v10, 5  ;;  %v2727_v36 = vshll.u32 %v2654_v9, 16  ;;  %v3317_v26 = vld [vmem:[#allocation2 + $0xc] sm:$0xe] }
 0x1b1   : > { %v2118_v2 = vsel %vm6735_vm11, %v2116_v18, %v2117_v24  ;;  %v919_v49 = vor.u32 %v917_v42, %v916_v63  ;;  %v921_v33 = vrot.slane %v916_v63, 4  ;;  %v1909_v61 = vadd.f32 %v1908_v7, %v1679_v30  ;;  %v2273_v40 = vpop.f32.mrf.mxu3  ;;  %v2656_v63 = vld [vmem:[#allocation2 + $0x20] sm:$0x1] }
 0x1b2   : > { %v2155_v60 = vunpack.c.l.b16 %v2118_v2  ;;  %v1517_v53 = vor.u32 %v1516_v39, %v1512_v28  ;;  %v1513_v59 = vsel %vm6803_vm15, %v1508_v58, %v1512_v28  ;;  %v3385_v11 = vrot.slane %v3383_v31, 4 }
 0x1b3   : > { %v920_v44 = vsel %vm6691_vm8, %v912_v27, %v919_v49  ;;  %v1083_v48 = vsel %vm6657_vm2, %v921_v33, %v1082_v47  ;;  %v7299_v6 = vadd.f32 %v2273_v40, %v1909_v61  ;;  %5726 = vmatmul.msk.bf16.gmra.mxu0 %vm1589_vm12, %v6789_v32  ;;  %v2712_v32 = vsel %vm6803_vm15, %v7268_v46, %v7222_v35 }
 0x1b4   : > { %v2171_v7 = vpack.c.b16 %v2155_v60, %v2154_v29  ;;  %1081 = vst.msk [vmem:[#allocation2 + $0xc4] sm:$0xf] %vm462_vm5, %v920_v44  ;;  %v1518_v57 = vrot.slane %v1517_v53, 4  ;;  %v1559_v14 = vunpack.c.l.b16 %v1513_v59  ;;  %v2735_v42 = vrot.slane %v2733_v37, 5  ;;  %v6150_v53 = vld [vmem:[#allocation2 + $0x18] sm:$0xff] }
 0x1b5   : > { %1084 = vst [vmem:[#allocation2 + $0xc8] sm:$0x1] %v1083_v48  ;;  %v2739_v21 = vrot.slane %v2737_v34, 4  ;;  %v3088_v24 = vunpack.c.l.b16 %v2712_v32  ;;  %v3386_v35 = vrot.slane %v7243_v25, 5  ;;  %v2726_v28 = vrot.slane %v2724_v62, 4 }
 0x1b6   : > { %5739 = vmatmul.msk.bf16.gmra.mxu3 %vm1589_vm12, %v2171_v7  ;;  %v1523_v3 = vsel %vm6803_vm15, %v1518_v57, %v1522_v13  ;;  %v2729_v47 = vrot.slane %v2727_v36, 5  ;;  %v5860_v30 = vrot.slane %v3317_v26, 9  ;;  %v2743_v39 = vshll.u32 %v2656_v63, 16  ;;  %v7331_v37 = vld [vmem:[#allocation2 + $0x28] sm:$0xf] }
 0x1b7   : > { %v1560_v4 = vunpack.c.l.b16 %v1523_v3  ;;  %v1913_v18 = vpop.f32.mrf.mxu2  ;;  %v3120_v27 = vpack.c.b16 %v3089_v55, %v3088_v24  ;;  %v3387_v2 = vsel %vm6735_vm11, %v3385_v11, %v3386_v35  ;;  %v2740_v29 = vor.u32 %v2739_v21, %v2735_v42  ;;  %v2657_v59 = vld [vmem:[#allocation2 + $0x24] sm:$0xf] }
 0x1b8   : > { %v1682_v0 = vpop.f32.mrf.mxu1  ;;  %v7314_v17 = vpop.f32.mrf.mxu0  ;;  %v3384_v25 = vsel %vm6735_vm11, %v5860_v30, %v3383_v31  ;;  %v3499_v10 = vunpack.c.l.b16 %v3387_v2  ;;  %v2730_v49 = vor.u32 %v2729_v47, %v2726_v28  ;;  %v2745_v44 = vrot.slane %v2743_v39, 5 }
 0x1b9   : > { %v1912_v16 = vadd.f32 %v1911_v50, %v1682_v0  ;;  %v2276_v19 = vpop.f32.mrf.mxu3  ;;  %v1576_v54 = vpack.c.b16 %v1560_v4, %v1559_v14  ;;  %v2741_v40 = vrot.slane %v2740_v29, 4  ;;  %v3498_v43 = vunpack.c.l.b16 %v3384_v25 }
 0x1ba   : > { %v2731_v31 = vrot.slane %v2730_v49, 4  ;;  %v3390_v9 = vrot.slane %v7285_v38, 5  ;;  %v2757_v57 = vshll.u32 %v7331_v37, 16  ;;  %v2761_v13 = vshrl.u32 %v7331_v37, 16 }
 0x1bb   : > { %v7319_v46 = vadd.f32 %v2276_v19, %v1912_v16  ;;  %5607 = vmatmul.msk.bf16.gmra.mxu1 %vm1589_vm12, %v1576_v54  ;;  %v3530_v8 = vpack.c.b16 %v3499_v10, %v3498_v43  ;;  %v2746_v7 = vsel %vm6803_vm15, %v2741_v40, %v2745_v44  ;;  %v2748_v32 = vshrl.u32 %v2657_v59, 16  ;;  %v3318_v19 = vld [vmem:[#allocation2 + $0x18] sm:$0xe]  ;;  %v6128_v54 = vld [vmem:[#allocation2 + $0xc] sm:$0xff] }
 0x1bc   : > { %5844 = vmatmul.msk.bf16.vlgmr.msrb.gmra.mxu2 %vm1589_vm12, %v3120_v27  ;;  %v2736_v34 = vsel %vm6803_vm15, %v2731_v31, %v2735_v42  ;;  %v3091_v3 = vunpack.c.l.b16 %v2746_v7  ;;  %v2751_v62 = vshll.u32 %v2657_v59, 16  ;;  %v3392_v55 = vrot.slane %v3390_v9, 4  ;;  %v2659_v42 = vld [vmem:[#allocation2 + $0x2c] sm:$0x1]  ;;  %v2660_v59 = vld [vmem:[#allocation2 + $0x30] sm:$0xf] }
 0x1bd   : > { %v2759_v36 = vrot.slane %v2757_v57, 5  ;;  %v2763_v0 = vrot.slane %v2761_v13, 4  ;;  %v3090_v16 = vunpack.c.l.b16 %v2736_v34  ;;  %v2750_v35 = vrot.slane %v2748_v32, 4 }
 0x1be   : > { %v2753_v27 = vrot.slane %v2751_v62, 5  ;;  %v5861_v28 = vrot.slane %v3318_v19, 9  ;;  %v2767_v29 = vshll.u32 %v2659_v42, 16  ;;  %v2772_v32 = vshrl.u32 %v2660_v59, 16 }
 0x1bf   : > { %v1916_v58 = vpop.f32.mrf.mxu2  ;;  %v3121_v26 = vpack.c.b16 %v3091_v3, %v3090_v16  ;;  %v2764_v30 = vor.u32 %v2763_v0, %v2759_v36  ;;  %v2775_v62 = vshll.u32 %v2660_v59, 16 }
 0x1c0   : > { %v1684_v33 = vpop.f32.mrf.mxu1  ;;  %v7329_v61 = vpop.f32.mrf.mxu0  ;;  %v3391_v2 = vsel %vm6735_vm11, %v5861_v28, %v3390_v9  ;;  %v2754_v25 = vor.u32 %v2753_v27, %v2750_v35  ;;  %v2769_v43 = vrot.slane %v2767_v29, 5  ;;  %v3397_v9 = vrot.slane %v7331_v37, 5 }
 0x1c1   : > { %v1914_v50 = vadd.f32 %v1913_v18, %v1684_v33  ;;  %v2278_v60 = vpop.f32.mrf.mxu3  ;;  %v3393_v18 = vrot.slane %v2656_v63, 5  ;;  %v2765_v49 = vrot.slane %v2764_v30, 4  ;;  %v2774_v28 = vrot.slane %v2772_v32, 4 }
 0x1c2   : > { %v2755_v31 = vrot.slane %v2754_v25, 4  ;;  %v3399_v0 = vrot.slane %v3397_v9, 4 }
 0x1c3   : > { %v7333_v48 = vadd.f32 %v2278_v60, %v1914_v50  ;;  %5980 = vmatmul.msk.bf16.vlgmr.msra.gmra.mxu0 %vm1589_vm12, %v6150_v53  ;;  %v3394_v47 = vsel %vm6735_vm11, %v3392_v55, %v3393_v18  ;;  %v6151_v60 = vld [vmem:[#allocation2 + $0x24] sm:$0xff]  ;;  %v7356_v53 = vld [vmem:[#allocation2 + $0x34] sm:$0xf]  ;;  %v2770_v7 = vsel %vm6803_vm15, %v2765_v49, %v2769_v43  ;;  %v6129_v18 = vld [vmem:[#allocation2 + $0x18] sm:$0xff] }
 0x1c4   : > { %v3501_v63 = vunpack.c.l.b16 %v3394_v47  ;;  %v2781_v57 = vshll.u32 %v7356_v53, 16  ;;  %v2785_v13 = vshrl.u32 %v7356_v53, 16  ;;  %v2760_v34 = vsel %vm6803_vm15, %v2755_v31, %v2759_v36  ;;  %v2662_v36 = vld [vmem:[#allocation2 + $0x38] sm:$0x1] }
 0x1c5   : > { %v3093_v3 = vunpack.c.l.b16 %v2770_v7  ;;  %v3092_v19 = vunpack.c.l.b16 %v2760_v34  ;;  %v2777_v47 = vrot.slane %v2775_v62, 5  ;;  %v2791_v25 = vshll.u32 %v2662_v36, 16  ;;  %v7382_v7 = vld [vmem:[#allocation2 + $0x40] sm:$0xf] }
 0x1c6   : > { %5888 = vmatmul.msk.bf16.vlgmr.msrb.gmra.mxu3 %vm1589_vm12, %v3530_v8  ;;  %v2805_v32 = vshll.u32 %v7382_v7, 16  ;;  %v2809_v62 = vshrl.u32 %v7382_v7, 16 }
 0x1c7   : > { %v1918_v21 = vpop.f32.mrf.mxu2  ;;  %v3122_v27 = vpack.c.b16 %v3093_v3, %v3092_v19  ;;  %v2793_v59 = vrot.slane %v2791_v25, 5  ;;  %v3404_v3 = vrot.slane %v7356_v53, 5  ;;  %v2665_v25 = vld [vmem:[#allocation2 + $0x44] sm:$0x1] }
 0x1c8   : > { %v1687_v14 = vpop.f32.mrf.mxu1  ;;  %v7344_v4 = vpop.f32.mrf.mxu0 }
 0x1c9   : > { %v1917_v38 = vadd.f32 %v1916_v58, %v1687_v14  ;;  %v2281_v11 = vpop.f32.mrf.mxu3  ;;  %v3500_v58 = vunpack.c.l.b16 %v3391_v2  ;;  %v3406_v19 = vrot.slane %v3404_v3, 4 }
 0x1cb   : > { %v7346_v24 = vadd.f32 %v2281_v11, %v1917_v38  ;;  %5816 = vmatmul.msk.bf16.vlgmr.msrb.gmra.mxu1 %vm1589_vm12, %v6128_v54  ;;  %v3531_v8 = vpack.c.b16 %v3501_v63, %v3500_v58  ;;  %v2783_v38 = vrot.slane %v2781_v57, 5  ;;  %v2787_v11 = vrot.slane %v2785_v13, 4  ;;  %v3319_v54 = vld [vmem:[#allocation2 + $0x24] sm:$0xe] }
 0x1cc   : > { %5845 = vmatmul.msk.bf16.gmra.mxu2 %vm1589_vm12, %v3121_v26  ;;  %v3400_v26 = vrot.slane %v2659_v42, 5  ;;  %v5862_v30 = vrot.slane %v3319_v54, 9  ;;  %v2807_v54 = vrot.slane %v2805_v32, 5 }
 0x1cd   : > { %v2788_v29 = vor.u32 %v2787_v11, %v2783_v38 }
 0x1ce   : > { %v3401_v2 = vsel %vm6735_vm11, %v3399_v0, %v3400_v26  ;;  %v3398_v63 = vsel %vm6735_vm11, %v5862_v30, %v3397_v9  ;;  %v3320_v30 = vld [vmem:[#allocation2 + $0x30] sm:$0xe] }
 0x1cf   : > { %v1921_v50 = vpop.f32.mrf.mxu2  ;;  %v3503_v42 = vunpack.c.l.b16 %v3401_v2  ;;  %v3502_v31 = vunpack.c.l.b16 %v3398_v63  ;;  %v6130_v2 = vld [vmem:[#allocation2 + $0x24] sm:$0xff] }
 0x1d0   : > { %v1689_v39 = vpop.f32.mrf.mxu1  ;;  %v7354_v10 = vpop.f32.mrf.mxu0 }
 0x1d1   : > { %v1919_v33 = vadd.f32 %v1918_v21, %v1689_v39  ;;  %v2283_v40 = vpop.f32.mrf.mxu3  ;;  %v2778_v39 = vor.u32 %v2777_v47, %v2774_v28  ;;  %v3532_v9 = vpack.c.b16 %v3503_v42, %v3502_v31 }
 0x1d3   : > { %v7358_v44 = vadd.f32 %v2283_v40, %v1919_v33  ;;  %5981 = vmatmul.msk.bf16.gmra.mxu0 %vm1589_vm12, %v6151_v60  ;;  %v2789_v40 = vrot.slane %v2788_v29, 4  ;;  %v2779_v13 = vrot.slane %v2778_v39, 4  ;;  %v3407_v29 = vrot.slane %v2662_v36, 5 }
 0x1d5   : > { %v2794_v34 = vsel %vm6803_vm15, %v2789_v40, %v2793_v59 }
 0x1d6   : > { %5889 = vmatmul.msk.bf16.gmra.mxu3 %vm1589_vm12, %v3531_v8  ;;  %v6152_v8 = vld [vmem:[#allocation2 + $0x30] sm:$0xff]  ;;  %v3095_v0 = vunpack.c.l.b16 %v2794_v34 }
 0x1d7   : > { %v1923_v16 = vpop.f32.mrf.mxu2 }
 0x1d8   : > { %v1692_v14 = vpop.f32.mrf.mxu1  ;;  %v7369_v55 = vpop.f32.mrf.mxu0 }
 0x1d9   : > { %v1922_v37 = vadd.f32 %v1921_v50, %v1692_v14  ;;  %v2286_v21 = vpop.f32.mrf.mxu3  ;;  %v2784_v14 = vsel %vm6803_vm15, %v2779_v13, %v2783_v38 }
 0x1da   : > { %v3094_v47 = vunpack.c.l.b16 %v2784_v14 }
 0x1db   : > { %v7371_v35 = vadd.f32 %v2286_v21, %v1922_v37  ;;  %5817 = vmatmul.msk.bf16.gmra.mxu1 %vm1589_vm12, %v6129_v18  ;;  %v2811_v18 = vrot.slane %v2809_v62, 4  ;;  %v7409_v62 = vld [vmem:[#allocation2 + $0x4c] sm:$0xf] }
 0x1dc   : > { %5846 = vmatmul.msk.bf16.gmra.mxu2 %vm1589_vm12, %v3122_v27  ;;  %v3123_v38 = vpack.c.b16 %v3095_v0, %v3094_v47 }
 0x1df   : > { %v1926_v43 = vpop.f32.mrf.mxu2 }
 0x1e0   : > { %v1694_v49 = vpop.f32.mrf.mxu1  ;;  %v1876_v33 = vpop.f32.mrf.mxu0 }
 0x1e1   : > { %v1924_v50 = vadd.f32 %v1923_v16, %v1694_v49  ;;  %v7380_v60 = vadd.f32 %v1876_v33, %v7287_v1  ;;  %v2288_v58 = vpop.f32.mrf.mxu3  ;;  %v2663_v1 = vld [vmem:[#allocation2 + $0x3c] sm:$0xf]  ;;  %v5863_v49 = vrot.slane %v3320_v30, 9  ;;  %v3408_v33 = vsel %vm6735_vm11, %v3406_v19, %v3407_v29 }
 0x1e2   : > { %v2796_v11 = vshrl.u32 %v2663_v1, 16  ;;  %v2799_v37 = vshll.u32 %v2663_v1, 16  ;;  %v3505_v36 = vunpack.c.l.b16 %v3408_v33  ;;  %v6153_v1 = vld [vmem:[#allocation2 + $0x3c] sm:$0xff]  ;;  %v2833_v19 = vshrl.u32 %v7409_v62, 16 }
 0x1e3   : > { %v7384_v57 = vadd.f32 %v2288_v58, %v1924_v50  ;;  %5982 = vmatmul.msk.bf16.gmra.mxu0 %vm1589_vm12, %v6152_v8  ;;  %v3405_v40 = vsel %vm6735_vm11, %v5863_v49, %v3404_v3  ;;  %v2815_v50 = vshll.u32 %v2665_v25, 16  ;;  %v3321_v49 = vld [vmem:[#allocation2 + $0x3c] sm:$0xe] }
 0x1e4   : > { %v2798_v42 = vrot.slane %v2796_v11, 4  ;;  %v2801_v39 = vrot.slane %v2799_v37, 5  ;;  %v3504_v32 = vunpack.c.l.b16 %v3405_v40  ;;  %v2835_v29 = vrot.slane %v2833_v19, 4  ;;  %v6131_v40 = vld [vmem:[#allocation2 + $0x30] sm:$0xff]  ;;  %v7436_v19 = vld [vmem:[#allocation2 + $0x58] sm:$0xf] }
 0x1e5   : > { %v2817_v14 = vrot.slane %v2815_v50, 5  ;;  %v3414_v50 = vrot.slane %v2665_v25, 5 }
 0x1e6   : > { %5890 = vmatmul.msk.bf16.gmra.mxu3 %vm1589_vm12, %v3532_v9  ;;  %v2802_v58 = vor.u32 %v2801_v39, %v2798_v42  ;;  %v3533_v3 = vpack.c.b16 %v3505_v36, %v3504_v32 }
 0x1e7   : > { %v1928_v28 = vpop.f32.mrf.mxu2 }
 0x1e8   : > { %v1697_v21 = vpop.f32.mrf.mxu1  ;;  %v1878_v16 = vpop.f32.mrf.mxu0  ;;  %v2803_v11 = vrot.slane %v2802_v58, 4 }
 0x1e9   : > { %v1927_v26 = vadd.f32 %v1926_v43, %v1697_v21  ;;  %v7396_v53 = vadd.f32 %v1878_v16, %v7314_v17  ;;  %v2291_v27 = vpop.f32.mrf.mxu3  ;;  %v2812_v17 = vor.u32 %v2811_v18, %v2807_v54  ;;  %v3411_v21 = vrot.slane %v7382_v7, 5 }
 0x1ea   : > { %v2829_v16 = vshll.u32 %v7409_v62, 16  ;;  %v2808_v18 = vsel %vm6803_vm15, %v2803_v11, %v2807_v54  ;;  %v2668_v54 = vld [vmem:[#allocation2 + $0x50] sm:$0x1] }
 0x1eb   : > { %v7398_v63 = vadd.f32 %v2291_v27, %v1927_v26  ;;  %5818 = vmatmul.msk.bf16.gmra.mxu1 %vm1589_vm12, %v6130_v2  ;;  %v2813_v31 = vrot.slane %v2812_v17, 4  ;;  %v3413_v30 = vrot.slane %v3411_v21, 4  ;;  %v3096_v39 = vunpack.c.l.b16 %v2808_v18 }
 0x1ec   : > { %5847 = vmatmul.msk.bf16.gmra.mxu2 %vm1589_vm12, %v3123_v38  ;;  %v2831_v2 = vrot.slane %v2829_v16, 5 }
 0x1ed   : > { %v2818_v37 = vsel %vm6803_vm15, %v2813_v31, %v2817_v14  ;;  %v5864_v31 = vrot.slane %v3321_v49, 9 }
 0x1ee   : > { %v3097_v26 = vunpack.c.l.b16 %v2818_v37 }
 0x1ef   : > { %v1931_v34 = vpop.f32.mrf.mxu2 }
 0x1f0   : > { %v1699_v43 = vpop.f32.mrf.mxu1  ;;  %v1881_v8 = vpop.f32.mrf.mxu0  ;;  %v3124_v36 = vpack.c.b16 %v3097_v26, %v3096_v39 }
 0x1f1   : > { %v1929_v59 = vadd.f32 %v1928_v28, %v1699_v43  ;;  %v7407_v9 = vadd.f32 %v1881_v8, %v7329_v61  ;;  %v2293_v13 = vpop.f32.mrf.mxu3  ;;  %v2666_v61 = vld [vmem:[#allocation2 + $0x48] sm:$0xf] }
 0x1f2   : > { %v2820_v27 = vshrl.u32 %v2666_v61, 16  ;;  %v2823_v28 = vshll.u32 %v2666_v61, 16  ;;  %v6154_v61 = vld [vmem:[#allocation2 + $0x48] sm:$0xff] }
 0x1f3   : > { %v7411_v0 = vadd.f32 %v2293_v13, %v1929_v59  ;;  %5983 = vmatmul.msk.bf16.gmra.mxu0 %vm1589_vm12, %v6153_v1  ;;  %v2836_v59 = vor.u32 %v2835_v29, %v2831_v2  ;;  %v3412_v13 = vsel %vm6735_vm11, %v5864_v31, %v3411_v21  ;;  %v2669_v29 = vld [vmem:[#allocation2 + $0x54] sm:$0xf] }
 0x1f4   : > { %v2822_v58 = vrot.slane %v2820_v27, 4  ;;  %v2825_v43 = vrot.slane %v2823_v28, 5  ;;  %v3506_v16 = vunpack.c.l.b16 %v3412_v13 }
 0x1f5   : > { %v2837_v14 = vrot.slane %v2836_v59, 4  ;;  %v3322_v59 = vld [vmem:[#allocation2 + $0x48] sm:$0xe] }
 0x1f6   : > { %5891 = vmatmul.msk.bf16.gmra.mxu3 %vm1589_vm12, %v3533_v3  ;;  %v2826_v1 = vor.u32 %v2825_v43, %v2822_v58 }
 0x1f7   : > { %v1933_v17 = vpop.f32.mrf.mxu2 }
 0x1f8   : > { %v1883_v47 = vpop.f32.mrf.mxu0  ;;  %v1702_v38 = vpop.f32.mrf.mxu1  ;;  %v2827_v28 = vrot.slane %v2826_v1, 4  ;;  %v3421_v1 = vrot.slane %v2668_v54, 5 }
 0x1f9   : > { %v7423_v7 = vadd.f32 %v1883_v47, %v7344_v4  ;;  %v2296_v42 = vpop.f32.mrf.mxu3  ;;  %v1932_v33 = vadd.f32 %v1931_v34, %v1702_v38  ;;  %v3415_v4 = vsel %vm6735_vm11, %v3413_v30, %v3414_v50  ;;  %v2839_v34 = vshll.u32 %v2668_v54, 16 }
 0x1fa   : > { %v3507_v25 = vunpack.c.l.b16 %v3415_v4  ;;  %v3418_v47 = vrot.slane %v7409_v62, 5  ;;  %v2853_v38 = vshll.u32 %v7436_v19, 16  ;;  %v2832_v39 = vsel %vm6803_vm15, %v2827_v28, %v2831_v2  ;;  %v2671_v2 = vld [vmem:[#allocation2 + $0x5c] sm:$0x1] }
 0x1fb   : > { %v7425_v8 = vadd.f32 %v2296_v42, %v1932_v33  ;;  %5819 = vmatmul.msk.bf16.gmra.mxu1 %vm1589_vm12, %v6131_v40  ;;  %v2841_v27 = vrot.slane %v2839_v34, 5  ;;  %v2857_v42 = vshrl.u32 %v7436_v19, 16  ;;  %v2844_v33 = vshrl.u32 %v2669_v29, 16 }
 0x1fc   : > { %5848 = vmatmul.msk.bf16.gmra.mxu2 %vm1589_vm12, %v3124_v36  ;;  %v3534_v21 = vpack.c.b16 %v3507_v25, %v3506_v16  ;;  %v3420_v62 = vrot.slane %v3418_v47, 4  ;;  %v2855_v50 = vrot.slane %v2853_v38, 5  ;;  %v3098_v4 = vunpack.c.l.b16 %v2832_v39  ;;  %v6132_v25 = vld [vmem:[#allocation2 + $0x3c] sm:$0xff] }
 0x1fd   : > { %v2859_v36 = vrot.slane %v2857_v42, 4  ;;  %v6155_v42 = vld [vmem:[#allocation2 + $0x54] sm:$0xff] }
 0x1ff   : > { %v1936_v26 = vpop.f32.mrf.mxu2  ;;  %v2860_v16 = vor.u32 %v2859_v36, %v2855_v50  ;;  %v3425_v36 = vrot.slane %v7436_v19, 5 }
 0x200   : > { %v1886_v32 = vpop.f32.mrf.mxu0  ;;  %v1704_v3 = vpop.f32.mrf.mxu1 }
 0x201   : > { %v7434_v11 = vadd.f32 %v1886_v32, %v7354_v10  ;;  %v2298_v37 = vpop.f32.mrf.mxu3  ;;  %v1934_v18 = vadd.f32 %v1933_v17, %v1704_v3  ;;  %v2842_v10 = vsel %vm6803_vm15, %v2837_v14, %v2841_v27  ;;  %v2847_v17 = vshll.u32 %v2669_v29, 16 }
 0x202   : > { %v3099_v49 = vunpack.c.l.b16 %v2842_v10  ;;  %v2846_v14 = vrot.slane %v2844_v33, 4  ;;  %v2861_v28 = vrot.slane %v2860_v16, 4  ;;  %v3427_v19 = vrot.slane %v3425_v36, 4 }
 0x203   : > { %5984 = vmatmul.msk.bf16.gmra.mxu0 %vm1589_vm12, %v6154_v61  ;;  %v7440_v30 = vadd.f32 %v2298_v37, %v1934_v18  ;;  %v2849_v3 = vrot.slane %v2847_v17, 5  ;;  %v5865_v61 = vrot.slane %v3322_v59, 9 }
 0x204   : > { %v3125_v32 = vpack.c.b16 %v3099_v49, %v3098_v4  ;;  %v7463_v49 = vld [vmem:[#allocation2 + $0x64] sm:$0xf] }
 0x205   : > { %v3419_v18 = vsel %vm6735_vm11, %v5865_v61, %v3418_v47  ;;  %v2850_v27 = vor.u32 %v2849_v3, %v2846_v14  ;;  %v2877_v4 = vshll.u32 %v7463_v49, 16  ;;  %v2881_v59 = vshrl.u32 %v7463_v49, 16 }
 0x206   : > { %5892 = vmatmul.msk.bf16.gmra.mxu3 %vm1589_vm12, %v3534_v21  ;;  %v3508_v39 = vunpack.c.l.b16 %v3419_v18 }
 0x207   : > { %v1938_v34 = vpop.f32.mrf.mxu2  ;;  %v2879_v14 = vrot.slane %v2877_v4, 5  ;;  %v2883_v3 = vrot.slane %v2881_v59, 4 }
 0x208   : > { %v1888_v40 = vpop.f32.mrf.mxu0  ;;  %v1707_v58 = vpop.f32.mrf.mxu1 }
 0x209   : > { %v7450_v43 = vadd.f32 %v1888_v40, %v7369_v55  ;;  %v2301_v31 = vpop.f32.mrf.mxu3  ;;  %v1937_v13 = vadd.f32 %v1936_v26, %v1707_v58  ;;  %v3422_v55 = vsel %vm6735_vm11, %v3420_v62, %v3421_v1  ;;  %v2863_v26 = vshll.u32 %v2671_v2, 16 }
 0x20a   : > { %v3509_v54 = vunpack.c.l.b16 %v3422_v55  ;;  %v2851_v62 = vrot.slane %v2850_v27, 4 }
 0x20b   : > { %v7452_v37 = vadd.f32 %v2301_v31, %v1937_v13  ;;  %5820 = vmatmul.msk.bf16.gmra.mxu1 %vm1589_vm12, %v6132_v25  ;;  %v2865_v40 = vrot.slane %v2863_v26, 5  ;;  %v2672_v31 = vld [vmem:[#allocation2 + $0x60] sm:$0xf]  ;;  %v3323_v26 = vld [vmem:[#allocation2 + $0x54] sm:$0xe] }
 0x20c   : > { %5849 = vmatmul.msk.bf16.gmra.mxu2 %vm1589_vm12, %v3125_v32  ;;  %v3535_v47 = vpack.c.b16 %v3509_v54, %v3508_v39  ;;  %v2856_v13 = vsel %vm6803_vm15, %v2851_v62, %v2855_v50  ;;  %v2868_v25 = vshrl.u32 %v2672_v31, 16  ;;  %v2871_v1 = vshll.u32 %v2672_v31, 16  ;;  %v2674_v50 = vld [vmem:[#allocation2 + $0x68] sm:$0x1] }
 0x20d   : > { %v3100_v18 = vunpack.c.l.b16 %v2856_v13 }
 0x20f   : > { %v1941_v17 = vpop.f32.mrf.mxu2 }
 0x210   : > { %v2241_v21 = vpop.f32.mrf.mxu0  ;;  %v1709_v10 = vpop.f32.mrf.mxu1 }
 0x211   : > { %v7461_v29 = vadd.f32 %v2241_v21, %v7380_v60  ;;  %v2303_v38 = vpop.f32.mrf.mxu3  ;;  %v1939_v33 = vadd.f32 %v1938_v34, %v1709_v10  ;;  %v2866_v60 = vsel %vm6803_vm15, %v2861_v28, %v2865_v40  ;;  %v6133_v21 = vld [vmem:[#allocation2 + $0x48] sm:$0xff]  ;;  %v3428_v28 = vrot.slane %v2671_v2, 5 }
 0x212   : > { %v3101_v34 = vunpack.c.l.b16 %v2866_v60  ;;  %v2884_v40 = vor.u32 %v2883_v3, %v2879_v14 }
 0x213   : > { %5985 = vmatmul.msk.bf16.gmra.mxu0 %vm1589_vm12, %v6155_v42  ;;  %v7467_v58 = vadd.f32 %v2303_v38, %v1939_v33  ;;  %v2870_v38 = vrot.slane %v2868_v25, 4  ;;  %v2873_v42 = vrot.slane %v2871_v1, 5  ;;  %v5866_v33 = vrot.slane %v3323_v26, 9  ;;  %v7490_v1 = vld [vmem:[#allocation2 + $0x70] sm:$0xf] }
 0x214   : > { %v3126_v10 = vpack.c.b16 %v3101_v34, %v3100_v18  ;;  %v2885_v31 = vrot.slane %v2884_v40, 4  ;;  %v6156_v34 = vld [vmem:[#allocation2 + $0x60] sm:$0xff]  ;;  %v2675_v26 = vld [vmem:[#allocation2 + $0x6c] sm:$0xf] }
 0x215   : > { %v2874_v62 = vor.u32 %v2873_v42, %v2870_v38  ;;  %v2895_v38 = vshll.u32 %v2675_v26, 16 }
 0x216   : > { %5893 = vmatmul.msk.bf16.gmra.mxu3 %vm1589_vm12, %v3535_v47  ;;  %v2887_v47 = vshll.u32 %v2674_v50, 16 }
 0x217   : > { %v1943_v27 = vpop.f32.mrf.mxu2 }
 0x218   : > { %v2243_v32 = vpop.f32.mrf.mxu0  ;;  %v1712_v61 = vpop.f32.mrf.mxu1  ;;  %v2889_v3 = vrot.slane %v2887_v47, 5 }
 0x219   : > { %v7477_v55 = vadd.f32 %v2243_v32, %v7396_v53  ;;  %v2306_v16 = vpop.f32.mrf.mxu3  ;;  %v1942_v54 = vadd.f32 %v1941_v17, %v1712_v61  ;;  %v3429_v53 = vsel %vm6735_vm11, %v3427_v19, %v3428_v28  ;;  %v3426_v17 = vsel %vm6735_vm11, %v5866_v33, %v3425_v36  ;;  %v6170_v28 = vld [vmem:[%s8150_s2 + $0x80] sm:$0xff] }
 0x21a   : > { %v3511_v2 = vunpack.c.l.b16 %v3429_v53  ;;  %v3510_v25 = vunpack.c.l.b16 %v3426_v17  ;;  %v2875_v61 = vrot.slane %v2874_v62, 4  ;;  %4988 = vmatpush.bf16.msra.mxu2 %v6170_v28 }
 0x21b   : > { %v7479_v39 = vadd.f32 %v2306_v16, %v1942_v54  ;;  %5821 = vmatmul.msk.bf16.gmra.mxu1 %vm1589_vm12, %v6133_v21  ;;  %v3432_v16 = vrot.slane %v7463_v49, 5  ;;  %v2901_v54 = vshll.u32 %v7490_v1, 16  ;;  %v2905_v21 = vshrl.u32 %v7490_v1, 16 }
 0x21c   : > { %5850 = vmatmul.msk.bf16.gmra.mxu2 %vm1589_vm12, %v3126_v10  ;;  %v3536_v36 = vpack.c.b16 %v3511_v2, %v3510_v25  ;;  %v2892_v10 = vshrl.u32 %v2675_v26, 16  ;;  %v7509_v25 = vld [vmem:[#allocation2 + $0x74] sm:$0x1] }
 0x21d   : > { %v3434_v33 = vrot.slane %v3432_v16, 4  ;;  %v2903_v53 = vrot.slane %v2901_v54, 5  ;;  %v2907_v40 = vrot.slane %v2905_v21, 4  ;;  %v6168_v26 = vld [vmem:[%s8150_s2 + $0x70] sm:$0xff] }
 0x21e   : > { %4578 = vmatpush.bf16.msra.mxu1 %v6168_v26 }
 0x21f   : > { %v1946_v19 = vpop.f32.mrf.mxu2 }
 0x220   : > { %v2246_v60 = vpop.f32.mrf.mxu0  ;;  %v1714_v4 = vpop.f32.mrf.mxu1 }
 0x221   : > { %v7488_v59 = vadd.f32 %v2246_v60, %v7407_v9  ;;  %v2308_v13 = vpop.f32.mrf.mxu3  ;;  %v1944_v32 = vadd.f32 %v1943_v27, %v1714_v4  ;;  %v2890_v9 = vsel %vm6803_vm15, %v2885_v31, %v2889_v3  ;;  %v2880_v27 = vsel %vm6803_vm15, %v2875_v61, %v2879_v14  ;;  %v3324_v60 = vld [vmem:[#allocation2 + $0x60] sm:$0xe]  ;;  %v6134_v4 = vld [vmem:[#allocation2 + $0x54] sm:$0xff] }
 0x222   : > { %v3103_v49 = vunpack.c.l.b16 %v2890_v9  ;;  %v3102_v62 = vunpack.c.l.b16 %v2880_v27  ;;  %v2897_v3 = vrot.slane %v2895_v38, 5  ;;  %v5867_v61 = vrot.slane %v3324_v60, 9 }
 0x223   : > { %5986 = vmatmul.msk.bf16.gmra.mxu0 %vm1589_vm12, %v6156_v34  ;;  %v7494_v18 = vadd.f32 %v2308_v13, %v1944_v32  ;;  %v3435_v13 = vrot.slane %v2674_v50, 5  ;;  %v2894_v32 = vrot.slane %v2892_v10, 4  ;;  %v2908_v9 = vor.u32 %v2907_v40, %v2903_v53  ;;  %v7526_v40 = vld [vmem:[#allocation2 + $0x7c] sm:$0xf] }
 0x224   : > { %v3127_v34 = vpack.c.b16 %v3103_v49, %v3102_v62  ;;  %v2911_v50 = vshll.u32 %v7509_v25, 16 }
 0x225   : > { %v2898_v21 = vor.u32 %v2897_v3, %v2894_v32  ;;  %v2909_v28 = vrot.slane %v2908_v9, 4  ;;  %v2929_v32 = vshrl.u32 %v7526_v40, 16 }
 0x226   : > { %5894 = vmatmul.msk.bf16.gmra.mxu3 %vm1589_vm12, %v3536_v36 }
 0x227   : > { %v1948_v31 = vpop.f32.mrf.mxu2  ;;  %v2899_v60 = vrot.slane %v2898_v21, 4 }
 0x228   : > { %v2248_v42 = vpop.f32.mrf.mxu0  ;;  %v1717_v17 = vpop.f32.mrf.mxu1 }
 0x229   : > { %v7507_v47 = vadd.f32 %v2248_v42, %v7423_v7  ;;  %v2311_v2 = vpop.f32.mrf.mxu3  ;;  %v1947_v14 = vadd.f32 %v1946_v19, %v1717_v17  ;;  %v3436_v7 = vsel %vm6735_vm11, %v3434_v33, %v3435_v13  ;;  %v3433_v19 = vsel %vm6735_vm11, %v5867_v61, %v3432_v16  ;;  %v6157_v42 = vld [vmem:[#allocation2 + $0x6c] sm:$0xff]  ;;  %v2678_v13 = vld [vmem:[#allocation2 + $0x78] sm:$0xf] }
 0x22a   : > { %v3513_v54 = vunpack.c.l.b16 %v3436_v7  ;;  %v3512_v33 = vunpack.c.l.b16 %v3433_v19  ;;  %v2916_v61 = vshrl.u32 %v2678_v13, 16  ;;  %v2919_v7 = vshll.u32 %v2678_v13, 16 }
 0x22b   : > { %v7511_v36 = vadd.f32 %v2311_v2, %v1947_v14  ;;  %5822 = vmatmul.msk.bf16.gmra.mxu1 %vm1589_vm12, %v6134_v4  ;;  %v2913_v2 = vrot.slane %v2911_v50, 5  ;;  %v3439_v14 = vrot.slane %v7490_v1, 5  ;;  %v2931_v50 = vrot.slane %v2929_v32, 4 }
 0x22c   : > { %5851 = vmatmul.msk.bf16.gmra.mxu2 %vm1589_vm12, %v3127_v34  ;;  %v3537_v62 = vpack.c.b16 %v3513_v54, %v3512_v33  ;;  %v2925_v34 = vshll.u32 %v7526_v40, 16  ;;  %v3442_v33 = vrot.slane %v7509_v25, 5 }
 0x22d   : > { %v3441_v1 = vrot.slane %v3439_v14, 4 }
 0x22e   : > { %v2927_v19 = vrot.slane %v2925_v34, 5 }
 0x22f   : > { %v1951_v17 = vpop.f32.mrf.mxu2 }
 0x230   : > { %v2251_v27 = vpop.f32.mrf.mxu0  ;;  %v1719_v49 = vpop.f32.mrf.mxu1  ;;  %v2932_v13 = vor.u32 %v2931_v50, %v2927_v19 }
 0x231   : > { %v7524_v10 = vadd.f32 %v2251_v27, %v7434_v11  ;;  %v2313_v38 = vpop.f32.mrf.mxu3  ;;  %v1949_v16 = vadd.f32 %v1948_v31, %v1719_v49  ;;  %v2914_v11 = vsel %vm6803_vm15, %v2909_v28, %v2913_v2  ;;  %v2904_v31 = vsel %vm6803_vm15, %v2899_v60, %v2903_v53  ;;  %v3325_v28 = vld [vmem:[#allocation2 + $0x6c] sm:$0xe]  ;;  %v2680_v2 = vld [vmem:[#allocation2 + $0x80] sm:$0x1] }
 0x232   : > { %v3105_v3 = vunpack.c.l.b16 %v2914_v11  ;;  %v3104_v27 = vunpack.c.l.b16 %v2904_v31  ;;  %v6173_v53 = vld [vmem:[%s8151_s3 + $0x8] sm:$0xff]  ;;  %v2921_v60 = vrot.slane %v2919_v7, 5  ;;  %v2935_v34 = vshll.u32 %v2680_v2, 16 }
 0x233   : > { %5987 = vmatmul.msk.bf16.gmra.mxu0 %vm1589_vm12, %v6157_v42  ;;  %v7530_v4 = vadd.f32 %v2313_v38, %v1949_v16  ;;  %v6135_v42 = vld [vmem:[#allocation2 + $0x60] sm:$0xff]  ;;  %5220 = vmatpush.bf16.msra.mxu3 %v6173_v53 }
 0x234   : > { %v3128_v16 = vpack.c.b16 %v3105_v3, %v3104_v27  ;;  %v2933_v3 = vrot.slane %v2932_v13, 4  ;;  %v2681_v53 = vld [vmem:[#allocation2 + $0x84] sm:$0xf] }
 0x236   : > { %5895 = vmatmul.msk.bf16.gmra.mxu3 %vm1589_vm12, %v3537_v62  ;;  %v2918_v62 = vrot.slane %v2916_v61, 4 }
 0x237   : > { %v1953_v38 = vpop.f32.mrf.mxu2 }
 0x238   : > { %v2253_v9 = vpop.f32.mrf.mxu0  ;;  %v1722_v26 = vpop.f32.mrf.mxu1  ;;  %v2922_v31 = vor.u32 %v2921_v60, %v2918_v62 }
 0x239   : > { %v7540_v54 = vadd.f32 %v2253_v9, %v7450_v43  ;;  %v2316_v21 = vpop.f32.mrf.mxu3  ;;  %v1952_v49 = vadd.f32 %v1951_v17, %v1722_v26  ;;  %v5868_v43 = vrot.slane %v3325_v28, 9  ;;  %v3443_v17 = vsel %vm6735_vm11, %v3441_v1, %v3442_v33  ;;  %v6158_v9 = vld [vmem:[#allocation2 + $0x78] sm:$0xff] }
 0x23a   : > { %v3515_v32 = vunpack.c.l.b16 %v3443_v17  ;;  %v2937_v1 = vrot.slane %v2935_v34, 5  ;;  %v2943_v17 = vshll.u32 %v2681_v53, 16 }
 0x23b   : > { %v7546_v11 = vadd.f32 %v2316_v21, %v1952_v49  ;;  %5823 = vmatmul.msk.bf16.gmra.mxu1 %vm1589_vm12, %v6135_v42  ;;  %v3440_v25 = vsel %vm6735_vm11, %v5868_v43, %v3439_v14  ;;  %v7554_v21 = vld [vmem:[#allocation2 + $0x88] sm:$0xf]  ;;  %v2923_v49 = vrot.slane %v2922_v31, 4  ;;  %v3446_v42 = vrot.slane %v7526_v40, 5 }
 0x23c   : > { %5852 = vmatmul.msk.bf16.gmra.mxu2 %vm1589_vm12, %v3128_v16  ;;  %v3514_v26 = vunpack.c.l.b16 %v3440_v25  ;;  %v2938_v33 = vsel %vm6803_vm15, %v2933_v3, %v2937_v1  ;;  %v2949_v16 = vshll.u32 %v7554_v21, 16  ;;  %v2953_v62 = vshrl.u32 %v7554_v21, 16  ;;  %v3326_v3 = vld [vmem:[#allocation2 + $0x78] sm:$0xe]  ;;  %v2683_v1 = vld [vmem:[#allocation2 + $0x8c] sm:$0x1] }
 0x23d   : > { %v3107_v60 = vunpack.c.l.b16 %v2938_v33  ;;  %v2940_v43 = vshrl.u32 %v2681_v53, 16  ;;  %v3448_v13 = vrot.slane %v3446_v42, 4  ;;  %v2945_v56 = vrot.slane %v2943_v17, 5  ;;  %v6159_v17 = vld [vmem:[#allocation2 + $0x84] sm:$0xff] }
 0x23e   : > { %v3538_v50 = vpack.c.b16 %v3515_v32, %v3514_v26  ;;  %v2951_v40 = vrot.slane %v2949_v16, 5  ;;  %v2955_v25 = vrot.slane %v2953_v62, 4  ;;  %v3449_v26 = vrot.slane %v2680_v2, 5 }
 0x23f   : > { %v3205_v28 = vpop.f32.mrf.mxu2  ;;  %v2959_v2 = vshll.u32 %v2683_v1, 16 }
 0x240   : > { %v1724_v61 = vpop.f32.mrf.mxu1  ;;  %v3450_v33 = vsel %vm6735_vm11, %v3448_v13, %v3449_v26  ;;  %v2956_v53 = vor.u32 %v2955_v25, %v2951_v40  ;;  %v2684_v26 = vld [vmem:[#allocation2 + $0x90] sm:$0xf] }
 0x241   : > { %v2318_v7 = vpop.f32.mrf.mxu3  ;;  %v1954_v27 = vadd.f32 %v1953_v38, %v1724_v61  ;;  %v2928_v38 = vsel %vm6803_vm15, %v2923_v49, %v2927_v19  ;;  %v5869_v49 = vrot.slane %v3326_v3, 9  ;;  %v3517_v62 = vunpack.c.l.b16 %v3450_v33 }
 0x242   : > { %v3106_v31 = vunpack.c.l.b16 %v2928_v38  ;;  %v2961_v3 = vrot.slane %v2959_v2, 5  ;;  %v2964_v33 = vshrl.u32 %v2684_v26, 16 }
 0x243   : > { %5988 = vmatmul.msk.bf16.gmra.mxu0 %vm1589_vm12, %v6158_v9  ;;  %v7558_v14 = vadd.f32 %v2318_v7, %v1954_v27  ;;  %v6136_v7 = vld [vmem:[#allocation2 + $0x6c] sm:$0xff] }
 0x244   : > { %v3129_v27 = vpack.c.b16 %v3107_v60, %v3106_v31  ;;  %v2957_v60 = vrot.slane %v2956_v53, 4  ;;  %v7576_v31 = vld [vmem:[#allocation2 + $0x94] sm:$0xf]  ;;  %v2967_v53 = vshll.u32 %v2684_v26, 16 }
 0x246   : > { %5896 = vmatmul.msk.bf16.gmra.mxu3 %vm1589_vm12, %v3538_v50  ;;  %v2942_v50 = vrot.slane %v2940_v43, 4 }
 0x247   : > { %v3207_v9 = vpop.f32.mrf.mxu2 }
 0x248   : > { %v2539_v34 = vpop.f32.mrf.mxu1  ;;  %v2946_v38 = vor.u32 %v2945_v56, %v2942_v50  ;;  %v2962_v56 = vsel %vm6803_vm15, %v2957_v60, %v2961_v3  ;;  %v2977_v50 = vshrl.u32 %v7576_v31, 16  ;;  %v3327_v60 = vld [vmem:[#allocation2 + $0x84] sm:$0xe]  ;;  %v2686_v3 = vld [vmem:[#allocation2 + $0x98] sm:$0x1] }
 0x249   : > { %v3615_v32 = vpop.f32.mrf.mxu3  ;;  %v2619_v61 = vadd.f32 %v2539_v34, %v7461_v29  ;;  %v3447_v29 = vsel %vm6735_vm11, %v5869_v49, %v3446_v42  ;;  %v3453_v42 = vrot.slane %v7554_v21, 5  ;;  %v3109_v49 = vunpack.c.l.b16 %v2962_v56 }
 0x24a   : > { %v3516_v34 = vunpack.c.l.b16 %v3447_v29  ;;  %v2979_v29 = vrot.slane %v2977_v50, 4 }
 0x24b   : > { %v3285_v19 = vadd.f32 %v3205_v28, %v2619_v61  ;;  %5824 = vmatmul.msk.bf16.gmra.mxu1 %vm1589_vm12, %v6136_v7  ;;  %v2947_v61 = vrot.slane %v2946_v38, 4  ;;  %v3455_v21 = vrot.slane %v3453_v42, 4 }
 0x24c   : > { %5853 = vmatmul.msk.bf16.gmra.mxu2 %vm1589_vm12, %v3129_v27  ;;  %v2973_v27 = vshll.u32 %v7576_v31, 16 }
 0x24d   : > { %v7572_v16 = vadd.f32 %v3615_v32, %v3285_v19  ;;  %v3539_v32 = vpack.c.b16 %v3517_v62, %v3516_v34  ;;  %v3456_v34 = vrot.slane %v2683_v1, 5  ;;  %v2983_v1 = vshll.u32 %v2686_v3, 16 }
 0x24f   : > { %v3210_v25 = vpop.f32.mrf.mxu2  ;;  %v3457_v56 = vsel %vm6735_vm11, %v3455_v21, %v3456_v34 }
 0x250   : > { %v2541_v43 = vpop.f32.mrf.mxu1  ;;  %v3519_v50 = vunpack.c.l.b16 %v3457_v56 }
 0x251   : > { %v3617_v28 = vpop.f32.mrf.mxu3  ;;  %v2620_v13 = vadd.f32 %v2541_v43, %v7477_v55  ;;  %v2952_v55 = vsel %vm6803_vm15, %v2947_v61, %v2951_v40  ;;  %v5870_v61 = vrot.slane %v3327_v60, 9  ;;  %v2985_v60 = vrot.slane %v2983_v1, 5 }
 0x252   : > { %v3108_v38 = vunpack.c.l.b16 %v2952_v55 }
 0x253   : > { %5989 = vmatmul.msk.bf16.gmra.mxu0 %vm1589_vm12, %v6159_v17  ;;  %v3286_v7 = vadd.f32 %v3207_v9, %v2620_v13  ;;  %v2975_v9 = vrot.slane %v2973_v27, 5  ;;  %v6137_v17 = vld [vmem:[#allocation2 + $0x78] sm:$0xff] }
 0x254   : > { %v3130_v13 = vpack.c.b16 %v3109_v49, %v3108_v38  ;;  %v7599_v38 = vld [vmem:[#allocation2 + $0xa0] sm:$0xf] }
 0x255   : > { %v7585_v19 = vadd.f32 %v3617_v28, %v3286_v7  ;;  %v2969_v7 = vrot.slane %v2967_v53, 5  ;;  %v2980_v26 = vor.u32 %v2979_v29, %v2975_v9  ;;  %v6160_v53 = vld [vmem:[#allocation2 + $0x90] sm:$0xff] }
 0x256   : > { %5897 = vmatmul.msk.bf16.gmra.mxu3 %vm1589_vm12, %v3539_v32  ;;  %v2966_v32 = vrot.slane %v2964_v33, 4 }
 0x257   : > { %v3212_v28 = vpop.f32.mrf.mxu2  ;;  %v2981_v49 = vrot.slane %v2980_v26, 4 }
 0x258   : > { %v2544_v2 = vpop.f32.mrf.mxu1  ;;  %v2970_v55 = vor.u32 %v2969_v7, %v2966_v32  ;;  %v2997_v32 = vshll.u32 %v7599_v38, 16  ;;  %v3001_v7 = vshrl.u32 %v7599_v38, 16 }
 0x259   : > { %v3620_v62 = vpop.f32.mrf.mxu3  ;;  %v2621_v43 = vadd.f32 %v2544_v2, %v7488_v59  ;;  %v3454_v59 = vsel %vm6735_vm11, %v5870_v61, %v3453_v42  ;;  %v3460_v42 = vrot.slane %v7576_v31, 5  ;;  %v2986_v34 = vsel %vm6803_vm15, %v2981_v49, %v2985_v60  ;;  %v3328_v49 = vld [vmem:[#allocation2 + $0x90] sm:$0xe]  ;;  %v2689_v60 = vld [vmem:[#allocation2 + $0xa4] sm:$0x1] }
 0x25a   : > { %v3518_v2 = vunpack.c.l.b16 %v3454_v59  ;;  %v3111_v61 = vunpack.c.l.b16 %v2986_v34  ;;  %v3003_v59 = vrot.slane %v3001_v7, 4  ;;  %v5871_v34 = vrot.slane %v3328_v49, 9  ;;  %v7624_v49 = vld [vmem:[#allocation2 + $0xac] sm:$0xf] }
 0x25b   : > { %v3287_v40 = vadd.f32 %v3210_v25, %v2621_v43  ;;  %5825 = vmatmul.msk.bf16.gmra.mxu1 %vm1589_vm12, %v6137_v17  ;;  %v2971_v43 = vrot.slane %v2970_v55, 4  ;;  %v3462_v31 = vrot.slane %v3460_v42, 4  ;;  %v3007_v7 = vshll.u32 %v2689_v60, 16 }
 0x25c   : > { %5854 = vmatmul.msk.bf16.gmra.mxu2 %vm1589_vm12, %v3130_v13  ;;  %v2687_v13 = vld [vmem:[#allocation2 + $0x9c] sm:$0xf] }
 0x25d   : > { %v7595_v27 = vadd.f32 %v3620_v62, %v3287_v40  ;;  %v3540_v62 = vpack.c.b16 %v3519_v50, %v3518_v2  ;;  %v2988_v56 = vshrl.u32 %v2687_v13, 16  ;;  %v2991_v26 = vshll.u32 %v2687_v13, 16 }
 0x25e   : > { %v3463_v2 = vrot.slane %v2686_v3, 5  ;;  %v3461_v3 = vsel %vm6735_vm11, %v5871_v34, %v3460_v42  ;;  %v3467_v42 = vrot.slane %v7599_v38, 5 }
 0x25f   : > { %v3215_v29 = vpop.f32.mrf.mxu2 }
 0x260   : > { %v2546_v33 = vpop.f32.mrf.mxu1  ;;  %v3464_v13 = vsel %vm6735_vm11, %v3462_v31, %v3463_v2  ;;  %v3469_v38 = vrot.slane %v3467_v42, 4 }
 0x261   : > { %v3622_v25 = vpop.f32.mrf.mxu3  ;;  %v2622_v21 = vadd.f32 %v2546_v33, %v7507_v47  ;;  %v2976_v47 = vsel %vm6803_vm15, %v2971_v43, %v2975_v9  ;;  %v7614_v9 = vpop.f32.mrf.mxu0 }
 0x262   : > { %v3110_v55 = vunpack.c.l.b16 %v2976_v47  ;;  %v3521_v47 = vunpack.c.l.b16 %v3464_v13 }
 0x263   : > { %5990 = vmatmul.msk.bf16.gmra.mxu0 %vm1589_vm12, %v6160_v53  ;;  %v3288_v17 = vadd.f32 %v3212_v28, %v2622_v21  ;;  %v2999_v28 = vrot.slane %v2997_v32, 5  ;;  %v6138_v53 = vld [vmem:[#allocation2 + $0x84] sm:$0xff] }
 0x264   : > { %v3131_v21 = vpack.c.b16 %v3111_v61, %v3110_v55  ;;  %v3520_v55 = vunpack.c.l.b16 %v3461_v3 }
 0x265   : > { %v7608_v40 = vadd.f32 %v3622_v25, %v3288_v17  ;;  %v2993_v17 = vrot.slane %v2991_v26, 5  ;;  %v3004_v32 = vor.u32 %v3003_v59, %v2999_v28 }
 0x266   : > { %5898 = vmatmul.msk.bf16.gmra.mxu3 %vm1589_vm12, %v3540_v62  ;;  %v2990_v62 = vrot.slane %v2988_v56, 4 }
 0x267   : > { %v3217_v25 = vpop.f32.mrf.mxu2  ;;  %v3005_v56 = vrot.slane %v3004_v32, 4 }
 0x268   : > { %v2549_v1 = vpop.f32.mrf.mxu1  ;;  %v2994_v61 = vor.u32 %v2993_v17, %v2990_v62  ;;  %v3021_v62 = vshll.u32 %v7624_v49, 16  ;;  %v3025_v17 = vshrl.u32 %v7624_v49, 16 }
 0x269   : > { %v3625_v50 = vpop.f32.mrf.mxu3  ;;  %v2623_v33 = vadd.f32 %v2549_v1, %v7524_v10  ;;  %v6161_v1 = vld [vmem:[#allocation2 + $0x9c] sm:$0xff]  ;;  %v7633_v34 = vpop.f32.mrf.mxu0 }
 0x26b   : > { %v3289_v43 = vadd.f32 %v3215_v29, %v2623_v33  ;;  %5826 = vmatmul.msk.bf16.gmra.mxu1 %vm1589_vm12, %v6138_v53  ;;  %v3009_v33 = vrot.slane %v3007_v7, 5  ;;  %v2995_v53 = vrot.slane %v2994_v61, 4  ;;  %v3027_v61 = vrot.slane %v3025_v17, 4 }
 0x26c   : > { %5855 = vmatmul.msk.bf16.gmra.mxu2 %vm1589_vm12, %v3131_v21 }
 0x26d   : > { %v7620_v10 = vadd.f32 %v3625_v50, %v3289_v43  ;;  %v3541_v50 = vpack.c.b16 %v3521_v47, %v3520_v55  ;;  %v3010_v21 = vsel %vm6803_vm15, %v3005_v56, %v3009_v33  ;;  %v2690_v43 = vld [vmem:[#allocation2 + $0xa8] sm:$0xf]  ;;  %v3000_v13 = vsel %vm6803_vm15, %v2995_v53, %v2999_v28  ;;  %v2692_v53 = vld [vmem:[#allocation2 + $0xb0] sm:$0x1] }
 0x26e   : > { %v3113_v32 = vunpack.c.l.b16 %v3010_v21  ;;  %v3012_v3 = vshrl.u32 %v2690_v43, 16  ;;  %v3015_v7 = vshll.u32 %v2690_v43, 16  ;;  %v3023_v47 = vrot.slane %v3021_v62, 5 }
 0x26f   : > { %v3220_v59 = vpop.f32.mrf.mxu2  ;;  %v3470_v55 = vrot.slane %v2689_v60, 5  ;;  %v3031_v60 = vshll.u32 %v2692_v53, 16 }
 0x270   : > { %v2551_v26 = vpop.f32.mrf.mxu1  ;;  %v3014_v43 = vrot.slane %v3012_v3, 4  ;;  %v3017_v62 = vrot.slane %v3015_v7, 5  ;;  %v3028_v17 = vor.u32 %v3027_v61, %v3023_v47  ;;  %v6162_v3 = vld [vmem:[#allocation2 + $0xa8] sm:$0xff] }
 0x271   : > { %v3627_v29 = vpop.f32.mrf.mxu3  ;;  %v2624_v31 = vadd.f32 %v2551_v26, %v7540_v54  ;;  %v3471_v28 = vsel %vm6735_vm11, %v3469_v38, %v3470_v55 }
 0x272   : > { %v3029_v38 = vrot.slane %v3028_v17, 4 }
 0x273   : > { %5991 = vmatmul.msk.bf16.gmra.mxu0 %vm1589_vm12, %v6161_v1  ;;  %v3290_v2 = vadd.f32 %v3217_v25, %v2624_v31  ;;  %v3329_v25 = vld [vmem:[#allocation2 + $0x9c] sm:$0xe]  ;;  %v3112_v1 = vunpack.c.l.b16 %v3000_v13 }
 0x275   : > { %v7635_v54 = vadd.f32 %v3627_v29, %v3290_v2  ;;  %v6139_v29 = vld [vmem:[#allocation2 + $0x90] sm:$0xff]  ;;  %v3132_v2 = vpack.c.b16 %v3113_v32, %v3112_v1  ;;  %v3523_v32 = vunpack.c.l.b16 %v3471_v28  ;;  %v7651_v1 = vld [vmem:[#allocation2 + $0xb8] sm:$0xf] }
 0x276   : > { %5899 = vmatmul.msk.bf16.gmra.mxu3 %vm1589_vm12, %v3541_v50  ;;  %v5872_v50 = vrot.slane %v3329_v25, 9  ;;  %v7649_v25 = vpop.f32.mrf.mxu0 }
 0x277   : > { %8169 = vst [vmem:[#allocation7_spill] sm:$0xff] %v7635_v54  ;;  %v3222_v33 = vpop.f32.mrf.mxu2 }
 0x278   : > { %v2554_v56 = vpop.f32.mrf.mxu1 }
 0x279   : > { %v3630_v26 = vpop.f32.mrf.mxu3  ;;  %v2625_v31 = vadd.f32 %v2554_v56, %v7154_v45  ;;  %v3468_v45 = vsel %vm6735_vm11, %v5872_v50, %v3467_v42  ;;  %v3018_v56 = vor.u32 %v3017_v62, %v3014_v43  ;;  %v2693_v42 = vld [vmem:[#allocation2 + $0xb4] sm:$0xf]  ;;  %v3049_v50 = vshrl.u32 %v7651_v1, 16 }
 0x27a   : > { %v3522_v7 = vunpack.c.l.b16 %v3468_v45  ;;  %v3474_v62 = vrot.slane %v7624_v49, 5  ;;  %v3036_v45 = vshrl.u32 %v2693_v42, 16 }
 0x27b   : > { %v3291_v21 = vadd.f32 %v3220_v59, %v2625_v31  ;;  %5827 = vmatmul.msk.bf16.gmra.mxu1 %vm1589_vm12, %v6139_v29 }
 0x27c   : > { %5856 = vmatmul.msk.bf16.gmra.mxu2 %vm1589_vm12, %v3132_v2  ;;  %v3542_v29 = vpack.c.b16 %v3523_v32, %v3522_v7  ;;  %v3045_v2 = vshll.u32 %v7651_v1, 16  ;;  %v3039_v32 = vshll.u32 %v2693_v42, 16  ;;  %v3476_v7 = vrot.slane %v3474_v62, 4 }
 0x27d   : > { %v7645_v13 = vadd.f32 %v3630_v26, %v3291_v21  ;;  %v3033_v26 = vrot.slane %v3031_v60, 5  ;;  %v3019_v21 = vrot.slane %v3018_v56, 4 }
 0x27f   : > { %8170 = vst [vmem:[#allocation8_spill] sm:$0xff] %v7645_v13  ;;  %v3225_v31 = vpop.f32.mrf.mxu2  ;;  %v3034_v43 = vsel %vm6803_vm15, %v3029_v38, %v3033_v26  ;;  %v3330_v13 = vld [vmem:[#allocation2 + $0xa8] sm:$0xe]  ;;  %v7665_v38 = vpop.f32.mrf.mxu0 }
 0x280   : > { %v2556_v59 = vpop.f32.mrf.mxu1  ;;  %v3115_v60 = vunpack.c.l.b16 %v3034_v43  ;;  %v3041_v43 = vrot.slane %v3039_v32, 5 }
 0x281   : > { %v3632_v55 = vpop.f32.mrf.mxu3  ;;  %v2626_v61 = vadd.f32 %v2556_v59, %v7169_v52  ;;  %v3024_v52 = vsel %vm6803_vm15, %v3019_v21, %v3023_v47  ;;  %v3047_v59 = vrot.slane %v3045_v2, 5  ;;  %v3038_v21 = vrot.slane %v3036_v45, 4 }
 0x283   : > { %5992 = vmatmul.msk.bf16.gmra.mxu0 %vm1589_vm12, %v6162_v3  ;;  %v3292_v28 = vadd.f32 %v3222_v33, %v2626_v61  ;;  %v3051_v3 = vrot.slane %v3049_v50, 4  ;;  %v3114_v61 = vunpack.c.l.b16 %v3024_v52  ;;  %v5873_v50 = vrot.slane %v3330_v13, 9 }
 0x284   : > { %v3042_v45 = vor.u32 %v3041_v43, %v3038_v21 }
 0x285   : > { %v7660_v17 = vadd.f32 %v3632_v55, %v3292_v28  ;;  %v6140_v55 = vld [vmem:[#allocation2 + $0x9c] sm:$0xff]  ;;  %v3133_v47 = vpack.c.b16 %v3115_v60, %v3114_v61  ;;  %v3052_v42 = vor.u32 %v3051_v3, %v3047_v59  ;;  %v6163_v61 = vld [vmem:[#allocation2 + $0xb4] sm:$0xff] }
 0x286   : > { %5900 = vmatmul.msk.bf16.gmra.mxu3 %vm1589_vm12, %v3542_v29  ;;  %v3477_v29 = vrot.slane %v2692_v53, 5  ;;  %v7668_v28 = vld [vmem:[#allocation2 + $0xbc] sm:$0x1]  ;;  %v3475_v53 = vsel %vm6735_vm11, %v5873_v50, %v3474_v62 }
 0x287   : > { %8171 = vst [vmem:[#allocation9_spill] sm:$0xff] %v7660_v17  ;;  %v3227_v26 = vpop.f32.mrf.mxu2  ;;  %v3053_v32 = vrot.slane %v3052_v42, 4  ;;  %v3524_v13 = vunpack.c.l.b16 %v3475_v53  ;;  %v7687_v43 = vpop.f32.mrf.mxu0 }
 0x288   : > { %v2559_v33 = vpop.f32.mrf.mxu1  ;;  %v3478_v52 = vsel %vm6735_vm11, %v3476_v7, %v3477_v29  ;;  %v2696_v29 = vld [vmem:[#allocation2 + $0xc0] sm:$0xf] }
 0x289   : > { %v3635_v56 = vpop.f32.mrf.mxu3  ;;  %v2627_v49 = vadd.f32 %v2559_v33, %v7182_v15  ;;  %v3055_v15 = vshll.u32 %v7668_v28, 16  ;;  %v3525_v60 = vunpack.c.l.b16 %v3478_v52  ;;  %v3060_v21 = vshrl.u32 %v2696_v29, 16 }
 0x28a   : > { %v3063_v50 = vshll.u32 %v2696_v29, 16  ;;  %v2698_v29 = vld [vmem:[#allocation2 + $0xc8] sm:$0x1] }
 0x28b   : > { %v3293_v2 = vadd.f32 %v3225_v31, %v2627_v49  ;;  %5828 = vmatmul.msk.bf16.gmra.mxu1 %vm1589_vm12, %v6140_v55  ;;  %v3057_v49 = vrot.slane %v3055_v15, 5  ;;  %v3481_v15 = vrot.slane %v7651_v1, 5  ;;  %v3331_v1 = vld [vmem:[#allocation2 + $0xb4] sm:$0xe] }
 0x28c   : > { %5857 = vmatmul.msk.bf16.gmra.mxu2 %vm1589_vm12, %v3133_v47  ;;  %v7682_v47 = vld [vmem:[#allocation2 + $0xc4] sm:$0xf] }
 0x28d   : > { %v7675_v33 = vadd.f32 %v3635_v56, %v3293_v2  ;;  %v3543_v56 = vpack.c.b16 %v3525_v60, %v3524_v13  ;;  %v3043_v2 = vrot.slane %v3042_v45, 4  ;;  %v3058_v62 = vsel %vm6803_vm15, %v3053_v32, %v3057_v49 }
 0x28e   : > { %v3069_v52 = vshll.u32 %v7682_v47, 16  ;;  %v3117_v60 = vunpack.c.l.b16 %v3058_v62  ;;  %v3062_v45 = vrot.slane %v3060_v21, 4  ;;  %v3065_v32 = vrot.slane %v3063_v50, 5 }
 0x28f   : > { %8172 = vst [vmem:[#allocation10_spill] sm:$0xff] %v7675_v33  ;;  %v3230_v55 = vpop.f32.mrf.mxu2  ;;  %v3048_v53 = vsel %vm6803_vm15, %v3043_v2, %v3047_v59  ;;  %v3079_v62 = vshll.u32 %v2698_v29, 16  ;;  %v5874_v21 = vrot.slane %v3331_v1, 9  ;;  %v3332_v1 = vld [vmem:[#allocation2 + $0xc0] sm:$0xe] }
 0x290   : > { %v2561_v3 = vpop.f32.mrf.mxu1  ;;  %v3116_v49 = vunpack.c.l.b16 %v3048_v53  ;;  %v3066_v59 = vor.u32 %v3065_v32, %v3062_v45  ;;  %v6164_v45 = vld [vmem:[#allocation2 + $0xc0] sm:$0xff] }
 0x291   : > { %v7679_v31 = vpop.f32.mrf.mxu3  ;;  %v2628_v7 = vadd.f32 %v2561_v3, %v7196_v5  ;;  %v3073_v5 = vshrl.u32 %v7682_v47, 16  ;;  %v3071_v3 = vrot.slane %v3069_v52, 5  ;;  %v7703_v52 = vpop.f32.mrf.mxu0 }
 0x292   : > { %8173 = vst [vmem:[#allocation11_spill] sm:$0xff] %v7679_v31  ;;  %v6141_v31 = vld [vmem:[#allocation2 + $0xa8] sm:$0xff]  ;;  %v3134_v17 = vpack.c.b16 %v3117_v60, %v3116_v49 }
 0x293   : > { %5993 = vmatmul.msk.bf16.gmra.mxu0 %vm1589_vm12, %v6163_v61  ;;  %v7689_v42 = vadd.f32 %v3227_v26, %v2628_v7  ;;  %v3075_v61 = vrot.slane %v3073_v5, 4  ;;  %v3483_v7 = vrot.slane %v3481_v15, 4  ;;  %v3482_v5 = vsel %vm6735_vm11, %v5874_v21, %v3481_v15 }
 0x295   : > { %8174 = vst [vmem:[#allocation12_spill] sm:$0xff] %v7689_v42  ;;  %v3076_v2 = vor.u32 %v3075_v61, %v3071_v3  ;;  %v3526_v61 = vunpack.c.l.b16 %v3482_v5  ;;  %v4027_v5 = vld [vmem:[#allocation2 + $0x1c] sm:$0xf] }
 0x296   : > { %5901 = vmatmul.msk.bf16.gmra.mxu3 %vm1589_vm12, %v3543_v56  ;;  %v3484_v56 = vrot.slane %v7668_v28, 5 }
 0x297   : > { %v3232_v42 = vpop.f32.mrf.mxu2 }
 0x298   : > { %v2564_v13 = vpop.f32.mrf.mxu1  ;;  %v3485_v50 = vsel %vm6735_vm11, %v3483_v7, %v3484_v56 }
 0x299   : > { %v3640_v26 = vpop.f32.mrf.mxu3  ;;  %v2629_v33 = vadd.f32 %v2564_v13, %v7217_v41  ;;  %v3527_v28 = vunpack.c.l.b16 %v3485_v50  ;;  %v525_v13 = vld [vmem:[#allocation2 + $0xcc] sm:$0x1]  ;;  %v3491_v50 = vrot.slane %v2698_v29, 5  ;;  %v4028_v29 = vld [vmem:[#allocation2 + $0x20] sm:$0x1] }
 0x29b   : > { %v3295_v54 = vadd.f32 %v3230_v55, %v2629_v33  ;;  %5829 = vmatmul.msk.bf16.gmra.mxu1 %vm1589_vm12, %v6141_v31  ;;  %v3067_v33 = vrot.slane %v3066_v59, 4  ;;  %v3077_v55 = vrot.slane %v3076_v2, 4  ;;  %v3081_v31 = vrot.slane %v3079_v62, 5  ;;  %v7723_v2 = vpop.f32.mrf.mxu0 }
 0x29c   : > { %5858 = vmatmul.msk.bf16.gmra.mxu2 %vm1589_vm12, %v3134_v17  ;;  %v3544_v15 = vpack.c.b16 %v3527_v28, %v3526_v61  ;;  %v5875_v62 = vrot.slane %v3332_v1, 9  ;;  %v6142_v28 = vld [vmem:[#allocation2 + $0xb4] sm:$0xff] }
 0x29d   : > { %v7705_v41 = vadd.f32 %v3640_v26, %v3295_v54  ;;  %v526_v54 = vsel %vm6657_vm2, 0, %v525_v13  ;;  %v3072_v49 = vsel %vm6803_vm15, %v3067_v33, %v3071_v3  ;;  %v3082_v7 = vsel %vm6803_vm15, %v3077_v55, %v3081_v31 }
 0x29e   : > { %527 = vst [vmem:[#allocation2 + $0xcc] sm:$0x1] %v526_v54  ;;  %v3118_v56 = vunpack.c.l.b16 %v3072_v49  ;;  %v3119_v59 = vunpack.c.l.b16 %v3082_v7  ;;  %v4692_v49 = vld [vmem:[#allocation2 + $0x18] sm:$0xe] }
 0x29f   : > { %v3235_v32 = vpop.f32.mrf.mxu2 }
 0x2a0   : > { %v2566_v53 = vpop.f32.mrf.mxu1  ;;  %v3135_v55 = vpack.c.b16 %v3119_v59, %v3118_v56  ;;  %v4761_v56 = vrot.slane %v4028_v29, 5 }
 0x2a1   : > { %v7709_v60 = vpop.f32.mrf.mxu3  ;;  %v2630_v17 = vadd.f32 %v2566_v53, %v7239_v23  ;;  %v3488_v23 = vrot.slane %v7682_v47, 5  ;;  %v4758_v47 = vrot.slane %v4027_v5, 5 }
 0x2a3   : > { %5994 = vmatmul.msk.bf16.gmra.mxu0 %vm1589_vm12, %v6164_v45  ;;  %v7715_v26 = vadd.f32 %v3232_v42, %v2630_v17  ;;  %v3490_v21 = vrot.slane %v3488_v23, 4  ;;  %v3489_v53 = vsel %vm6735_vm11, %v5875_v62, %v3488_v23  ;;  %v4760_v54 = vrot.slane %v4758_v47, 4  ;;  %v7737_v59 = vpop.f32.mrf.mxu0  ;;  %v4026_v23 = vld [vmem:[#allocation2 + $0x18] sm:$0xf] }
 0x2a5   : > { %v3492_v45 = vsel %vm6735_vm11, %v3490_v21, %v3491_v50  ;;  %v6165_v61 = vld [vmem:[#allocation2 + $0xcc] sm:$0xff]  ;;  %v6024_v50 = vrot.slane %v4692_v49, 9 }
 0x2a6   : > { %5902 = vmatmul.msk.bf16.gmra.mxu3 %vm1589_vm12, %v3544_v15  ;;  %v3529_v13 = vunpack.c.l.b16 %v3492_v45 }
 0x2a7   : > { %v3237_v33 = vpop.f32.mrf.mxu2 }
 0x2a8   : > { %v2569_v51 = vpop.f32.mrf.mxu1 }
 0x2a9   : > { %v3645_v42 = vpop.f32.mrf.mxu3  ;;  %v2631_v3 = vadd.f32 %v2569_v51, %v7274_v12  ;;  %v3528_v12 = vunpack.c.l.b16 %v3489_v53  ;;  %v4084_v51 = vshll.u32 %v4027_v5, 16 }
 0x2ab   : > { %v3297_v31 = vadd.f32 %v3235_v32, %v2631_v3  ;;  %5830 = vmatmul.msk.bf16.gmra.mxu1 %vm1589_vm12, %v6142_v28  ;;  %v3545_v21 = vpack.c.b16 %v3529_v13, %v3528_v12  ;;  %v4762_v3 = vsel %vm6735_vm11, %v4760_v54, %v4761_v56  ;;  %v4075_v28 = vshrl.u32 %v4026_v23, 16  ;;  %v6143_v13 = vld [vmem:[#allocation2 + $0xc0] sm:$0xff] }
 0x2ac   : > { %5859 = vmatmul.msk.bf16.gmra.mxu2 %vm1589_vm12, %v3135_v55  ;;  %v4874_v55 = vunpack.c.l.b16 %v4762_v3  ;;  %v4086_v53 = vrot.slane %v4084_v51, 5  ;;  %v6172_v54 = vld [vmem:[%s8151_s3] sm:$0xff]  ;;  %v4094_v51 = vshll.u32 %v4028_v29, 16 }
 0x2ad   : > { %v7732_v17 = vadd.f32 %v3645_v42, %v3297_v31  ;;  %v4088_v42 = vshrl.u32 %v4027_v5, 16  ;;  %v4078_v31 = vshll.u32 %v4026_v23, 16  ;;  %v4077_v56 = vrot.slane %v4075_v28, 4  ;;  %5221 = vmatpush.bf16.msra.mxu3 %v6172_v54  ;;  %v4029_v29 = vld [vmem:[#allocation2 + $0x24] sm:$0xf] }
 0x2ae   : > { %v4096_v28 = vrot.slane %v4094_v51, 5  ;;  %v4102_v51 = vshll.u32 %v4029_v29, 16 }
 0x2af   : > { %8175 = vst [vmem:[#allocation13_spill] sm:$0xff] %v7732_v17  ;;  %v3240_v1 = vpop.f32.mrf.mxu2  ;;  %v4090_v45 = vrot.slane %v4088_v42, 4 }
 0x2b0   : > { %v2571_v15 = vpop.f32.mrf.mxu1 }
 0x2b1   : > { %v7734_v32 = vpop.f32.mrf.mxu3  ;;  %v2632_v7 = vadd.f32 %v2571_v15, %v7299_v6  ;;  %v4759_v6 = vsel %vm6735_vm11, %v6024_v50, %v4758_v47  ;;  %v4080_v47 = vrot.slane %v4078_v31, 5 }
 0x2b2   : > { %8176 = vst [vmem:[#allocation14_spill] sm:$0xff] %v7734_v32  ;;  %v4873_v5 = vunpack.c.l.b16 %v4759_v6  ;;  %v4031_v6 = vld [vmem:[#allocation2 + $0x2c] sm:$0x1] }
 0x2b3   : > { %5995 = vmatmul.msk.bf16.gmra.mxu0 %vm1589_vm12, %v6165_v61  ;;  %v7740_v62 = vadd.f32 %v3237_v33, %v2632_v7  ;;  %v4030_v33 = vld [vmem:[#allocation2 + $0x28] sm:$0xf] }
 0x2b4   : > { %v4905_v7 = vpack.c.b16 %v4874_v55, %v4873_v5  ;;  %v4765_v23 = vrot.slane %v4030_v33, 5  ;;  %v4693_v55 = vld [vmem:[#allocation2 + $0x24] sm:$0xe] }
 0x2b6   : > { %5903 = vmatmul.msk.bf16.gmra.mxu3 %vm1589_vm12, %v3545_v21  ;;  %v4091_v21 = vor.u32 %v4090_v45, %v4086_v53  ;;  %v4768_v45 = vrot.slane %v4031_v6, 5 }
 0x2b7   : > { %v3242_v49 = vpop.f32.mrf.mxu2 }
 0x2b8   : > { %v2574_v61 = vpop.f32.mrf.mxu1  ;;  %v4092_v3 = vrot.slane %v4091_v21, 4 }
 0x2b9   : > { %v3650_v15 = vpop.f32.mrf.mxu3  ;;  %v2633_v12 = vadd.f32 %v2574_v61, %v7319_v46  ;;  %v4081_v46 = vor.u32 %v4080_v47, %v4077_v56  ;;  %v4767_v61 = vrot.slane %v4765_v23, 4 }
 0x2bb   : > { %v3299_v50 = vadd.f32 %v3240_v1, %v2633_v12  ;;  %5831 = vmatmul.msk.bf16.gmra.mxu1 %vm1589_vm12, %v6143_v13  ;;  %v4082_v5 = vrot.slane %v4081_v46, 4  ;;  %v4097_v12 = vsel %vm6803_vm15, %v4092_v3, %v4096_v28  ;;  %v4112_v13 = vshrl.u32 %v4030_v33, 16 }
 0x2bc   : > { %6052 = vmatmul.msk.bf16.vlgmr.msra.gmra.mxu2 %vm1589_vm12, %v4905_v7  ;;  %v6025_v7 = vrot.slane %v4693_v55, 9  ;;  %v4769_v56 = vsel %vm6735_vm11, %v4767_v61, %v4768_v45  ;;  %v4464_v21 = vunpack.c.l.b16 %v4097_v12  ;;  %v4033_v55 = vld [vmem:[#allocation2 + $0x34] sm:$0xf] }
 0x2bd   : > { %v7753_v42 = vadd.f32 %v3650_v15, %v3299_v50  ;;  %v4108_v15 = vshll.u32 %v4030_v33, 16  ;;  %v4087_v47 = vsel %vm6803_vm15, %v4082_v5, %v4086_v53  ;;  %v4876_v50 = vunpack.c.l.b16 %v4769_v56  ;;  %v4034_v56 = vld [vmem:[#allocation2 + $0x38] sm:$0x1] }
 0x2be   : > { %v4114_v3 = vrot.slane %v4112_v13, 4  ;;  %v4463_v28 = vunpack.c.l.b16 %v4087_v47  ;;  %v4104_v5 = vrot.slane %v4102_v51, 5 }
 0x2bf   : > { %8177 = vst [vmem:[#allocation15_spill] sm:$0xff] %v7753_v42  ;;  %v3245_v31 = vpop.f32.mrf.mxu2  ;;  %v4110_v46 = vrot.slane %v4108_v15, 5 }
 0x2c0   : > { %v2576_v17 = vpop.f32.mrf.mxu1  ;;  %v4495_v45 = vpack.c.b16 %v4464_v21, %v4463_v28 }
 0x2c1   : > { %v7755_v32 = vpop.f32.mrf.mxu3  ;;  %v2634_v1 = vadd.f32 %v2576_v17, %v7333_v48  ;;  %v4766_v48 = vsel %vm6735_vm11, %v6025_v7, %v4765_v23  ;;  %v4099_v17 = vshrl.u32 %v4029_v29, 16  ;;  %v4115_v12 = vor.u32 %v4114_v3, %v4110_v46 }
 0x2c2   : > { %8178 = vst [vmem:[#allocation16_spill] sm:$0xff] %v7755_v32  ;;  %v4772_v23 = vrot.slane %v4033_v55, 5  ;;  %v4118_v29 = vshll.u32 %v4031_v6, 16  ;;  %v4032_v6 = vld [vmem:[#allocation2 + $0x30] sm:$0xf]  ;;  %v4136_v3 = vshrl.u32 %v4033_v55, 16 }
 0x2c3   : > { %v7760_v54 = vadd.f32 %v3242_v49, %v2634_v1  ;;  %v4875_v1 = vunpack.c.l.b16 %v4766_v48  ;;  %v4101_v53 = vrot.slane %v4099_v17, 4  ;;  %v4116_v7 = vrot.slane %v4115_v12, 4  ;;  %v4694_v17 = vld [vmem:[#allocation2 + $0x30] sm:$0xe] }
 0x2c4   : > { %v4774_v47 = vrot.slane %v4772_v23, 4  ;;  %v4120_v21 = vrot.slane %v4118_v29, 5  ;;  %v4126_v12 = vshll.u32 %v4032_v6, 16 }
 0x2c5   : > { %8179 = vst [vmem:[#allocation17_spill] sm:$0xff] %v7760_v54  ;;  %v4906_v32 = vpack.c.b16 %v4876_v50, %v4875_v1  ;;  %v4105_v13 = vor.u32 %v4104_v5, %v4101_v53  ;;  %v4123_v53 = vshrl.u32 %v4032_v6, 16  ;;  %v4142_v6 = vshll.u32 %v4034_v56, 16 }
 0x2c6   : > { %v8198_v22 = vld [vmem:[#allocation15_spill] sm:$0xff] }
 0x2c7   : > { %v3247_v61 = vpop.f32.mrf.mxu2  ;;  %v4106_v51 = vrot.slane %v4105_v13, 4  ;;  %v4138_v13 = vrot.slane %v4136_v3, 4 }
 0x2c8   : > { %v2579_v33 = vpop.f32.mrf.mxu1 }
 0x2c9   : > { %v3655_v49 = vpop.f32.mrf.mxu3  ;;  %v2635_v42 = vadd.f32 %v2579_v33, %v7346_v24  ;;  %v6026_v33 = vrot.slane %v4694_v17, 9  ;;  %v4111_v1 = vsel %vm6803_vm15, %v4106_v51, %v4110_v46  ;;  %v4125_v46 = vrot.slane %v4123_v53, 4  ;;  %v4695_v53 = vld [vmem:[#allocation2 + $0x3c] sm:$0xe] }
 0x2ca   : > { %v4128_v51 = vrot.slane %v4126_v12, 5 }
 0x2cb   : > { %v3301_v54 = vadd.f32 %v3245_v31, %v2635_v42  ;;  %6008 = vmatmul.msk.bf16.vlgmr.msra.gmra.mxu1 %vm1589_vm12, %v4495_v45  ;;  %v4775_v31 = vrot.slane %v4034_v56, 5  ;;  %v4035_v56 = vld [vmem:[#allocation2 + $0x3c] sm:$0xf] }
 0x2cc   : > { %6053 = vmatmul.msk.bf16.gmra.mxu2 %vm1589_vm12, %v4906_v32  ;;  %v4121_v32 = vsel %vm6803_vm15, %v4116_v7, %v4120_v21  ;;  %v4465_v7 = vunpack.c.l.b16 %v4111_v1  ;;  %v4036_v21 = vld [vmem:[#allocation2 + $0x40] sm:$0xf]  ;;  %v4129_v3 = vor.u32 %v4128_v51, %v4125_v46  ;;  %v4147_v46 = vshrl.u32 %v4035_v56, 16 }
 0x2cd   : > { %v7771_v15 = vadd.f32 %v3655_v49, %v3301_v54  ;;  %v4132_v54 = vshll.u32 %v4033_v55, 16  ;;  %v4776_v49 = vsel %vm6735_vm11, %v4774_v47, %v4775_v31  ;;  %v4466_v45 = vunpack.c.l.b16 %v4121_v32 }
 0x2ce   : > { %v4878_v5 = vunpack.c.l.b16 %v4776_v49  ;;  %v4037_v49 = vld [vmem:[#allocation2 + $0x44] sm:$0x1]  ;;  %v4150_v51 = vshll.u32 %v4035_v56, 16 }
 0x2cf   : > { %8180 = vst [vmem:[#allocation18_spill] sm:$0xff] %v7771_v15  ;;  %v3250_v42 = vpop.f32.mrf.mxu2  ;;  %v4134_v29 = vrot.slane %v4132_v54, 5  ;;  %v4782_v12 = vrot.slane %v4037_v49, 5  ;;  %v4166_v56 = vshll.u32 %v4037_v49, 16 }
 0x2d0   : > { %v2581_v24 = vpop.f32.mrf.mxu1 }
 0x2d1   : > { %v7773_v48 = vpop.f32.mrf.mxu3  ;;  %v2636_v50 = vadd.f32 %v2581_v24, %v7358_v44  ;;  %v4773_v44 = vsel %vm6735_vm11, %v6026_v33, %v4772_v23  ;;  %v4139_v32 = vor.u32 %v4138_v13, %v4134_v29  ;;  %v4779_v23 = vrot.slane %v4036_v21, 5 }
 0x2d2   : > { %v4877_v24 = vunpack.c.l.b16 %v4773_v44  ;;  %v4130_v13 = vrot.slane %v4129_v3, 4 }
 0x2d3   : > { %v7778_v28 = vadd.f32 %v3247_v61, %v2636_v50  ;;  %v4496_v50 = vpack.c.b16 %v4466_v45, %v4465_v7  ;;  %v4140_v33 = vrot.slane %v4139_v32, 4  ;;  %v4781_v1 = vrot.slane %v4779_v23, 4 }
 0x2d4   : > { %v4907_v31 = vpack.c.b16 %v4878_v5, %v4877_v24  ;;  %v4144_v45 = vrot.slane %v4142_v6, 5  ;;  %v6027_v24 = vrot.slane %v4695_v53, 9 }
 0x2d6   : > { %v4145_v7 = vsel %vm6803_vm15, %v4140_v33, %v4144_v45 }
 0x2d7   : > { %v3252_v47 = vpop.f32.mrf.mxu2 }
 0x2d8   : > { %v2584_v55 = vpop.f32.mrf.mxu1 }
 0x2d9   : > { %v3660_v61 = vpop.f32.mrf.mxu3  ;;  %v2637_v17 = vadd.f32 %v2584_v55, %v7371_v35  ;;  %v4160_v55 = vshrl.u32 %v4036_v21, 16 }
 0x2db   : > { %v3303_v15 = vadd.f32 %v3250_v42, %v2637_v17  ;;  %6009 = vmatmul.msk.bf16.gmra.mxu1 %vm1589_vm12, %v4496_v50  ;;  %v4783_v17 = vsel %vm6735_vm11, %v4781_v1, %v4782_v12  ;;  %v4135_v50 = vsel %vm6803_vm15, %v4130_v13, %v4134_v29  ;;  %v4162_v3 = vrot.slane %v4160_v55, 4 }
 0x2dc   : > { %6054 = vmatmul.msk.bf16.gmra.mxu2 %vm1589_vm12, %v4907_v31  ;;  %v4468_v31 = vunpack.c.l.b16 %v4145_v7  ;;  %v4880_v32 = vunpack.c.l.b16 %v4783_v17  ;;  %v4467_v33 = vunpack.c.l.b16 %v4135_v50  ;;  %v4149_v12 = vrot.slane %v4147_v46, 4  ;;  %v4696_v46 = vld [vmem:[#allocation2 + $0x48] sm:$0xe] }
 0x2dd   : > { %v7789_v54 = vadd.f32 %v3660_v61, %v3303_v15  ;;  %v4156_v15 = vshll.u32 %v4036_v21, 16  ;;  %v4039_v21 = vld [vmem:[#allocation2 + $0x4c] sm:$0xf]  ;;  %v4152_v29 = vrot.slane %v4150_v51, 5 }
 0x2df   : > { %8181 = vst [vmem:[#allocation19_spill] sm:$0xff] %v7789_v54  ;;  %v3255_v42 = vpop.f32.mrf.mxu2  ;;  %v4158_v6 = vrot.slane %v4156_v15, 5  ;;  %v4786_v54 = vrot.slane %v4039_v21, 5  ;;  %v4153_v55 = vor.u32 %v4152_v29, %v4149_v12 }
 0x2e0   : > { %v2586_v35 = vpop.f32.mrf.mxu1 }
 0x2e1   : > { %v7791_v44 = vpop.f32.mrf.mxu3  ;;  %v2638_v5 = vadd.f32 %v2586_v35, %v7384_v57  ;;  %v4780_v57 = vsel %vm6735_vm11, %v6027_v24, %v4779_v23  ;;  %v4163_v7 = vor.u32 %v4162_v3, %v4158_v6  ;;  %v4040_v24 = vld [vmem:[#allocation2 + $0x50] sm:$0x1]  ;;  %v4788_v50 = vrot.slane %v4786_v54, 4 }
 0x2e2   : > { %v4879_v45 = vunpack.c.l.b16 %v4780_v57  ;;  %v4789_v51 = vrot.slane %v4040_v24, 5  ;;  %v4154_v3 = vrot.slane %v4153_v55, 4 }
 0x2e3   : > { %v7796_v61 = vadd.f32 %v3252_v47, %v2638_v5  ;;  %v4497_v5 = vpack.c.b16 %v4468_v31, %v4467_v33  ;;  %v4164_v17 = vrot.slane %v4163_v7, 4  ;;  %v4168_v31 = vrot.slane %v4166_v56, 5 }
 0x2e4   : > { %v4908_v13 = vpack.c.b16 %v4880_v32, %v4879_v45  ;;  %v4790_v49 = vsel %vm6735_vm11, %v4788_v50, %v4789_v51  ;;  %v4159_v12 = vsel %vm6803_vm15, %v4154_v3, %v4158_v6 }
 0x2e5   : > { %v4169_v33 = vsel %vm6803_vm15, %v4164_v17, %v4168_v31  ;;  %v4469_v17 = vunpack.c.l.b16 %v4159_v12 }
 0x2e6   : > { %v4470_v29 = vunpack.c.l.b16 %v4169_v33 }
 0x2e7   : > { %v3257_v1 = vpop.f32.mrf.mxu2 }
 0x2e8   : > { %v2589_v47 = vpop.f32.mrf.mxu1  ;;  %v4498_v51 = vpack.c.b16 %v4470_v29, %v4469_v17 }
 0x2e9   : > { %v3665_v35 = vpop.f32.mrf.mxu3  ;;  %v2639_v53 = vadd.f32 %v2589_v47, %v7398_v63  ;;  %v4180_v47 = vshll.u32 %v4039_v21, 16 }
 0x2eb   : > { %v3305_v23 = vadd.f32 %v3255_v42, %v2639_v53  ;;  %6010 = vmatmul.msk.bf16.gmra.mxu1 %vm1589_vm12, %v4497_v5  ;;  %v6028_v53 = vrot.slane %v4696_v46, 9  ;;  %v4038_v5 = vld [vmem:[#allocation2 + $0x48] sm:$0xf]  ;;  %v4182_v56 = vrot.slane %v4180_v47, 5 }
 0x2ec   : > { %6055 = vmatmul.msk.bf16.gmra.mxu2 %vm1589_vm12, %v4908_v13  ;;  %v4882_v13 = vunpack.c.l.b16 %v4790_v49  ;;  %v4171_v7 = vshrl.u32 %v4038_v5, 16  ;;  %v4190_v49 = vshll.u32 %v4040_v24, 16  ;;  %v4041_v24 = vld [vmem:[#allocation2 + $0x54] sm:$0xf] }
 0x2ed   : > { %v7807_v15 = vadd.f32 %v3665_v35, %v3305_v23  ;;  %v4184_v35 = vshrl.u32 %v4039_v21, 16  ;;  %v4174_v23 = vshll.u32 %v4038_v5, 16  ;;  %v4043_v5 = vld [vmem:[#allocation2 + $0x5c] sm:$0x1] }
 0x2ee   : > { %v4173_v6 = vrot.slane %v4171_v7, 4  ;;  %v4192_v29 = vrot.slane %v4190_v49, 5 }
 0x2ef   : > { %8182 = vst [vmem:[#allocation20_spill] sm:$0xff] %v7807_v15  ;;  %v3260_v42 = vpop.f32.mrf.mxu2  ;;  %v4186_v55 = vrot.slane %v4184_v35, 4  ;;  %v4176_v3 = vrot.slane %v4174_v23, 5  ;;  %v4796_v23 = vrot.slane %v4043_v5, 5 }
 0x2f0   : > { %v2591_v63 = vpop.f32.mrf.mxu1 }
 0x2f1   : > { %v7809_v57 = vpop.f32.mrf.mxu3  ;;  %v2640_v32 = vadd.f32 %v2591_v63, %v7411_v0  ;;  %v4787_v0 = vsel %vm6735_vm11, %v6028_v53, %v4786_v54  ;;  %v4187_v33 = vor.u32 %v4186_v55, %v4182_v56  ;;  %v4177_v35 = vor.u32 %v4176_v3, %v4173_v6 }
 0x2f2   : > { %v4881_v21 = vunpack.c.l.b16 %v4787_v0  ;;  %v4195_v6 = vshrl.u32 %v4041_v24, 16 }
 0x2f3   : > { %v7816_v45 = vadd.f32 %v3257_v1, %v2640_v32  ;;  %v4042_v1 = vld [vmem:[#allocation2 + $0x58] sm:$0xf]  ;;  %v4188_v53 = vrot.slane %v4187_v33, 4  ;;  %v4178_v55 = vrot.slane %v4177_v35, 4  ;;  %v4198_v33 = vshll.u32 %v4041_v24, 16 }
 0x2f4   : > { %v4909_v32 = vpack.c.b16 %v4882_v13, %v4881_v21  ;;  %v4793_v54 = vrot.slane %v4042_v1, 5  ;;  %v4697_v13 = vld [vmem:[#allocation2 + $0x54] sm:$0xe]  ;;  %v4214_v24 = vshll.u32 %v4043_v5, 16  ;;  %v4044_v5 = vld [vmem:[#allocation2 + $0x60] sm:$0xf] }
 0x2f5   : > { %v4193_v17 = vsel %vm6803_vm15, %v4188_v53, %v4192_v29  ;;  %v6029_v21 = vrot.slane %v4697_v13, 9  ;;  %v4045_v29 = vld [vmem:[#allocation2 + $0x64] sm:$0xf] }
 0x2f6   : > { %v4795_v12 = vrot.slane %v4793_v54, 4 }
 0x2f7   : > { %v3262_v46 = vpop.f32.mrf.mxu2 }
 0x2f8   : > { %v2594_v50 = vpop.f32.mrf.mxu1 }
 0x2f9   : > { %v3670_v63 = vpop.f32.mrf.mxu3  ;;  %v2641_v31 = vadd.f32 %v2594_v50, %v7425_v8  ;;  %v4208_v50 = vshrl.u32 %v4042_v1, 16 }
 0x2fb   : > { %v3307_v15 = vadd.f32 %v3260_v42, %v2641_v31  ;;  %6011 = vmatmul.msk.bf16.gmra.mxu1 %vm1589_vm12, %v4498_v51  ;;  %v4797_v31 = vsel %vm6735_vm11, %v4795_v12, %v4796_v23  ;;  %v4183_v51 = vsel %vm6803_vm15, %v4178_v55, %v4182_v56  ;;  %v4210_v35 = vrot.slane %v4208_v50, 4 }
 0x2fc   : > { %6056 = vmatmul.msk.bf16.gmra.mxu2 %vm1589_vm12, %v4909_v32  ;;  %v4472_v32 = vunpack.c.l.b16 %v4193_v17  ;;  %v4884_v3 = vunpack.c.l.b16 %v4797_v31  ;;  %v4471_v53 = vunpack.c.l.b16 %v4183_v51  ;;  %v4197_v56 = vrot.slane %v4195_v6, 4  ;;  %v4046_v31 = vld [vmem:[#allocation2 + $0x68] sm:$0x1]  ;;  %v4698_v6 = vld [vmem:[#allocation2 + $0x60] sm:$0xe] }
 0x2fd   : > { %v7825_v47 = vadd.f32 %v3670_v63, %v3307_v15  ;;  %v4204_v15 = vshll.u32 %v4042_v1, 16  ;;  %v4200_v55 = vrot.slane %v4198_v33, 5  ;;  %v4803_v33 = vrot.slane %v4046_v31, 5 }
 0x2ff   : > { %8183 = vst [vmem:[#allocation21_spill] sm:$0xff] %v7825_v47  ;;  %v3265_v42 = vpop.f32.mrf.mxu2  ;;  %v4206_v49 = vrot.slane %v4204_v15, 5  ;;  %v4201_v50 = vor.u32 %v4200_v55, %v4197_v56  ;;  %v4219_v56 = vshrl.u32 %v4044_v5, 16 }
 0x300   : > { %v2596_v8 = vpop.f32.mrf.mxu1 }
 0x301   : > { %v7827_v0 = vpop.f32.mrf.mxu3  ;;  %v2642_v7 = vadd.f32 %v2596_v8, %v7440_v30  ;;  %v4794_v30 = vsel %vm6735_vm11, %v6029_v21, %v4793_v54  ;;  %v4211_v17 = vor.u32 %v4210_v35, %v4206_v49  ;;  %v4800_v54 = vrot.slane %v4045_v29, 5 }
 0x302   : > { %v4883_v8 = vunpack.c.l.b16 %v4794_v30  ;;  %v4202_v35 = vrot.slane %v4201_v50, 4 }
 0x303   : > { %v7832_v63 = vadd.f32 %v3262_v46, %v2642_v7  ;;  %v4499_v7 = vpack.c.b16 %v4472_v32, %v4471_v53  ;;  %v4212_v21 = vrot.slane %v4211_v17, 4  ;;  %v4802_v51 = vrot.slane %v4800_v54, 4 }
 0x304   : > { %v4910_v23 = vpack.c.b16 %v4884_v3, %v4883_v8  ;;  %v4216_v32 = vrot.slane %v4214_v24, 5  ;;  %v6030_v8 = vrot.slane %v4698_v6, 9  ;;  %v4222_v17 = vshll.u32 %v4044_v5, 16 }
 0x305   : > { %v4238_v5 = vshll.u32 %v4046_v31, 16  ;;  %v4047_v31 = vld [vmem:[#allocation2 + $0x6c] sm:$0xf] }
 0x306   : > { %v4217_v53 = vsel %vm6803_vm15, %v4212_v21, %v4216_v32  ;;  %v4048_v32 = vld [vmem:[#allocation2 + $0x70] sm:$0xf] }
 0x307   : > { %v3267_v12 = vpop.f32.mrf.mxu2 }
 0x308   : > { %v2599_v1 = vpop.f32.mrf.mxu1 }
 0x309   : > { %v3675_v46 = vpop.f32.mrf.mxu3  ;;  %v2643_v13 = vadd.f32 %v2599_v1, %v7452_v37  ;;  %v4232_v1 = vshrl.u32 %v4045_v29, 16 }
 0x30b   : > { %v3309_v47 = vadd.f32 %v3265_v42, %v2643_v13  ;;  %6012 = vmatmul.msk.bf16.gmra.mxu1 %vm1589_vm12, %v4499_v7  ;;  %v4804_v13 = vsel %vm6735_vm11, %v4802_v51, %v4803_v33  ;;  %v4207_v7 = vsel %vm6803_vm15, %v4202_v35, %v4206_v49  ;;  %v4234_v50 = vrot.slane %v4232_v1, 4 }
 0x30c   : > { %6057 = vmatmul.msk.bf16.gmra.mxu2 %vm1589_vm12, %v4910_v23  ;;  %v4474_v23 = vunpack.c.l.b16 %v4217_v53  ;;  %v4886_v55 = vunpack.c.l.b16 %v4804_v13  ;;  %v4473_v21 = vunpack.c.l.b16 %v4207_v7  ;;  %v4221_v49 = vrot.slane %v4219_v56, 4  ;;  %v4049_v13 = vld [vmem:[#allocation2 + $0x74] sm:$0x1]  ;;  %v4699_v56 = vld [vmem:[#allocation2 + $0x6c] sm:$0xe] }
 0x30d   : > { %v7843_v15 = vadd.f32 %v3675_v46, %v3309_v47  ;;  %v4228_v47 = vshll.u32 %v4045_v29, 16  ;;  %v4224_v35 = vrot.slane %v4222_v17, 5  ;;  %v4810_v17 = vrot.slane %v4049_v13, 5 }
 0x30f   : > { %8184 = vst [vmem:[#allocation22_spill] sm:$0xff] %v7843_v15  ;;  %v3270_v42 = vpop.f32.mrf.mxu2  ;;  %v4230_v24 = vrot.slane %v4228_v47, 5  ;;  %v4225_v1 = vor.u32 %v4224_v35, %v4221_v49  ;;  %v4243_v49 = vshrl.u32 %v4047_v31, 16 }
 0x310   : > { %v2601_v37 = vpop.f32.mrf.mxu1 }
 0x311   : > { %v7845_v30 = vpop.f32.mrf.mxu3  ;;  %v2644_v3 = vadd.f32 %v2601_v37, %v7467_v58  ;;  %v4801_v58 = vsel %vm6735_vm11, %v6030_v8, %v4800_v54  ;;  %v4235_v53 = vor.u32 %v4234_v50, %v4230_v24  ;;  %v4807_v54 = vrot.slane %v4048_v32, 5 }
 0x312   : > { %v4885_v37 = vunpack.c.l.b16 %v4801_v58  ;;  %v4226_v50 = vrot.slane %v4225_v1, 4 }
 0x313   : > { %v7850_v46 = vadd.f32 %v3267_v12, %v2644_v3  ;;  %v4500_v3 = vpack.c.b16 %v4474_v23, %v4473_v21  ;;  %v4236_v8 = vrot.slane %v4235_v53, 4  ;;  %v4809_v7 = vrot.slane %v4807_v54, 4 }
 0x314   : > { %v4911_v33 = vpack.c.b16 %v4886_v55, %v4885_v37  ;;  %v4240_v23 = vrot.slane %v4238_v5, 5  ;;  %v6031_v37 = vrot.slane %v4699_v56, 9  ;;  %v4246_v53 = vshll.u32 %v4047_v31, 16 }
 0x315   : > { %v4262_v31 = vshll.u32 %v4049_v13, 16  ;;  %v4050_v13 = vld [vmem:[#allocation2 + $0x78] sm:$0xf] }
 0x316   : > { %v4241_v21 = vsel %vm6803_vm15, %v4236_v8, %v4240_v23  ;;  %v4051_v23 = vld [vmem:[#allocation2 + $0x7c] sm:$0xf] }
 0x317   : > { %v3272_v51 = vpop.f32.mrf.mxu2 }
 0x318   : > { %v2604_v29 = vpop.f32.mrf.mxu1 }
 0x319   : > { %v3680_v12 = vpop.f32.mrf.mxu3  ;;  %v2645_v6 = vadd.f32 %v2604_v29, %v7479_v39  ;;  %v4256_v29 = vshrl.u32 %v4048_v32, 16 }
 0x31b   : > { %v3311_v15 = vadd.f32 %v3270_v42, %v2645_v6  ;;  %6013 = vmatmul.msk.bf16.gmra.mxu1 %vm1589_vm12, %v4500_v3  ;;  %v4811_v6 = vsel %vm6735_vm11, %v4809_v7, %v4810_v17  ;;  %v4231_v3 = vsel %vm6803_vm15, %v4226_v50, %v4230_v24  ;;  %v4258_v1 = vrot.slane %v4256_v29, 4 }
 0x31c   : > { %6058 = vmatmul.msk.bf16.gmra.mxu2 %vm1589_vm12, %v4911_v33  ;;  %v4476_v33 = vunpack.c.l.b16 %v4241_v21  ;;  %v4888_v35 = vunpack.c.l.b16 %v4811_v6  ;;  %v4475_v8 = vunpack.c.l.b16 %v4231_v3  ;;  %v4245_v24 = vrot.slane %v4243_v49, 4  ;;  %v4052_v6 = vld [vmem:[#allocation2 + $0x80] sm:$0x1] }
 0x31d   : > { %v7861_v47 = vadd.f32 %v3680_v12, %v3311_v15  ;;  %v4252_v15 = vshll.u32 %v4048_v32, 16  ;;  %v4248_v50 = vrot.slane %v4246_v53, 5  ;;  %v4817_v53 = vrot.slane %v4052_v6, 5 }
 0x31f   : > { %8185 = vst [vmem:[#allocation23_spill] sm:$0xff] %v7861_v47  ;;  %v3275_v42 = vpop.f32.mrf.mxu2  ;;  %v4254_v5 = vrot.slane %v4252_v15, 5  ;;  %v4249_v29 = vor.u32 %v4248_v50, %v4245_v24  ;;  %v4267_v24 = vshrl.u32 %v4050_v13, 16 }
 0x320   : > { %v2606_v39 = vpop.f32.mrf.mxu1 }
 0x321   : > { %v7863_v58 = vpop.f32.mrf.mxu3  ;;  %v2646_v55 = vadd.f32 %v2606_v39, %v7494_v18  ;;  %v4808_v18 = vsel %vm6735_vm11, %v6031_v37, %v4807_v54  ;;  %v4259_v21 = vor.u32 %v4258_v1, %v4254_v5  ;;  %v4814_v54 = vrot.slane %v4051_v23, 5 }
 0x322   : > { %v4887_v39 = vunpack.c.l.b16 %v4808_v18  ;;  %v4264_v18 = vrot.slane %v4262_v31, 5  ;;  %v4250_v1 = vrot.slane %v4249_v29, 4 }
 0x323   : > { %v7868_v12 = vadd.f32 %v3272_v51, %v2646_v55  ;;  %v4501_v55 = vpack.c.b16 %v4476_v33, %v4475_v8  ;;  %v4260_v37 = vrot.slane %v4259_v21, 4  ;;  %v4816_v3 = vrot.slane %v4814_v54, 4  ;;  %v4700_v33 = vld [vmem:[#allocation2 + $0x78] sm:$0xe] }
 0x324   : > { %v4912_v17 = vpack.c.b16 %v4888_v35, %v4887_v39  ;;  %v6032_v39 = vrot.slane %v4700_v33, 9  ;;  %v4270_v21 = vshll.u32 %v4050_v13, 16  ;;  %v4286_v13 = vshll.u32 %v4052_v6, 16 }
 0x325   : > { %v4265_v8 = vsel %vm6803_vm15, %v4260_v37, %v4264_v18 }
 0x327   : > { %v3277_v7 = vpop.f32.mrf.mxu2 }
 0x328   : > { %v2609_v32 = vpop.f32.mrf.mxu1 }
 0x329   : > { %v3685_v51 = vpop.f32.mrf.mxu3  ;;  %v2647_v56 = vadd.f32 %v2609_v32, %v7511_v36  ;;  %v4280_v32 = vshrl.u32 %v4051_v23, 16 }
 0x32b   : > { %v3313_v47 = vadd.f32 %v3275_v42, %v2647_v56  ;;  %6014 = vmatmul.msk.bf16.gmra.mxu1 %vm1589_vm12, %v4501_v55  ;;  %v4818_v56 = vsel %vm6735_vm11, %v4816_v3, %v4817_v53  ;;  %v4478_v55 = vunpack.c.l.b16 %v4265_v8  ;;  %v4282_v29 = vrot.slane %v4280_v32, 4 }
 0x32c   : > { %6059 = vmatmul.msk.bf16.gmra.mxu2 %vm1589_vm12, %v4912_v17  ;;  %v4815_v17 = vsel %vm6735_vm11, %v6032_v39, %v4814_v54  ;;  %v4890_v50 = vunpack.c.l.b16 %v4818_v56  ;;  %v4269_v53 = vrot.slane %v4267_v24, 4 }
 0x32d   : > { %v7879_v15 = vadd.f32 %v3685_v51, %v3313_v47  ;;  %v4276_v47 = vshll.u32 %v4051_v23, 16 }
 0x32f   : > { %v3280_v35 = vpop.f32.mrf.mxu2  ;;  %v4278_v31 = vrot.slane %v4276_v47, 5 }
 0x330   : > { %v2611_v36 = vpop.f32.mrf.mxu1 }
 0x331   : > { %v2648_v49 = vadd.f32 %v2611_v36, %v7530_v4  ;;  %v7882_v42 = vpop.f32.mrf.mxu3  ;;  %v4255_v4 = vsel %vm6803_vm15, %v4250_v1, %v4254_v5  ;;  %v4054_v36 = vld [vmem:[#allocation2 + $0x88] sm:$0xf]  ;;  %v4272_v5 = vrot.slane %v4270_v21, 5  ;;  %v4283_v1 = vor.u32 %v4282_v29, %v4278_v31 }
 0x332   : > { %v4477_v37 = vunpack.c.l.b16 %v4255_v4  ;;  %v4821_v54 = vrot.slane %v4054_v36, 5  ;;  %v4055_v4 = vld [vmem:[#allocation2 + $0x8c] sm:$0x1]  ;;  %v4304_v6 = vshrl.u32 %v4054_v36, 16 }
 0x333   : > { %v7886_v51 = vadd.f32 %v3277_v7, %v2648_v49  ;;  %v4889_v7 = vunpack.c.l.b16 %v4815_v17  ;;  %v4273_v32 = vor.u32 %v4272_v5, %v4269_v53  ;;  %v4284_v56 = vrot.slane %v4283_v1, 4 }
 0x334   : > { %v4502_v3 = vpack.c.b16 %v4478_v55, %v4477_v37  ;;  %v4288_v55 = vrot.slane %v4286_v13, 5 }
 0x335   : > { %v4913_v49 = vpack.c.b16 %v4890_v50, %v4889_v7  ;;  %v4701_v50 = vld [vmem:[#allocation2 + $0x84] sm:$0xe]  ;;  %v4274_v29 = vrot.slane %v4273_v32, 4  ;;  %v4300_v7 = vshll.u32 %v4054_v36, 16  ;;  %v4306_v32 = vrot.slane %v4304_v6, 4 }
 0x336   : > { %v4289_v37 = vsel %vm6803_vm15, %v4284_v56, %v4288_v55  ;;  %v4058_v6 = vld [vmem:[#allocation2 + $0x98] sm:$0x1] }
 0x337   : > { %v3282_v33 = vpop.f32.mrf.mxu2  ;;  %v4279_v53 = vsel %vm6803_vm15, %v4274_v29, %v4278_v31  ;;  %v4480_v5 = vunpack.c.l.b16 %v4289_v37  ;;  %v4302_v13 = vrot.slane %v4300_v7, 5  ;;  %v3994_v31 = vadd.f32 %v7614_v9, %v7572_v16 }
 0x338   : > { %v2614_v23 = vpop.f32.mrf.mxu1  ;;  %v4479_v56 = vunpack.c.l.b16 %v4279_v53  ;;  %v4310_v29 = vshll.u32 %v4055_v4, 16  ;;  %v4831_v9 = vrot.slane %v4058_v6, 5 }
 0x339   : > { %v2649_v18 = vadd.f32 %v2614_v23, %v7546_v11  ;;  %v3690_v39 = vpop.f32.mrf.mxu3  ;;  %v4823_v11 = vrot.slane %v4821_v54, 4  ;;  %v4053_v23 = vld [vmem:[#allocation2 + $0x84] sm:$0xf] }
 0x33a   : > { %v4291_v1 = vshrl.u32 %v4053_v23, 16  ;;  %v4503_v55 = vpack.c.b16 %v4480_v5, %v4479_v56  ;;  %v4312_v5 = vrot.slane %v4310_v29, 5 }
 0x33b   : > { %v3315_v8 = vadd.f32 %v3280_v35, %v2649_v18  ;;  %6015 = vmatmul.msk.bf16.gmra.mxu1 %vm1589_vm12, %v4502_v3  ;;  %v4824_v35 = vrot.slane %v4055_v4, 5  ;;  %v6033_v3 = vrot.slane %v4701_v50, 9 }
 0x33c   : > { %6060 = vmatmul.msk.bf16.gmra.mxu2 %vm1589_vm12, %v4913_v49 }
 0x33d   : > { %v7897_v47 = vadd.f32 %v3690_v39, %v3315_v8  ;;  %v4825_v49 = vsel %vm6735_vm11, %v4823_v11, %v4824_v35  ;;  %v4294_v39 = vshll.u32 %v4053_v23, 16  ;;  %v4293_v11 = vrot.slane %v4291_v1, 4 }
 0x33e   : > { %v4892_v8 = vunpack.c.l.b16 %v4825_v49 }
 0x33f   : > { %v4990_v21 = vpop.f32.mrf.mxu2  ;;  %v4296_v35 = vrot.slane %v4294_v39, 5  ;;  %v4056_v39 = vld [vmem:[#allocation2 + $0x90] sm:$0xf] }
 0x340   : > { %v2616_v17 = vpop.f32.mrf.mxu1  ;;  %v4318_v29 = vshll.u32 %v4056_v39, 16 }
 0x341   : > { %v2650_v24 = vadd.f32 %v2616_v17, %v7558_v14  ;;  %v4822_v14 = vsel %vm6735_vm11, %v6033_v3, %v4821_v54  ;;  %v4057_v17 = vld [vmem:[#allocation2 + $0x94] sm:$0xf]  ;;  %v4297_v23 = vor.u32 %v4296_v35, %v4293_v11  ;;  %v3995_v3 = vadd.f32 %v7633_v34, %v7585_v19 }
 0x342   : > { %v4828_v54 = vrot.slane %v4057_v17, 5  ;;  %v4324_v56 = vshll.u32 %v4057_v17, 16 }
 0x343   : > { %v7902_v18 = vadd.f32 %v3282_v33, %v2650_v24  ;;  %v4891_v33 = vunpack.c.l.b16 %v4822_v14  ;;  %v4702_v14 = vld [vmem:[#allocation2 + $0x90] sm:$0xe] }
 0x344   : > { %v4830_v49 = vrot.slane %v4828_v54, 4 }
 0x345   : > { %8186 = vst [vmem:[#allocation24_spill] sm:$0xff] %v7902_v18  ;;  %v4914_v24 = vpack.c.b16 %v4892_v8, %v4891_v33  ;;  %v4307_v18 = vor.u32 %v4306_v32, %v4302_v13  ;;  %v4298_v32 = vrot.slane %v4297_v23, 4  ;;  %v6034_v33 = vrot.slane %v4702_v14, 9 }
 0x346   : > { %v4832_v19 = vsel %vm6735_vm11, %v4830_v49, %v4831_v9 }
 0x347   : > { %v4992_v50 = vpop.f32.mrf.mxu2  ;;  %v4308_v7 = vrot.slane %v4307_v18, 4  ;;  %v4303_v34 = vsel %vm6803_vm15, %v4298_v32, %v4302_v13  ;;  %v4829_v35 = vsel %vm6735_vm11, %v6034_v33, %v4828_v54  ;;  %v3996_v54 = vadd.f32 %v7649_v25, %v7595_v27 }
 0x348   : > { %v4580_v36 = vpop.f32.mrf.mxu1  ;;  %v4893_v49 = vunpack.c.l.b16 %v4829_v35  ;;  %v4334_v32 = vshll.u32 %v4058_v6, 16  ;;  %v3997_v33 = vadd.f32 %v7665_v38, %v7608_v40  ;;  %v4059_v35 = vld [vmem:[#allocation2 + $0x9c] sm:$0xf] }
 0x349   : > { %v4660_v37 = vadd.f32 %v4580_v36, %v3994_v31  ;;  %v4313_v4 = vsel %vm6803_vm15, %v4308_v7, %v4312_v5  ;;  %v4328_v36 = vshrl.u32 %v4057_v17, 16  ;;  %v4894_v31 = vunpack.c.l.b16 %v4832_v19  ;;  %v7924_v7 = vpop.f32.mrf.mxu0 }
 0x34a   : > { %v4482_v11 = vunpack.c.l.b16 %v4313_v4 }
 0x34b   : > { %6016 = vmatmul.msk.bf16.gmra.mxu1 %vm1589_vm12, %v4503_v55  ;;  %v5070_v1 = vadd.f32 %v4990_v21, %v4660_v37  ;;  %v4315_v55 = vshrl.u32 %v4056_v39, 16  ;;  %v4326_v37 = vrot.slane %v4324_v56, 5  ;;  %v4330_v23 = vrot.slane %v4328_v36, 4 }
 0x34c   : > { %6061 = vmatmul.msk.bf16.gmra.mxu2 %vm1589_vm12, %v4914_v24  ;;  %v4915_v14 = vpack.c.b16 %v4894_v31, %v4893_v49 }
 0x34d   : > { %v5102_v21 = vmax.f32 %v5070_v1, 0.0  ;;  %v4317_v1 = vrot.slane %v4315_v55, 4  ;;  %v4331_v9 = vor.u32 %v4330_v23, %v4326_v37  ;;  %v4336_v55 = vrot.slane %v4334_v32, 5 }
 0x34f   : > { %v4995_v16 = vpop.f32.mrf.mxu2  ;;  %v4332_v36 = vrot.slane %v4331_v9, 4  ;;  %v4342_v9 = vshll.u32 %v4059_v35, 16 }
 0x350   : > { %v4582_v53 = vpop.f32.mrf.mxu1 }
 0x351   : > { %v4661_v8 = vadd.f32 %v4582_v53, %v3995_v3  ;;  %v4060_v53 = vld [vmem:[#allocation2 + $0xa0] sm:$0xf]  ;;  %v7933_v31 = vpop.f32.mrf.mxu0  ;;  %v4337_v6 = vsel %vm6803_vm15, %v4332_v36, %v4336_v55  ;;  %v4063_v36 = vld [vmem:[#allocation2 + $0xac] sm:$0xf]  ;;  %v4344_v55 = vrot.slane %v4342_v9, 5 }
 0x352   : > { %v4835_v39 = vrot.slane %v4060_v53, 5  ;;  %v4348_v23 = vshll.u32 %v4060_v53, 16  ;;  %v4376_v9 = vshrl.u32 %v4063_v36, 16 }
 0x353   : > { %v5071_v18 = vadd.f32 %v4992_v50, %v4661_v8  ;;  %v4481_v50 = vunpack.c.l.b16 %v4303_v34  ;;  %v4320_v8 = vrot.slane %v4318_v29, 5 }
 0x354   : > { %v4837_v19 = vrot.slane %v4835_v39, 4 }
 0x355   : > { %v5103_v24 = vmax.f32 %v5071_v18, 0.0  ;;  %v4504_v13 = vpack.c.b16 %v4482_v11, %v4481_v50  ;;  %v4321_v56 = vor.u32 %v4320_v8, %v4317_v1  ;;  %v4061_v18 = vld [vmem:[#allocation2 + $0xa4] sm:$0x1] }
 0x356   : > { %v4838_v25 = vrot.slane %v4061_v18, 5 }
 0x357   : > { %v5134_v17 = vpack.c.bf16 %v5103_v24, %v5102_v21  ;;  %v4997_v5 = vpop.f32.mrf.mxu2  ;;  %v4703_v21 = vld [vmem:[#allocation2 + $0x9c] sm:$0xe]  ;;  %v4322_v29 = vrot.slane %v4321_v56, 4 }
 0x358   : > { %v4585_v3 = vpop.f32.mrf.mxu1  ;;  %v4839_v40 = vsel %vm6735_vm11, %v4837_v19, %v4838_v25  ;;  %v4358_v25 = vshll.u32 %v4061_v18, 16 }
 0x359   : > { %6076 = vmatmul.msk.bf16.vlgmr.msra.gmra.mxu3 %vm1589_vm12, %v5134_v17  ;;  %v4662_v4 = vadd.f32 %v4585_v3, %v3996_v54  ;;  %v4352_v17 = vshrl.u32 %v4060_v53, 16  ;;  %v6035_v3 = vrot.slane %v4703_v21, 9  ;;  %v4327_v38 = vsel %vm6803_vm15, %v4322_v29, %v4326_v37 }
 0x35a   : > { %v4896_v8 = vunpack.c.l.b16 %v4839_v40  ;;  %v4350_v54 = vrot.slane %v4348_v23, 5  ;;  %v4064_v23 = vld [vmem:[#allocation2 + $0xb0] sm:$0x1] }
 0x35b   : > { %6017 = vmatmul.msk.bf16.gmra.mxu1 %vm1589_vm12, %v4504_v13  ;;  %v5072_v24 = vadd.f32 %v4995_v16, %v4662_v4  ;;  %v4339_v16 = vshrl.u32 %v4059_v35, 16  ;;  %v4836_v1 = vsel %vm6735_vm11, %v6035_v3, %v4835_v39  ;;  %v4354_v32 = vrot.slane %v4352_v17, 4  ;;  %v8187_v17 = vld [vmem:[#allocation7_spill] sm:$0xff] }
 0x35c   : > { %6062 = vmatmul.msk.bf16.gmra.mxu2 %vm1589_vm12, %v4915_v14  ;;  %v4484_v14 = vunpack.c.l.b16 %v4337_v6  ;;  %v4895_v56 = vunpack.c.l.b16 %v4836_v1  ;;  %v3998_v39 = vadd.f32 %v7687_v43, %v7620_v10 }
 0x35d   : > { %v5104_v49 = vmax.f32 %v5072_v24, 0.0  ;;  %v4355_v21 = vor.u32 %v4354_v32, %v4350_v54  ;;  %v4842_v24 = vrot.slane %v4063_v36, 5 }
 0x35e   : > { %v4916_v19 = vpack.c.b16 %v4896_v8, %v4895_v56  ;;  %v4372_v8 = vshll.u32 %v4063_v36, 16 }
 0x35f   : > { %v5000_v27 = vpop.f32.mrf.mxu2  ;;  %v4356_v6 = vrot.slane %v4355_v21, 4  ;;  %v4844_v3 = vrot.slane %v4842_v24, 4 }
 0x360   : > { %v4587_v34 = vpop.f32.mrf.mxu1  ;;  %v4374_v36 = vrot.slane %v4372_v8, 5  ;;  %v8189_v8 = vld [vmem:[#allocation9_spill] sm:$0xff] }
 0x361   : > { %v4663_v11 = vadd.f32 %v4587_v34, %v3997_v33  ;;  %v4341_v34 = vrot.slane %v4339_v16, 4  ;;  %v4704_v16 = vld [vmem:[#allocation2 + $0xa8] sm:$0xe] }
 0x363   : > { %v5073_v50 = vadd.f32 %v4997_v5, %v4663_v11  ;;  %v4483_v5 = vunpack.c.l.b16 %v4327_v38  ;;  %v7947_v11 = vpop.f32.mrf.mxu0  ;;  %v4345_v29 = vor.u32 %v4344_v55, %v4341_v34  ;;  %v4360_v38 = vrot.slane %v4358_v25, 5 }
 0x365   : > { %v5105_v13 = vmax.f32 %v5073_v50, 0.0  ;;  %v4505_v33 = vpack.c.b16 %v4484_v14, %v4483_v5  ;;  %v3999_v50 = vadd.f32 %v7703_v52, %v8187_v17  ;;  %v4062_v14 = vld [vmem:[#allocation2 + $0xa8] sm:$0xf]  ;;  %v4346_v1 = vrot.slane %v4345_v29, 4 }
 0x366   : > { %v4361_v18 = vsel %vm6803_vm15, %v4356_v6, %v4360_v38  ;;  %v4366_v21 = vshll.u32 %v4062_v14, 16  ;;  %v4066_v6 = vld [vmem:[#allocation2 + $0xb8] sm:$0xf] }
 0x367   : > { %v5135_v53 = vpack.c.bf16 %v5105_v13, %v5104_v49  ;;  %v5002_v37 = vpop.f32.mrf.mxu2  ;;  %v4845_v13 = vrot.slane %v4064_v23, 5  ;;  %v4351_v5 = vsel %vm6803_vm15, %v4346_v1, %v4350_v54 }
 0x368   : > { %v4590_v4 = vpop.f32.mrf.mxu1  ;;  %v4485_v25 = vunpack.c.l.b16 %v4351_v5 }
 0x369   : > { %6077 = vmatmul.msk.bf16.gmra.mxu3 %vm1589_vm12, %v5135_v53  ;;  %v4664_v35 = vadd.f32 %v4590_v4, %v3998_v39  ;;  %v6036_v53 = vrot.slane %v4704_v16, 9  ;;  %v4846_v52 = vsel %vm6735_vm11, %v4844_v3, %v4845_v13  ;;  %v4363_v4 = vshrl.u32 %v4062_v14, 16 }
 0x36a   : > { %v4898_v55 = vunpack.c.l.b16 %v4846_v52 }
 0x36b   : > { %6018 = vmatmul.msk.bf16.gmra.mxu1 %vm1589_vm12, %v4505_v33  ;;  %v5074_v10 = vadd.f32 %v5000_v27, %v4664_v35  ;;  %v4486_v33 = vunpack.c.l.b16 %v4361_v18  ;;  %v7960_v34 = vpop.f32.mrf.mxu0  ;;  %v4365_v3 = vrot.slane %v4363_v4, 4  ;;  %v4067_v18 = vld [vmem:[#allocation2 + $0xbc] sm:$0x1]  ;;  %v4705_v4 = vld [vmem:[#allocation2 + $0xb4] sm:$0xe] }
 0x36c   : > { %6063 = vmatmul.msk.bf16.gmra.mxu2 %vm1589_vm12, %v4916_v19  ;;  %v4843_v19 = vsel %vm6735_vm11, %v6036_v53, %v4842_v24  ;;  %v8188_v24 = vld [vmem:[#allocation8_spill] sm:$0xff] }
 0x36d   : > { %v5106_v27 = vmax.f32 %v5074_v10, 0.0  ;;  %v4897_v29 = vunpack.c.l.b16 %v4843_v19  ;;  %v4506_v54 = vpack.c.b16 %v4486_v33, %v4485_v25  ;;  %v4000_v16 = vadd.f32 %v7723_v2, %v8188_v24  ;;  %v4065_v25 = vld [vmem:[#allocation2 + $0xb4] sm:$0xf] }
 0x36e   : > { %v4849_v10 = vrot.slane %v4066_v6, 5  ;;  %v4396_v2 = vshll.u32 %v4066_v6, 16 }
 0x36f   : > { %v5005_v49 = vpop.f32.mrf.mxu2 }
 0x370   : > { %v4592_v40 = vpop.f32.mrf.mxu1 }
 0x371   : > { %v4665_v43 = vadd.f32 %v4592_v40, %v3999_v50  ;;  %v4917_v50 = vpack.c.b16 %v4898_v55, %v4897_v29  ;;  %v4368_v40 = vrot.slane %v4366_v21, 5  ;;  %v4852_v55 = vrot.slane %v4067_v18, 5 }
 0x372   : > { %v7977_v29 = vrot.slane %v4396_v2, 5  ;;  %v8191_v2 = vld [vmem:[#allocation11_spill] sm:$0xff] }
 0x373   : > { %v5075_v32 = vadd.f32 %v5002_v37, %v4665_v43  ;;  %v4378_v37 = vrot.slane %v4376_v9, 4  ;;  %v4382_v43 = vshll.u32 %v4064_v23, 16  ;;  %v4369_v14 = vor.u32 %v4368_v40, %v4365_v3  ;;  %v7969_v53 = vpop.f32.mrf.mxu0 }
 0x374   : > { %v4001_v9 = vadd.f32 %v7737_v59, %v8189_v8 }
 0x375   : > { %v5107_v56 = vmax.f32 %v5075_v32, 0.0  ;;  %v4379_v38 = vor.u32 %v4378_v37, %v4374_v36  ;;  %v4851_v32 = vrot.slane %v4849_v10, 4  ;;  %v4384_v5 = vrot.slane %v4382_v43, 5 }
 0x376   : > { %v4370_v23 = vrot.slane %v4369_v14, 4 }
 0x377   : > { %v5136_v39 = vpack.c.bf16 %v5107_v56, %v5106_v27  ;;  %v5007_v17 = vpop.f32.mrf.mxu2  ;;  %v4380_v1 = vrot.slane %v4379_v38, 4  ;;  %v4400_v27 = vshrl.u32 %v4066_v6, 16  ;;  %v4853_v59 = vsel %vm6735_vm11, %v4851_v32, %v4852_v55 }
 0x378   : > { %v4595_v35 = vpop.f32.mrf.mxu1  ;;  %v4900_v40 = vunpack.c.l.b16 %v4853_v59  ;;  %v4387_v38 = vshrl.u32 %v4065_v25, 16 }
 0x379   : > { %6078 = vmatmul.msk.bf16.gmra.mxu3 %vm1589_vm12, %v5136_v39  ;;  %v4666_v13 = vadd.f32 %v4595_v35, %v4000_v16  ;;  %v4385_v21 = vsel %vm6803_vm15, %v4380_v1, %v4384_v5  ;;  %v6037_v39 = vrot.slane %v4705_v4, 9  ;;  %v4375_v35 = vsel %vm6803_vm15, %v4370_v23, %v4374_v36  ;;  %v8190_v4 = vld [vmem:[#allocation12_spill] sm:$0xff] }
 0x37a   : > { %v4402_v6 = vrot.slane %v4400_v27, 4  ;;  %v4487_v16 = vunpack.c.l.b16 %v4375_v35  ;;  %v4389_v32 = vrot.slane %v4387_v38, 4  ;;  %v4406_v5 = vshll.u32 %v4067_v18, 16  ;;  %v4068_v35 = vld [vmem:[#allocation2 + $0xc0] sm:$0xf] }
 0x37b   : > { %6019 = vmatmul.msk.bf16.gmra.mxu1 %vm1589_vm12, %v4506_v54  ;;  %v5076_v56 = vadd.f32 %v5005_v49, %v4666_v13  ;;  %v4850_v3 = vsel %vm6735_vm11, %v6037_v39, %v4849_v10  ;;  %v7983_v8 = vpop.f32.mrf.mxu0  ;;  %v4069_v10 = vld [vmem:[#allocation2 + $0xc4] sm:$0xf]  ;;  %v3704_v27 = vadd.f32 %v8191_v2, %v8190_v4 }
 0x37c   : > { %6064 = vmatmul.msk.bf16.gmra.mxu2 %vm1589_vm12, %v4917_v50  ;;  %v4488_v50 = vunpack.c.l.b16 %v4385_v21  ;;  %v4899_v13 = vunpack.c.l.b16 %v4850_v3  ;;  %v4403_v14 = vor.u32 %v4402_v6, %v7977_v29  ;;  %v4856_v55 = vrot.slane %v4069_v10, 5  ;;  %v4070_v21 = vld [vmem:[#allocation2 + $0xc8] sm:$0x1] }
 0x37d   : > { %v5108_v49 = vmax.f32 %v5076_v56, 0.0  ;;  %v8192_v56 = vld [vmem:[#allocation10_spill] sm:$0xff]  ;;  %v4003_v18 = vadd.f32 %v7933_v31, %v3704_v27 }
 0x37e   : > { %v4507_v36 = vpack.c.b16 %v4488_v50, %v4487_v16  ;;  %v4404_v23 = vrot.slane %v4403_v14, 4 }
 0x37f   : > { %v5010_v19 = vpop.f32.mrf.mxu2 }
 0x380   : > { %v4597_v52 = vpop.f32.mrf.mxu1 }
 0x381   : > { %v4667_v33 = vadd.f32 %v4597_v52, %v4001_v9  ;;  %v4918_v9 = vpack.c.b16 %v4900_v40, %v4899_v13  ;;  %v4420_v13 = vshll.u32 %v4069_v10, 16 }
 0x383   : > { %v5077_v37 = vadd.f32 %v5007_v17, %v4667_v33  ;;  %v4390_v17 = vshll.u32 %v4065_v25, 16  ;;  %v4002_v33 = vadd.f32 %v7924_v7, %v8192_v56  ;;  %v4408_v25 = vrot.slane %v4406_v5, 5 }
 0x385   : > { %v5109_v54 = vmax.f32 %v5077_v37, 0.0  ;;  %v4392_v52 = vrot.slane %v4390_v17, 5  ;;  %v4706_v37 = vld [vmem:[#allocation2 + $0xc0] sm:$0xe]  ;;  %v4409_v7 = vsel %vm6803_vm15, %v4404_v23, %v4408_v25  ;;  %v4411_v17 = vshrl.u32 %v4068_v35, 16 }
 0x386   : > { %v6038_v6 = vrot.slane %v4706_v37, 9  ;;  %v581_v23 = vld [vmem:[#allocation2 + $0xd4] sm:$0x1]  ;;  %v4072_v25 = vld [vmem:[#allocation2 + $0xd0] sm:$0xf] }
 0x387   : > { %v5137_v24 = vpack.c.bf16 %v5109_v54, %v5108_v49  ;;  %v5012_v1 = vpop.f32.mrf.mxu2  ;;  %v4393_v59 = vor.u32 %v4392_v52, %v4389_v32  ;;  %v4858_v49 = vrot.slane %v4856_v55, 4  ;;  %v4859_v54 = vrot.slane %v4070_v21, 5 }
 0x388   : > { %v4600_v43 = vpop.f32.mrf.mxu1  ;;  %v4490_v32 = vunpack.c.l.b16 %v4409_v7  ;;  %v4413_v4 = vrot.slane %v4411_v17, 4  ;;  %v3706_v7 = vadd.f32 %v7709_v60, %v7715_v26  ;;  %v4444_v60 = vshll.u32 %v4072_v25, 16 }
 0x389   : > { %6079 = vmatmul.msk.bf16.gmra.mxu3 %vm1589_vm12, %v5137_v24  ;;  %v4668_v39 = vadd.f32 %v4600_v43, %v4002_v33  ;;  %v4414_v24 = vshll.u32 %v4068_v35, 16  ;;  %v4394_v16 = vrot.slane %v4393_v59, 4  ;;  %v4424_v43 = vshrl.u32 %v4069_v10, 16 }
 0x38a   : > { %v4860_v31 = vsel %vm6735_vm11, %v4858_v49, %v4859_v54  ;;  %v582_v59 = vsel %vm6666_vm4, 0, %v581_v23  ;;  %v4446_v23 = vrot.slane %v4444_v60, 5 }
 0x38b   : > { %6020 = vmatmul.msk.bf16.gmra.mxu1 %vm1589_vm12, %v4507_v36  ;;  %v5078_v3 = vadd.f32 %v5010_v19, %v4668_v39  ;;  %v4857_v36 = vsel %vm6735_vm11, %v6038_v6, %v4856_v55  ;;  %v4399_v19 = vsel %vm6803_vm15, %v4394_v16, %v7977_v29  ;;  %v4416_v2 = vrot.slane %v4414_v24, 5  ;;  %583 = vst [vmem:[#allocation2 + $0xd4] sm:$0x1] %v582_v59  ;;  %v4071_v16 = vld [vmem:[#allocation2 + $0xcc] sm:$0xf] }
 0x38c   : > { %6065 = vmatmul.msk.bf16.gmra.mxu2 %vm1589_vm12, %v4918_v9  ;;  %v7998_v9 = vpop.f32.mrf.mxu0  ;;  %v4901_v27 = vunpack.c.l.b16 %v4857_v36  ;;  %v4902_v10 = vunpack.c.l.b16 %v4860_v31  ;;  %v4426_v56 = vrot.slane %v4424_v43, 4  ;;  %v4489_v55 = vunpack.c.l.b16 %v4399_v19 }
 0x38d   : > { %v5110_v52 = vmax.f32 %v5078_v3, 0.0  ;;  %v4417_v49 = vor.u32 %v4416_v2, %v4413_v4  ;;  %v4004_v3 = vadd.f32 %v7947_v11, %v7705_v41  ;;  %v4435_v11 = vshrl.u32 %v4071_v16, 16 }
 0x38e   : > { %v4508_v29 = vpack.c.b16 %v4490_v32, %v4489_v55  ;;  %v4919_v6 = vpack.c.b16 %v4902_v10, %v4901_v27  ;;  %v4438_v32 = vshll.u32 %v4071_v16, 16  ;;  %v8195_v16 = vld [vmem:[#allocation13_spill] sm:$0xff] }
 0x38f   : > { %v5015_v38 = vpop.f32.mrf.mxu2  ;;  %v4418_v43 = vrot.slane %v4417_v49, 4  ;;  %v4437_v39 = vrot.slane %v4435_v11, 4 }
 0x390   : > { %v4602_v50 = vpop.f32.mrf.mxu1  ;;  %v4440_v59 = vrot.slane %v4438_v32, 5 }
 0x391   : > { %v4669_v40 = vadd.f32 %v4602_v50, %v4003_v18  ;;  %v4707_v18 = vld [vmem:[#allocation2 + $0xcc] sm:$0xe]  ;;  %v4430_v50 = vshll.u32 %v4070_v21, 16  ;;  %v4005_v21 = vadd.f32 %v7960_v34, %v3706_v7 }
 0x392   : > { %v6039_v17 = vrot.slane %v4707_v18, 9  ;;  %v4073_v19 = vld [vmem:[#allocation2 + $0xd4] sm:$0x1]  ;;  %v4441_v7 = vor.u32 %v4440_v59, %v4437_v39 }
 0x393   : > { %v5079_v14 = vadd.f32 %v5012_v1, %v4669_v40  ;;  %v4422_v1 = vrot.slane %v4420_v13, 5  ;;  %v4863_v40 = vrot.slane %v4072_v25, 5  ;;  %v4432_v36 = vrot.slane %v4430_v50, 5 }
 0x394   : > { %v8012_v13 = vpop.f32.mrf.mxu0  ;;  %v4866_v27 = vrot.slane %v4073_v19, 5 }
 0x395   : > { %v5111_v5 = vmax.f32 %v5079_v14, 0.0  ;;  %v4427_v54 = vor.u32 %v4426_v56, %v4422_v1  ;;  %v4865_v31 = vrot.slane %v4863_v40, 4  ;;  %v4864_v41 = vsel %vm6735_vm11, %v6039_v17, %v4863_v40  ;;  %v8194_v17 = vld [vmem:[#allocation14_spill] sm:$0xff] }
 0x396   : > { %v4423_v10 = vsel %vm6803_vm15, %v4418_v43, %v4422_v1  ;;  %v4903_v55 = vunpack.c.l.b16 %v4864_v41  ;;  %v4006_v43 = vadd.f32 %v7969_v53, %v8195_v16 }
 0x397   : > { %v5138_v33 = vpack.c.bf16 %v5111_v5, %v5110_v52  ;;  %v5017_v35 = vpop.f32.mrf.mxu2  ;;  %v4428_v14 = vrot.slane %v4427_v54, 4  ;;  %v4448_v52 = vshrl.u32 %v4072_v25, 16  ;;  %v4491_v18 = vunpack.c.l.b16 %v4423_v10 }
 0x398   : > { %v4605_v37 = vpop.f32.mrf.mxu1 }
 0x399   : > { %6080 = vmatmul.msk.bf16.gmra.mxu3 %vm1589_vm12, %v5138_v33  ;;  %v4670_v24 = vadd.f32 %v4605_v37, %v4004_v3  ;;  %v4433_v34 = vsel %vm6803_vm15, %v4428_v14, %v4432_v36  ;;  %v4867_v33 = vsel %vm6735_vm11, %v4865_v31, %v4866_v27  ;;  %v4450_v25 = vrot.slane %v4448_v52, 4 }
 0x39a   : > { %v4904_v37 = vunpack.c.l.b16 %v4867_v33  ;;  %v4442_v14 = vrot.slane %v4441_v7, 4 }
 0x39b   : > { %6021 = vmatmul.msk.bf16.gmra.mxu1 %vm1589_vm12, %v4508_v29  ;;  %v5080_v5 = vadd.f32 %v5015_v38, %v4670_v24  ;;  %v4451_v3 = vor.u32 %v4450_v25, %v4446_v23  ;;  %v3708_v24 = vadd.f32 %v8194_v17, %v7740_v62 }
 0x39c   : > { %6066 = vmatmul.msk.bf16.gmra.mxu2 %vm1589_vm12, %v4919_v6  ;;  %v4492_v6 = vunpack.c.l.b16 %v4433_v34  ;;  %v3954_v54 = vpop.f32.mrf.mxu0  ;;  %v4920_v50 = vpack.c.b16 %v4904_v37, %v4903_v55  ;;  %v8196_v55 = vld [vmem:[#allocation17_spill] sm:$0xff] }
 0x39d   : > { %v5112_v38 = vmax.f32 %v5080_v5, 0.0  ;;  %v4452_v36 = vrot.slane %v4451_v3, 4  ;;  %v4007_v60 = vadd.f32 %v7983_v8, %v3708_v24 }
 0x39e   : > { %v4509_v20 = vpack.c.b16 %v4492_v6, %v4491_v18 }
 0x39f   : > { %v5020_v2 = vpop.f32.mrf.mxu2 }
 0x3a0   : > { %v4607_v26 = vpop.f32.mrf.mxu1 }
 0x3a1   : > { %v4671_v4 = vadd.f32 %v4607_v26, %v4005_v21 }
 0x3a3   : > { %v5081_v56 = vadd.f32 %v5017_v35, %v4671_v4  ;;  %v4454_v35 = vshll.u32 %v4073_v19, 16  ;;  %v4447_v19 = vsel %vm6803_vm15, %v4442_v14, %v4446_v23  ;;  %v8197_v23 = vld [vmem:[#allocation16_spill] sm:$0xff] }
 0x3a4   : > { %v3956_v32 = vpop.f32.mrf.mxu0  ;;  %v4493_v5 = vunpack.c.l.b16 %v4447_v19  ;;  %v3710_v37 = vadd.f32 %v8197_v23, %v8196_v55 }
 0x3a5   : > { %v5113_v29 = vmax.f32 %v5081_v56, 0.0  ;;  %v4456_v21 = vrot.slane %v4454_v35, 5 }
 0x3a6   : > { %v4009_v25 = vadd.f32 %v8012_v13, %v3710_v37 }
 0x3a7   : > { %v5139_v49 = vpack.c.bf16 %v5113_v29, %v5112_v38  ;;  %v5022_v40 = vpop.f32.mrf.mxu2  ;;  %v4457_v62 = vsel %vm6803_vm15, %v4452_v36, %v4456_v21 }
 0x3a8   : > { %v4610_v1 = vpop.f32.mrf.mxu1  ;;  %v4494_v4 = vunpack.c.l.b16 %v4457_v62 }
 0x3a9   : > { %6081 = vmatmul.msk.bf16.gmra.mxu3 %vm1589_vm12, %v5139_v49  ;;  %v4672_v31 = vadd.f32 %v4610_v1, %v4006_v43 }
 0x3aa   : > { %v4510_v56 = vpack.c.b16 %v4494_v4, %v4493_v5  ;;  %v6240_v5 = vld [vmem:[%s6637_s20] sm:$0xff]  }
 0x3ab   : > { %6022 = vmatmul.msk.bf16.gmra.mxu1 %vm1589_vm12, %v4509_v20  ;;  %v5082_v41 = vadd.f32 %v5020_v2, %v4672_v31  ;;  %v4008_v2 = vadd.f32 %v7998_v9, %v8198_v22  ;;  %v3712_v9 = vadd.f32 %v7773_v48, %v7778_v28 }
 0x3ac   : > { %6067 = vmatmul.msk.bf16.gmra.mxu2 %vm1589_vm12, %v4920_v50  ;;  %v3959_v39 = vpop.f32.mrf.mxu0 }
 0x3ad   : > { %v5114_v27 = vmax.f32 %v5082_v41, 0.0  ;;  %v4011_v13 = vadd.f32 %v3956_v32, %v3712_v9 }
 0x3af   : > { %v5025_v53 = vpop.f32.mrf.mxu2 }
 0x3b0   : > { %v4612_v26 = vpop.f32.mrf.mxu1 }
 0x3b1   : > { %v4673_v11 = vadd.f32 %v4612_v26, %v4007_v60  ;;  %v8046_v60 = vpop.f32.mrf.mxu3 }
 0x3b3   : > { %v5083_v52 = vadd.f32 %v5022_v40, %v4673_v11  ;;  %v8199_v40 = vld [vmem:[#allocation18_spill] sm:$0xff]  ;;  %v8200_v11 = vld [vmem:[#allocation19_spill] sm:$0xff] }
 0x3b4   : > { %v3961_v7 = vpop.f32.mrf.mxu0  ;;  %v4010_v17 = vadd.f32 %v3954_v54, %v8199_v40  ;;  %v3714_v54 = vadd.f32 %v7791_v44, %v7796_v61 }
 0x3b5   : > { %v5115_v10 = vmax.f32 %v5083_v52, 0.0 }
 0x3b6   : > { %v4013_v4 = vadd.f32 %v3961_v7, %v3714_v54  ;;  %v6398_v7 = vld [vmem:[%s6637_s20 + $0x8] sm:$0xff]  }
 0x3b7   : > { %v5140_v34 = vpack.c.bf16 %v5115_v10, %v5114_v27  ;;  %v5027_v8 = vpop.f32.mrf.mxu2  ;;  %v6245_v9 = vunpack.c.l.bf16 %v6398_v7 }
 0x3b8   : > { %v4615_v33 = vpop.f32.mrf.mxu1 }
 0x3b9   : > { %6082 = vmatmul.msk.bf16.gmra.mxu3 %vm1589_vm12, %v5140_v34  ;;  %v4674_v59 = vadd.f32 %v4615_v33, %v4008_v2  ;;  %v6241_v34 = vunpack.c.l.bf16 %v6240_v5 }
 0x3bb   : > { %6023 = vmatmul.msk.bf16.gmra.mxu1 %vm1589_vm12, %v4510_v56  ;;  %v5084_v29 = vadd.f32 %v5025_v53, %v4674_v59  ;;  %v4012_v53 = vadd.f32 %v3959_v39, %v8200_v11  ;;  %v6399_v11 = vld [vmem:[%s6637_s20 + $0x10] sm:$0xff]  }
 0x3bc   : > { %v3964_v16 = vpop.f32.mrf.mxu0 }
 0x3bd   : > { %v5116_v1 = vmax.f32 %v5084_v29, 0.0  ;;  %v3716_v29 = vadd.f32 %v7809_v57, %v7816_v45 }
 0x3bf   : > { %v5030_v6 = vpop.f32.mrf.mxu2 }
 0x3c0   : > { %v4617_v38 = vpop.f32.mrf.mxu1 }
 0x3c1   : > { %v4675_v18 = vadd.f32 %v4617_v38, %v4009_v25 }
 0x3c3   : > { %v5085_v49 = vadd.f32 %v5027_v8, %v4675_v18  ;;  %v6242_v8 = vunpack.c.h.bf16 %v6240_v5  ;;  %v8201_v18 = vld [vmem:[#allocation20_spill] sm:$0xff]  ;;  %v6249_v5 = vunpack.c.l.bf16 %v6399_v11 }
 0x3c4   : > { %v3966_v28 = vpop.f32.mrf.mxu0 }
 0x3c5   : > { %v5117_v50 = vmax.f32 %v5085_v49, 0.0 }
 0x3c7   : > { %v5141_v3 = vpack.c.bf16 %v5117_v50, %v5116_v1  ;;  %v5032_v20 = vpop.f32.mrf.mxu2 }
 0x3c8   : > { %v4620_v35 = vpop.f32.mrf.mxu1 }
 0x3c9   : > { %6083 = vmatmul.msk.bf16.gmra.mxu3 %vm1589_vm12, %v5141_v3  ;;  %v4676_v24 = vadd.f32 %v4620_v35, %v4010_v17  ;;  %v4015_v3 = vadd.f32 %v3966_v28, %v3716_v29  ;;  %v6400_v29 = vld [vmem:[%s6637_s20 + $0x18] sm:$0xff]  }
 0x3cb   : > { %v5086_v14 = vadd.f32 %v5030_v6, %v4676_v24  ;;  %v4014_v6 = vadd.f32 %v3964_v16, %v8201_v18  ;;  %v6246_v24 = vunpack.c.h.bf16 %v6398_v7 }
 0x3cc   : > { %v3969_v23 = vpop.f32.mrf.mxu0 }
 0x3cd   : > { %v5118_v26 = vmax.f32 %v5086_v14, 0.0 }
 0x3cf   : > { %v5035_v21 = vpop.f32.mrf.mxu2 }
 0x3d0   : > { %v4622_v43 = vpop.f32.mrf.mxu1 }
 0x3d1   : > { %v4677_v36 = vadd.f32 %v4622_v43, %v4011_v13 }
 0x3d3   : > { %v5087_v31 = vadd.f32 %v5032_v20, %v4677_v36 }
 0x3d4   : > { %v3971_v50 = vpop.f32.mrf.mxu0 }
 0x3d5   : > { %v5119_v19 = vmax.f32 %v5087_v31, 0.0 }
 0x3d7   : > { %v5142_v62 = vpack.c.bf16 %v5119_v19, %v5118_v26  ;;  %v5037_v48 = vpop.f32.mrf.mxu2 }
 0x3d8   : > { %v4625_v41 = vpop.f32.mrf.mxu1 }
 0x3d9   : > { %6084 = vmatmul.msk.bf16.gmra.mxu3 %vm1589_vm12, %v5142_v62  ;;  %v4678_v52 = vadd.f32 %v4625_v41, %v4012_v53  ;;  %v3718_v62 = vadd.f32 %v7827_v0, %v7832_v63  ;;  %v8202_v41 = vld [vmem:[#allocation21_spill] sm:$0xff] }
 0x3db   : > { %v5088_v10 = vadd.f32 %v5035_v21, %v4678_v52  ;;  %v4017_v53 = vadd.f32 %v3971_v50, %v3718_v62 }
 0x3dc   : > { %v5223_v32 = vpop.f32.mrf.mxu3  ;;  %v3974_v31 = vpop.f32.mrf.mxu0 }
 0x3dd   : > { %v5120_v22 = vmax.f32 %v5088_v10, 0.0  ;;  %v5367_v44 = vadd.f32 %v6241_v34, %v5223_v32  ;;  %v6250_v10 = vunpack.c.h.bf16 %v6399_v11 }
 0x3df   : > { %v5040_v33 = vpop.f32.mrf.mxu2 }
 0x3e0   : > { %v4627_v27 = vpop.f32.mrf.mxu1 }
 0x3e1   : > { %v4679_v56 = vadd.f32 %v4627_v27, %v4013_v4 }
 0x3e3   : > { %v5089_v55 = vadd.f32 %v5037_v48, %v4679_v56  ;;  %v4016_v48 = vadd.f32 %v3969_v23, %v8202_v41 }
 0x3e4   : > { %v5225_v37 = vpop.f32.mrf.mxu3  ;;  %v3976_v34 = vpop.f32.mrf.mxu0 }
 0x3e5   : > { %v5121_v61 = vmax.f32 %v5089_v55, 0.0  ;;  %v5368_v2 = vadd.f32 %v6242_v8, %v5225_v37 }
 0x3e7   : > { %v5143_v39 = vpack.c.bf16 %v5121_v61, %v5120_v22  ;;  %v6306_v59 = vpack.c.bf16 %v5368_v2, %v5367_v44  ;;  %v5042_v38 = vpop.f32.mrf.mxu2  ;;  %v3720_v61 = vadd.f32 %v7845_v30, %v7850_v46  ;;  %v8203_v2 = vld [vmem:[#allocation22_spill] sm:$0xff] }
 0x3e8   : > { %v4630_v25 = vpop.f32.mrf.mxu1 }
 0x3e9   : > { %6307 = vst [vmem:[%s8056_s27] sm:$0xff] %v6306_v59   ;;  %6085 = vmatmul.msk.bf16.gmra.mxu3 %vm1589_vm12, %v5143_v39  ;;  %v4680_v1 = vadd.f32 %v4630_v25, %v4014_v6  ;;  %v4018_v39 = vadd.f32 %v3974_v31, %v8203_v2  ;;  %v4019_v18 = vadd.f32 %v3976_v34, %v3720_v61  ;;  %v6401_v31 = vld [vmem:[%s6637_s20 + $0x20] sm:$0xff]  }
 0x3eb   : > { %v5090_v20 = vadd.f32 %v5040_v33, %v4680_v1  ;;  %v6253_v1 = vunpack.c.l.bf16 %v6400_v29 }
 0x3ec   : > { %v5228_v49 = vpop.f32.mrf.mxu3  ;;  %v3979_v59 = vpop.f32.mrf.mxu0 }
 0x3ed   : > { %v5122_v14 = vmax.f32 %v5090_v20, 0.0  ;;  %v5369_v36 = vadd.f32 %v6245_v9, %v5228_v49 }
 0x3ef   : > { %v5045_v17 = vpop.f32.mrf.mxu2 }
 0x3f0   : > { %v4632_v35 = vpop.f32.mrf.mxu1 }
 0x3f1   : > { %v4681_v40 = vadd.f32 %v4632_v35, %v4015_v3  ;;  %v6254_v3 = vunpack.c.h.bf16 %v6400_v29 }
 0x3f3   : > { %v5091_v13 = vadd.f32 %v5042_v38, %v4681_v40 }
 0x3f4   : > { %v5230_v43 = vpop.f32.mrf.mxu3 }
 0x3f5   : > { %v5123_v57 = vmax.f32 %v5091_v13, 0.0  ;;  %v5370_v45 = vadd.f32 %v6246_v24, %v5230_v43 }
 0x3f7   : > { %v5144_v16 = vpack.c.bf16 %v5123_v57, %v5122_v14  ;;  %v6311_v21 = vpack.c.bf16 %v5370_v45, %v5369_v36  ;;  %v5047_v19 = vpop.f32.mrf.mxu2  ;;  %v3722_v36 = vadd.f32 %v7863_v58, %v7868_v12  ;;  %v8204_v57 = vld [vmem:[#allocation23_spill] sm:$0xff] }
 0x3f8   : > { %v4635_v26 = vpop.f32.mrf.mxu1  ;;  %v4020_v45 = vadd.f32 %v3979_v59, %v8204_v57 }
 0x3f9   : > { %6413 = vst [vmem:[%s8056_s27 + $0x8] sm:$0xff] %v6311_v21   ;;  %6086 = vmatmul.msk.bf16.gmra.mxu3 %vm1589_vm12, %v5144_v16  ;;  %v4682_v54 = vadd.f32 %v4635_v26, %v4016_v48  ;;  %v6257_v48 = vunpack.c.l.bf16 %v6401_v31 }
 0x3fb   : > { %v5092_v52 = vadd.f32 %v5045_v17, %v4682_v54  ;;  %v3981_v17 = vpop.f32.mrf.mxu0  ;;  %v6258_v54 = vunpack.c.h.bf16 %v6401_v31 }
 0x3fc   : > { %v5233_v28 = vpop.f32.mrf.mxu3  ;;  %v4021_v26 = vadd.f32 %v3981_v17, %v3722_v36 }
 0x3fd   : > { %v5124_v8 = vmax.f32 %v5092_v52, 0.0  ;;  %v5371_v55 = vadd.f32 %v6249_v5, %v5233_v28 }
 0x3ff   : > { %v5050_v27 = vpop.f32.mrf.mxu2 }
 0x400   : > { %v4637_v32 = vpop.f32.mrf.mxu1 }
 0x401   : > { %v4683_v4 = vadd.f32 %v4637_v32, %v4017_v53 }
 0x403   : > { %v5093_v56 = vadd.f32 %v5047_v19, %v4683_v4  ;;  %v3984_v19 = vpop.f32.mrf.mxu0 }
 0x404   : > { %v5235_v33 = vpop.f32.mrf.mxu3 }
 0x405   : > { %v5125_v0 = vmax.f32 %v5093_v56, 0.0  ;;  %v5372_v63 = vadd.f32 %v6250_v10, %v5235_v33  ;;  %v3724_v56 = vadd.f32 %v7882_v42, %v7886_v51  ;;  %v4022_v33 = vadd.f32 %v3984_v19, %v7879_v15 }
 0x407   : > { %v5145_v23 = vpack.c.bf16 %v5125_v0, %v5124_v8  ;;  %v6316_v37 = vpack.c.bf16 %v5372_v63, %v5371_v55  ;;  %v5052_v44 = vpop.f32.mrf.mxu2  ;;  %v6402_v63 = vld [vmem:[%s6637_s20 + $0x28] sm:$0xff]  }
 0x408   : > { %v4640_v22 = vpop.f32.mrf.mxu1  ;;  %v6262_v2 = vunpack.c.h.bf16 %v6402_v63 }
 0x409   : > { %6414 = vst [vmem:[%s8056_s27 + $0x10] sm:$0xff] %v6316_v37   ;;  %6087 = vmatmul.msk.bf16.gmra.mxu3 %vm1589_vm12, %v5145_v23  ;;  %v4684_v38 = vadd.f32 %v4640_v22, %v4018_v39 }
 0x40b   : > { %v5094_v49 = vadd.f32 %v5050_v27, %v4684_v38  ;;  %v3986_v34 = vpop.f32.mrf.mxu0 }
 0x40c   : > { %v5238_v25 = vpop.f32.mrf.mxu3  ;;  %v4023_v23 = vadd.f32 %v3986_v34, %v3724_v56 }
 0x40d   : > { %v5126_v9 = vmax.f32 %v5094_v49, 0.0  ;;  %v5373_v40 = vadd.f32 %v6253_v1, %v5238_v25 }
 0x40f   : > { %v5055_v7 = vpop.f32.mrf.mxu2 }
 0x410   : > { %v4642_v6 = vpop.f32.mrf.mxu1 }
 0x411   : > { %v4685_v50 = vadd.f32 %v4642_v6, %v4019_v18 }
 0x413   : > { %v5095_v35 = vadd.f32 %v5052_v44, %v4685_v50  ;;  %v6261_v44 = vunpack.c.l.bf16 %v6402_v63  ;;  %v3989_v39 = vpop.f32.mrf.mxu0  ;;  %v8205_v50 = vld [vmem:[#allocation24_spill] sm:$0xff] }
 0x414   : > { %v5240_v20 = vpop.f32.mrf.mxu3  ;;  %v4024_v1 = vadd.f32 %v3989_v39, %v7897_v47 }
 0x415   : > { %v5127_v30 = vmax.f32 %v5095_v35, 0.0  ;;  %v5374_v46 = vadd.f32 %v6254_v3, %v5240_v20 }
 0x417   : > { %v5146_v24 = vpack.c.bf16 %v5127_v30, %v5126_v9  ;;  %v6321_v13 = vpack.c.bf16 %v5374_v46, %v5373_v40  ;;  %v5057_v14 = vpop.f32.mrf.mxu2  ;;  %v6403_v9 = vld [vmem:[%s6637_s20 + $0x30] sm:$0xff]  }
 0x418   : > { %v4645_v43 = vpop.f32.mrf.mxu1  ;;  %v6265_v17 = vunpack.c.l.bf16 %v6403_v9 }
 0x419   : > { %6415 = vst [vmem:[%s8056_s27 + $0x18] sm:$0xff] %v6321_v13   ;;  %6088 = vmatmul.msk.bf16.gmra.mxu3 %vm1589_vm12, %v5146_v24  ;;  %v4686_v21 = vadd.f32 %v4645_v43, %v4020_v45  ;;  %v6266_v13 = vunpack.c.h.bf16 %v6403_v9 }
 0x41b   : > { %v5096_v41 = vadd.f32 %v5055_v7, %v4686_v21  ;;  %v3726_v7 = vadd.f32 %v8046_v60, %v8205_v50  ;;  %v3991_v3 = vpop.f32.mrf.mxu0 }
 0x41c   : > { %v5243_v16 = vpop.f32.mrf.mxu3 }
 0x41d   : > { %v5128_v52 = vmax.f32 %v5096_v41, 0.0  ;;  %v5375_v5 = vadd.f32 %v6257_v48, %v5243_v16  ;;  %v4025_v40 = vadd.f32 %v3991_v3, %v3726_v7 }
 0x41f   : > { %v5060_v53 = vpop.f32.mrf.mxu2 }
 0x420   : > { %v4647_v62 = vpop.f32.mrf.mxu1 }
 0x421   : > { %v4687_v28 = vadd.f32 %v4647_v62, %v4021_v26  ;;  %v6404_v26 = vld [vmem:[%s6637_s20 + $0x38] sm:$0xff]  }
 0x422   : > { %v6269_v19 = vunpack.c.l.bf16 %v6404_v26  ;;  %v6270_v62 = vunpack.c.h.bf16 %v6404_v26  ;;  %v6412_v26 = vld [vmem:[%s6637_s20 + $0x78] sm:$0xff]  }
 0x423   : > { %v5097_v11 = vadd.f32 %v5057_v14, %v4687_v28 }
 0x424   : > { %v5245_v32 = vpop.f32.mrf.mxu3 }
 0x425   : > { %v5129_v58 = vmax.f32 %v5097_v11, 0.0  ;;  %v5376_v12 = vadd.f32 %v6258_v54, %v5245_v32 }
 0x427   : > { %v5147_v4 = vpack.c.bf16 %v5129_v58, %v5128_v52  ;;  %v6326_v27 = vpack.c.bf16 %v5376_v12, %v5375_v5  ;;  %v5062_v0 = vpop.f32.mrf.mxu2 }
 0x428   : > { %v4650_v10 = vpop.f32.mrf.mxu1 }
 0x429   : > { %6416 = vst [vmem:[%s8056_s27 + $0x20] sm:$0xff] %v6326_v27   ;;  %6089 = vmatmul.msk.bf16.gmra.mxu3 %vm1589_vm12, %v5147_v4  ;;  %v4688_v55 = vadd.f32 %v4650_v10, %v4022_v33  ;;  %v6406_v10 = vld [vmem:[%s6637_s20 + $0x48] sm:$0xff]  }
 0x42a   : > { %v6277_v34 = vunpack.c.l.bf16 %v6406_v10  ;;  %v6278_v56 = vunpack.c.h.bf16 %v6406_v10 }
 0x42b   : > { %v5098_v22 = vadd.f32 %v5060_v53, %v4688_v55  ;;  %v6405_v53 = vld [vmem:[%s6637_s20 + $0x40] sm:$0xff]  }
 0x42c   : > { %v5248_v8 = vpop.f32.mrf.mxu3  ;;  %v6273_v32 = vunpack.c.l.bf16 %v6405_v53  ;;  %v6274_v52 = vunpack.c.h.bf16 %v6405_v53 }
 0x42d   : > { %v5130_v38 = vmax.f32 %v5098_v22, 0.0  ;;  %v5377_v29 = vadd.f32 %v6261_v44, %v5248_v8 }
 0x42f   : > { %v5065_v6 = vpop.f32.mrf.mxu2 }
 0x430   : > { %v4652_v37 = vpop.f32.mrf.mxu1 }
 0x431   : > { %v4689_v61 = vadd.f32 %v4652_v37, %v4023_v23  ;;  %v6407_v23 = vld [vmem:[%s6637_s20 + $0x50] sm:$0xff]  }
 0x432   : > { %v6281_v37 = vunpack.c.l.bf16 %v6407_v23  ;;  %v6282_v22 = vunpack.c.h.bf16 %v6407_v23 }
 0x433   : > { %v5099_v59 = vadd.f32 %v5062_v0, %v4689_v61 }
 0x434   : > { %v5250_v25 = vpop.f32.mrf.mxu3 }
 0x435   : > { %v5131_v42 = vmax.f32 %v5099_v59, 0.0  ;;  %v5378_v51 = vadd.f32 %v6262_v2, %v5250_v25  ;;  %v6408_v25 = vld [vmem:[%s6637_s20 + $0x58] sm:$0xff]  }
 0x437   : > { %v5148_v15 = vpack.c.bf16 %v5131_v42, %v5130_v38  ;;  %v6331_v18 = vpack.c.bf16 %v5378_v51, %v5377_v29  ;;  %v5067_v43 = vpop.f32.mrf.mxu2  ;;  %v6285_v38 = vunpack.c.l.bf16 %v6408_v25  ;;  %v6286_v29 = vunpack.c.h.bf16 %v6408_v25 }
 0x438   : > { %v4655_v49 = vpop.f32.mrf.mxu1 }
 0x439   : > { %6417 = vst [vmem:[%s8056_s27 + $0x28] sm:$0xff] %v6331_v18   ;;  %6090 = vmatmul.msk.bf16.gmra.mxu3 %vm1589_vm12, %v5148_v15  ;;  %v4690_v20 = vadd.f32 %v4655_v49, %v4024_v1  ;;  %v6409_v49 = vld [vmem:[%s6637_s20 + $0x60] sm:$0xff]  }
 0x43a   : > { %v6289_v1 = vunpack.c.l.bf16 %v6409_v49  ;;  %v6290_v50 = vunpack.c.h.bf16 %v6409_v49 }
 0x43b   : > { %v5100_v46 = vadd.f32 %v5065_v6, %v4690_v20 }
 0x43c   : > { %v5253_v35 = vpop.f32.mrf.mxu3 }
 0x43d   : > { %v5132_v57 = vmax.f32 %v5100_v46, 0.0  ;;  %v5379_v47 = vadd.f32 %v6265_v17, %v5253_v35 }
 0x440   : > { %v4657_v30 = vpop.f32.mrf.mxu1 }
 0x441   : > { %v4691_v24 = vadd.f32 %v4657_v30, %v4025_v40  ;;  %v6410_v40 = vld [vmem:[%s6637_s20 + $0x68] sm:$0xff]  }
 0x442   : > { %v6293_v30 = vunpack.c.l.bf16 %v6410_v40  ;;  %v6294_v46 = vunpack.c.h.bf16 %v6410_v40 }
 0x443   : > { %v5101_v14 = vadd.f32 %v5067_v43, %v4691_v24 }
 0x444   : > { %v5255_v36 = vpop.f32.mrf.mxu3 }
 0x445   : > { %v5133_v45 = vmax.f32 %v5101_v14, 0.0  ;;  %v5380_v60 = vadd.f32 %v6266_v13, %v5255_v36  ;;  %v6411_v36 = vld [vmem:[%s6637_s20 + $0x70] sm:$0xff]   ;;  %s6491_s20 = sshra.s32 %s5479_s7, 4  ;;  %s6492_s20 = int_to_ptr.hbm [resolvable:$true] %s6491_s20 }
 0x446   : > { %s6493_s19 = scalar_lea.hbm %s6492_s20, 128  ;;  %p6498_p0 = scmp.lt.s32.totalorder %s6492_s20, %s8152_s4 }
 0x447   : > { %v5149_v16 = vpack.c.bf16 %v5133_v45, %v5132_v57  ;;  %v6336_v21 = vpack.c.bf16 %v5380_v60, %v5379_v47  ;;  %v6297_v57 = vunpack.c.l.bf16 %v6411_v36  ;;  %v6298_v47 = vunpack.c.h.bf16 %v6411_v36  ;;  %p6494_p11 = scmp.ne.s32.totalorder %s6492_s20, %s6493_s19  ;;  %p6499_p1 = scmp.lt.s32.totalorder %s6497_s11, %s6493_s19 }
 0x449   : > { %6418 = vst [vmem:[%s8056_s27 + $0x30] sm:$0xff] %v6336_v21   ;;  %6091 = vmatmul.msk.bf16.gmra.mxu3 %vm1589_vm12, %v5149_v16  ;;  %p6495_p12 = pnand %p6494_p11, %p6607_p5  ;;  %p6500_p2 = por %p6499_p1, %p6498_p0 }
 0x44b   : > { %p6496_p13 = pneg %p6495_p12 }
 0x44c   : > { %v5258_v31 = vpop.f32.mrf.mxu3 }
 0x44d   : > { %v5381_v48 = vadd.f32 %v6269_v19, %v5258_v31  ;;  %v6301_v19 = vunpack.c.l.bf16 %v6412_v26  ;;  %p6501_p3 = pnand %p6500_p2, %p6496_p13 }
 0x454   : > { %v5260_v41 = vpop.f32.mrf.mxu3 }
 0x455   : > { %v5382_v28 = vadd.f32 %v6270_v62, %v5260_v41  ;;  %v6302_v62 = vunpack.c.h.bf16 %v6412_v26 }
 0x457   : > { %v6341_v54 = vpack.c.bf16 %v5382_v28, %v5381_v48 }
 0x459   : > { %6419 = vst [vmem:[%s8056_s27 + $0x38] sm:$0xff] %v6341_v54  }
 0x45c   : > { %v5263_v11 = vpop.f32.mrf.mxu3 }
 0x45d   : > { %v5383_v58 = vadd.f32 %v6273_v32, %v5263_v11 }
 0x464   : > { %v5265_v5 = vpop.f32.mrf.mxu3 }
 0x465   : > { %v5384_v12 = vadd.f32 %v6274_v52, %v5265_v5 }
 0x467   : > { %v6346_v4 = vpack.c.bf16 %v5384_v12, %v5383_v58 }
 0x469   : > { %6420 = vst [vmem:[%s8056_s27 + $0x40] sm:$0xff] %v6346_v4  }
 0x46c   : > { %v5268_v27 = vpop.f32.mrf.mxu3 }
 0x46d   : > { %v5385_v8 = vadd.f32 %v6277_v34, %v5268_v27 }
 0x474   : > { %v5270_v33 = vpop.f32.mrf.mxu3 }
 0x475   : > { %v5386_v55 = vadd.f32 %v6278_v56, %v5270_v33 }
 0x477   : > { %v6351_v0 = vpack.c.bf16 %v5386_v55, %v5385_v8 }
 0x479   : > { %6421 = vst [vmem:[%s8056_s27 + $0x48] sm:$0xff] %v6351_v0  }
 0x47c   : > { %v5273_v63 = vpop.f32.mrf.mxu3 }
 0x47d   : > { %v5387_v61 = vadd.f32 %v6281_v37, %v5273_v63 }
 0x484   : > { %v5275_v44 = vpop.f32.mrf.mxu3 }
 0x485   : > { %v5388_v2 = vadd.f32 %v6282_v22, %v5275_v44 }
 0x487   : > { %v6356_v39 = vpack.c.bf16 %v5388_v2, %v5387_v61 }
 0x489   : > { %6422 = vst [vmem:[%s8056_s27 + $0x50] sm:$0xff] %v6356_v39  }
 0x48c   : > { %v5278_v59 = vpop.f32.mrf.mxu3 }
 0x48d   : > { %v5389_v51 = vadd.f32 %v6285_v38, %v5278_v59 }
 0x494   : > { %v5280_v42 = vpop.f32.mrf.mxu3 }
 0x495   : > { %v5390_v15 = vadd.f32 %v6286_v29, %v5280_v42 }
 0x497   : > { %v6361_v18 = vpack.c.bf16 %v5390_v15, %v5389_v51 }
 0x499   : > { %6423 = vst [vmem:[%s8056_s27 + $0x58] sm:$0xff] %v6361_v18  }
 0x49c   : > { %v5283_v6 = vpop.f32.mrf.mxu3 }
 0x49d   : > { %v5391_v3 = vadd.f32 %v6289_v1, %v5283_v6 }
 0x4a4   : > { %v5285_v7 = vpop.f32.mrf.mxu3 }
 0x4a5   : > { %v5392_v35 = vadd.f32 %v6290_v50, %v5285_v7 }
 0x4a7   : > { %v6366_v20 = vpack.c.bf16 %v5392_v35, %v5391_v3 }
 0x4a9   : > { %6424 = vst [vmem:[%s8056_s27 + $0x60] sm:$0xff] %v6366_v20  }
 0x4ac   : > { %v5288_v9 = vpop.f32.mrf.mxu3 }
 0x4ad   : > { %v5393_v24 = vadd.f32 %v6293_v30, %v5288_v9 }
 0x4b4   : > { %v5290_v17 = vpop.f32.mrf.mxu3 }
 0x4b5   : > { %v5394_v13 = vadd.f32 %v6294_v46, %v5290_v17 }
 0x4b7   : > { %v6371_v43 = vpack.c.bf16 %v5394_v13, %v5393_v24 }
 0x4b9   : > { %6425 = vst [vmem:[%s8056_s27 + $0x68] sm:$0xff] %v6371_v43  }
 0x4bc   : > { %v5293_v14 = vpop.f32.mrf.mxu3 }
 0x4bd   : > { %v5395_v60 = vadd.f32 %v6297_v57, %v5293_v14 }
 0x4c4   : > { %v5295_v45 = vpop.f32.mrf.mxu3 }
 0x4c5   : > { %v5396_v16 = vadd.f32 %v6298_v47, %v5295_v45 }
 0x4c7   : > { %v6376_v21 = vpack.c.bf16 %v5396_v16, %v5395_v60 }
 0x4c9   : > { %6426 = vst [vmem:[%s8056_s27 + $0x70] sm:$0xff] %v6376_v21  }
 0x4cc   : > { %v5298_v31 = vpop.f32.mrf.mxu3 }
 0x4cd   : > { %v5397_v48 = vadd.f32 %v6301_v19, %v5298_v31 }
 0x4d4   : > { %v5300_v41 = vpop.f32.mrf.mxu3 }
 0x4d5   : > { %v5398_v28 = vadd.f32 %v6302_v62, %v5300_v41 }
 0x4d7   : > { %v6381_v54 = vpack.c.bf16 %v5398_v28, %v5397_v48 }
 0x4d9   : > { %6427 = vst [vmem:[%s8056_s27 + $0x78] sm:$0xff] %v6381_v54  }
 0x4da   : > { %6504 = shalt.err (!%p6501_p3)
}
 0x4db   : > { %s6542_s14 = smov 64   ;;  %s6543_s22 = smov 4  }
 0x4dc   : > { %6434 = dma.vmem_to_hbm [thread:$0]  (%p6607_p5), %s5477_s6, 2048, %s5479_s7, %s5464_s8, %s6542_s14, %s6542_s14, %s6543_s22  }
 0x4dd PF: > { %p6440_p4 = scmp.ge.s32.totalorder %s6539_s18, 2  ;;  %s5493_s23 = sand.u32 1, %s6527_s15  }
 0x4de   : > { %s5494_s27 = scalar_lea.sflag [#allocation4], %s5493_s23 }
 0x4df   : > { %p6437_p7 = pnand %p6440_p4, %p6611_p6 }
 0x4e1   : > { %p6438_p8 = pneg %p6437_p7 }
 0x4e3   : > { %6522 = dma.done.wait (%p6438_p8), %s5494_s27, 2048  }
 0x4e4   : > { %6524 = vsyncadd (%p6438_p8), %s5494_s27, 4294965248  ;;  %p14_p9 = scmp.ge.s32.totalorder %s6594_s21, 4   ;;  %s8206_s15 = smov %s6531_s16 }
 0x4e5   : > { %s8207_s16 = smov %s6535_s17  ;;  %s8208_s17 = smov %s6605_s24 }
 0x4e6   : > { %s8209_s18 = smov %s6594_s21  ;;  %16 = sbr.rel (!%p14_p9) target bundleno = 3 (0x3), region = 82 }
 0x4eb   :  { %5500 = vsyncpa [#allocation4], 1 }
 0x4ec   :  { %5502 = vsyncpa [#allocation4 + $0x1], 1 }

</bundles_post_ra>
